<compile_context>
chip_gen: v5e
topology: v5e:2x2
jax: 0.10.0
libtpu: 0.0.40
codegen_flags: <defaults>
</compile_context>

<pallas_src>
import jax
import jax.numpy as jnp
from jax import lax
from jax.experimental import pallas as pl
from jax.experimental.pallas import tpu as pltpu


def _round_up(x, m):
    return (x + m - 1) // m * m


# ---------------------------------------------------------------------------
# Kernel A: tiled  out = A @ W + b  (used for input projection and vocab proj)
# ---------------------------------------------------------------------------
def _matmul_bias_kernel(a_ref, w_ref, b_ref, o_ref):
    o_ref[...] = (jnp.dot(a_ref[...], w_ref[...],
                          preferred_element_type=jnp.float32)
                  + b_ref[...]).astype(o_ref.dtype)


def _pick_tile(n, candidates):
    for c in candidates:
        if n % c == 0:
            return c
    return n


def _matmul_bias(a, w, b, out_dtype):
    """a:(M,K) bf16, w:(K,N) bf16, b:(1,N) f32 -> (M,N) out_dtype.
    Grid is (N-tiles outer, M-tiles inner) so the W tile is held across the
    inner loop (big when N >> M, e.g. the vocab projection)."""
    M, K = a.shape
    _, N = w.shape
    TM = _pick_tile(M, (256, 128, 64, 32, 16))
    TN = _pick_tile(N, (512, 256, 128))
    bytes_out = int(jnp.dtype(out_dtype).itemsize)
    return pl.pallas_call(
        _matmul_bias_kernel,
        out_shape=jax.ShapeDtypeStruct((M, N), out_dtype),
        grid_spec=pltpu.PrefetchScalarGridSpec(
            num_scalar_prefetch=0,
            grid=(N // TN, M // TM),                      # N outer, M inner
            in_specs=[
                pl.BlockSpec((TM, K), lambda n, m: (m, 0)),   # A rows
                pl.BlockSpec((K, TN), lambda n, m: (0, n)),   # W tile (outer only)
                pl.BlockSpec((1, TN), lambda n, m: (0, n)),   # bias tile
            ],
            out_specs=pl.BlockSpec((TM, TN), lambda n, m: (m, n)),
        ),
        compiler_params=pltpu.CompilerParams(
            dimension_semantics=("parallel", "parallel")),
        cost_estimate=pl.CostEstimate(
            flops=2 * M * K * N,
            transcendentals=0,
            bytes_accessed=M * K * 2 + K * N * 2 + M * N * bytes_out),
    )(a, w, b)


# ---------------------------------------------------------------------------
# Kernel B: sequential LSTM recurrence (gates_x precomputed; h @ W_hh per step)
# ---------------------------------------------------------------------------
def _lstm_recurrence_kernel(gx_ref, whh_ref, h_out_ref, h_ref, c_ref):
    """gx_ref:(Tc,B_blk,4H_pad) f32 precomputed x@W_ih+b (time-major chunk)
    whh_ref:(H_pad,4H_pad) bf16 | h_out_ref:(Tc,B_blk,H_pad) bf16
    h_ref:(B_blk,H_pad) bf16 scratch | c_ref:(B_blk,H_pad) f32 scratch.
    Scratch persists across time chunks; PyTorch gate order [i, f, g, o]."""
    Tc = gx_ref.shape[0]
    H = h_ref.shape[1]

    @pl.when(pl.program_id(1) == 0)      # first time chunk of this batch block
    def _():
        h_ref[...] = jnp.zeros_like(h_ref)
        c_ref[...] = jnp.zeros_like(c_ref)

    def step(t, carry):
        gates = gx_ref[t] + jnp.dot(h_ref[...], whh_ref[...],
                                    preferred_element_type=jnp.float32)
        i_g = jax.nn.sigmoid(gates[:, 0 * H:1 * H])
        f_g = jax.nn.sigmoid(gates[:, 1 * H:2 * H])
        g_g = jnp.tanh(gates[:, 2 * H:3 * H])
        o_g = jax.nn.sigmoid(gates[:, 3 * H:4 * H])
        c_new = f_g * c_ref[...] + i_g * g_g
        h_new = (o_g * jnp.tanh(c_new)).astype(jnp.bfloat16)
        c_ref[...] = c_new
        h_ref[...] = h_new           # bf16: reused directly as next matmul operand
        h_out_ref[t] = h_new
        return carry

    # Fully unroll the short per-chunk loop (cross-iteration LLO visibility).
    lax.fori_loop(0, Tc, step, 0, unroll=True)


def _pick_time_chunk(T, B_blk, H_pad, budget_bytes=8 << 20, max_tc=16):
    """Largest divisor of T (<= max_tc) whose double-buffered gates_x + h_out
    chunks stay under budget_bytes (keeps kernel-1 VMEM well under the v7x
    scoped limit while still allowing DMA/compute overlap)."""
    per_t = B_blk * (4 * H_pad * 4 + H_pad * 2)   # gates_x f32 + h_out bf16
    best = 1
    for tc in range(1, min(T, max_tc) + 1):
        if T % tc == 0 and 2 * tc * per_t <= budget_bytes:
            best = tc
    return best


# ---------------------------------------------------------------------------
# Wrapper
# ---------------------------------------------------------------------------
def _pad2(a, rows, cols):
    return jnp.pad(a, ((0, rows - a.shape[0]), (0, cols - a.shape[1])))


def _pad_gate_cols(w, H, H_pad):
    # (R, 4*H) -> (R, 4*H_pad): each gate block zero-padded to H_pad lanes.
    R = w.shape[0]
    w4 = w.reshape(R, 4, H)
    w4 = jnp.pad(w4, ((0, 0), (0, 0), (0, H_pad - H)))
    return w4.reshape(R, 4 * H_pad)


@jax.jit
def decoder_rnn_forward(features, captions, params):
    """Mirrors DecoderRNN.forward(features, captions).
    features: (B, E) f32, captions: (B, T) int32  ->  (B, T, V) f32."""
    # --- glue: embedding lookup + concat (batch_first, like PyTorch) ---
    emb = jnp.take(params["embedding"], captions[:, :-1], axis=0)       # (B, T-1, E)
    inputs = jnp.concatenate([features[:, None, :], emb], axis=1)       # (B, T, E)
    B, T, E = inputs.shape
    H = params["w_hh"].shape[0]
    V = params["w_out"].shape[1]

    E_pad = _round_up(E, 128)
    H_pad = _round_up(H, 128)
    V_pad = _round_up(V, 128)
    B_pad = _round_up(B, 16)            # bf16 activations -> 16-sublane friendly

    # --- padded parameters (bf16 MXU operands, f32 biases) ---
    w_ih_p = _pad2(_pad_gate_cols(params["w_ih"], H, H_pad),
                   E_pad, 4 * H_pad).astype(jnp.bfloat16)
    w_hh_p = _pad2(_pad_gate_cols(params["w_hh"], H, H_pad),
                   H_pad, 4 * H_pad).astype(jnp.bfloat16)
    b_cat = _pad_gate_cols(params["b"], H, H_pad).astype(jnp.float32)   # (1, 4H_pad)
    w_out_p = _pad2(params["w_out"], H_pad, V_pad).astype(jnp.bfloat16)
    b_out_p = _pad2(params["b_out"], 1, V_pad).astype(jnp.float32)

    # --- inputs: pad + time-major + bf16 (small E-wide tensor; the big V-wide
    #     logits output stays batch-first so it is never transposed) ---
    x = jnp.pad(inputs, ((0, B_pad - B), (0, 0), (0, E_pad - E)))
    x_tm = jnp.transpose(x, (1, 0, 2)).astype(jnp.bfloat16)             # (T, B_pad, E_pad)

    # --- kernel A: hoisted input projection  gates_x = X @ W_ih + b  (f32) ---
    gates_x = _matmul_bias(x_tm.reshape(T * B_pad, E_pad), w_ih_p, b_cat,
                           out_dtype=jnp.float32)
    gates_x = gates_x.reshape(T, B_pad, 4 * H_pad)                      # time-major

    # --- batch / time chunking for the recurrence grid ---
    if B_pad >= 32 and B_pad % 32 == 0:
        B_blk = B_pad // 2            # two batch blocks -> both v7x TensorCores
    else:
        B_blk = B_pad
    Tc = _pick_time_chunk(T, B_blk, H_pad)

    # --- kernel B: recurrence (h @ W_hh per step, state in scratch) ---
    h_all = pl.pallas_call(
        _lstm_recurrence_kernel,
        out_shape=jax.ShapeDtypeStruct((T, B_pad, H_pad), jnp.bfloat16),
        grid_spec=pltpu.PrefetchScalarGridSpec(
            num_scalar_prefetch=0,
            grid=(B_pad // B_blk, T // Tc),          # batch parallel, time serial
            in_specs=[
                pl.BlockSpec((Tc, B_blk, 4 * H_pad), lambda b, t: (t, b, 0)),  # gates_x
                pl.BlockSpec((H_pad, 4 * H_pad), lambda b, t: (0, 0)),         # W_hh
            ],
            out_specs=pl.BlockSpec((Tc, B_blk, H_pad), lambda b, t: (t, b, 0)),
            scratch_shapes=[pltpu.VMEM((B_blk, H_pad), jnp.bfloat16),   # h state
                            pltpu.VMEM((B_blk, H_pad), jnp.float32)],   # c state
        ),
        compiler_params=pltpu.CompilerParams(
            dimension_semantics=("parallel", "arbitrary")),
        cost_estimate=pl.CostEstimate(
            flops=2 * T * B_pad * H_pad * 4 * H_pad,
            transcendentals=5 * T * B_pad * H_pad,
            bytes_accessed=(T * B_pad * 4 * H_pad * 4      # gates_x read
                            + H_pad * 4 * H_pad * 2        # W_hh
                            + T * B_pad * H_pad * 2)),     # h_out write
    )(gates_x, w_hh_p)

    # --- reorder hidden states batch-first (small H-wide tensor) and flatten ---
    h_rows = jnp.transpose(h_all, (1, 0, 2)).reshape(B_pad * T, H_pad)  # bf16

    # --- kernel A again: hidden -> vocab projection (f32 logits, as in PyTorch) ---
    logits = _matmul_bias(h_rows, w_out_p, b_out_p, out_dtype=jnp.float32)

    return logits.reshape(B_pad, T, V_pad)[:B, :, :V]                   # (B, T, V)


# ---------------------------------------------------------------------------
# Pure-JAX reference (lax.scan) with PyTorch LSTM semantics.
# matmul_dtype=bf16 mirrors the kernel's MXU operand dtype (f32 accumulation).
# ---------------------------------------------------------------------------
def decoder_rnn_reference(features, captions, params, matmul_dtype=jnp.float32):
    emb = jnp.take(params["embedding"], captions[:, :-1], axis=0)
    inputs = jnp.concatenate([features[:, None, :], emb], axis=1)         # (B, T, E)
    x = jnp.transpose(inputs, (1, 0, 2))                                  # (T, B, E)
    B = x.shape[1]
    H = params["w_hh"].shape[0]

    def mm(a, b):
        return jnp.dot(a.astype(matmul_dtype), b.astype(matmul_dtype),
                       preferred_element_type=jnp.float32)

    def step(carry, x_t):
        h, c = carry
        gates = mm(x_t, params["w_ih"]) + mm(h, params["w_hh"]) + params["b"]
        i_g = jax.nn.sigmoid(gates[:, 0 * H:1 * H])
        f_g = jax.nn.sigmoid(gates[:, 1 * H:2 * H])
        g_g = jnp.tanh(gates[:, 2 * H:3 * H])
        o_g = jax.nn.sigmoid(gates[:, 3 * H:4 * H])
        c_new = f_g * c + i_g * g_g
        h_new = o_g * jnp.tanh(c_new)
        out = mm(h_new, params["w_out"]) + params["b_out"]
        return (h_new, c_new), out

    init = (jnp.zeros((B, H), jnp.float32), jnp.zeros((B, H), jnp.float32))
    _, outs = lax.scan(step, init, x)                                     # (T, B, V)
    return jnp.transpose(outs, (1, 0, 2))


def init_params(key, embed_size, hidden_size, vocab_size):
    """Synthetic params with PyTorch-equivalent shapes (weights stored transposed).
    'b' is the pre-summed b_ih + b_hh (single (1, 4H) bias)."""
    ks = jax.random.split(key, 6)
    scale = 0.1
    E, H, V = embed_size, hidden_size, vocab_size
    return {
        "embedding": scale * jax.random.normal(ks[0], (V, E), jnp.float32),
        "w_ih": scale * jax.random.normal(ks[1], (E, 4 * H), jnp.float32),
        "w_hh": scale * jax.random.normal(ks[2], (H, 4 * H), jnp.float32),
        "b": scale * jax.random.normal(ks[3], (1, 4 * H), jnp.float32),
        "w_out": scale * jax.random.normal(ks[4], (H, V), jnp.float32),
        "b_out": scale * jax.random.normal(ks[5], (1, V), jnp.float32),
    }


if __name__ == "__main__":
    embed_size, hidden_size, vocab_size = 32, 32, 40
    batch, caption_len = 2, 8

    key = jax.random.PRNGKey(0)
    k_param, k_feat, k_cap = jax.random.split(key, 3)

    params = init_params(k_param, embed_size, hidden_size, vocab_size)
    features = jax.random.normal(k_feat, (batch, embed_size), jnp.float32)
    captions = jax.random.randint(k_cap, (batch, caption_len), 0, vocab_size,
                                  dtype=jnp.int32)

    out = decoder_rnn_forward(features, captions, params)
    out = jax.block_until_ready(out)
    assert out.shape == (batch, caption_len, vocab_size), out.shape

    # Numerics-matched check (bf16 MXU operands, f32 accumulation, like the kernel).
    ref_bf16 = decoder_rnn_reference(features, captions, params, jnp.bfloat16)
    assert jnp.allclose(out, ref_bf16, atol=1e-3, rtol=1e-3), \
        float(jnp.max(jnp.abs(out - ref_bf16)))

    # Loose sanity check against the full-f32 PyTorch-semantics reference.
    ref_f32 = decoder_rnn_reference(features, captions, params, jnp.float32)
    assert jnp.allclose(out, ref_f32, atol=1e-1, rtol=1e-1), \
        float(jnp.max(jnp.abs(out - ref_f32)))

    print("KERNEL_OK")
</pallas_src>

<mosaic_0001>
module attributes {stable_mosaic.version = 11 : i64} {
  func.func @_matmul_bias_kernel(%arg0: i32, %arg1: i32, %arg2: memref<128x128xbf16, #tpu.memory_space<vmem>>, %arg3: memref<128x512xbf16, #tpu.memory_space<vmem>>, %arg4: memref<1x512xf32, #tpu.memory_space<vmem>>, %arg5: memref<128x512xf32, #tpu.memory_space<vmem>>) attributes {dimension_semantics = [#tpu.dimension_semantics<parallel>, #tpu.dimension_semantics<parallel>], iteration_bounds = array<i64: 1, 1>, scalar_prefetch = 0 : i64, scratch_operands = 0 : i64, tpu.core_type = #tpu.core_type<tc>, window_params = [{transform_indices = @transform_0, window_bounds = array<i64: 128, 128>}, {transform_indices = @transform_1, window_bounds = array<i64: 128, 512>}, {transform_indices = @transform_2, window_bounds = array<i64: 1, 512>}, {transform_indices = @transform_3, window_bounds = array<i64: 128, 512>}]} {
    %c0 = arith.constant 0 : index
    %c0_0 = arith.constant 0 : index
    %0 = vector.load %arg2[%c0, %c0_0] : memref<128x128xbf16, #tpu.memory_space<vmem>>, vector<128x128xbf16>
    %c0_1 = arith.constant 0 : index
    %c0_2 = arith.constant 0 : index
    %1 = vector.load %arg3[%c0_1, %c0_2] : memref<128x512xbf16, #tpu.memory_space<vmem>>, vector<128x512xbf16>
    %cst = arith.constant dense<0.000000e+00> : vector<128x512xf32>
    %2 = tpu.matmul %0, %1, %cst {dimension_numbers = #tpu.dot_dimension_numbers<[1], [0], [0], [1], [0, 0, 1, 1], [], []>} : vector<128x128xbf16>, vector<128x512xbf16>, vector<128x512xf32> -> vector<128x512xf32>
    %c0_3 = arith.constant 0 : index
    %c0_4 = arith.constant 0 : index
    %3 = vector.load %arg4[%c0_3, %c0_4] : memref<1x512xf32, #tpu.memory_space<vmem>>, vector<1x512xf32>
    %4 = vector.broadcast %3 : vector<1x512xf32> to vector<128x512xf32>
    %5 = arith.addf %2, %4 : vector<128x512xf32>
    %c0_5 = arith.constant 0 : index
    %c0_6 = arith.constant 0 : index
    %6 = vector.load %arg5[%c0_5, %c0_6] : memref<128x512xf32, #tpu.memory_space<vmem>>, vector<128x512xf32>
    tpu.vector_store %arg5[%c0_5, %c0_6], %5 {strides = array<i32>} : memref<128x512xf32, #tpu.memory_space<vmem>>, vector<128x512xf32>,
    return
  }
  func.func @transform_0(%arg0: i32, %arg1: i32) -> (i32, i32) {
    %c0_i32 = arith.constant 0 : i32
    %c0_i32_0 = arith.constant 0 : i32
    return %arg1, %c0_i32 : i32, i32
  }
  func.func @transform_1(%arg0: i32, %arg1: i32) -> (i32, i32) {
    %c0_i32 = arith.constant 0 : i32
    %c0_i32_0 = arith.constant 0 : i32
    return %c0_i32, %arg0 : i32, i32
  }
  func.func @transform_2(%arg0: i32, %arg1: i32) -> (i32, i32) {
    %c0_i32 = arith.constant 0 : i32
    %c0_i32_0 = arith.constant 0 : i32
    return %c0_i32, %arg0 : i32, i32
  }
  func.func @transform_3(%arg0: i32, %arg1: i32) -> (i32, i32) {
    %c0_i32 = arith.constant 0 : i32
    return %arg1, %arg0 : i32, i32
  }
}

module attributes {stable_mosaic.version = 11 : i64} {
  func.func @_lstm_recurrence_kernel(%arg0: i32, %arg1: i32, %arg2: memref<8x16x512xf32, #tpu.memory_space<vmem>>, %arg3: memref<128x512xbf16, #tpu.memory_space<vmem>>, %arg4: memref<8x16x128xbf16, #tpu.memory_space<vmem>>, %arg5: memref<16x128xbf16, #tpu.memory_space<vmem>>, %arg6: memref<16x128xf32, #tpu.memory_space<vmem>>) attributes {dimension_semantics = [#tpu.dimension_semantics<parallel>, #tpu.dimension_semantics<arbitrary>], iteration_bounds = array<i64: 1, 1>, scalar_prefetch = 0 : i64, scratch_operands = 2 : i64, tpu.core_type = #tpu.core_type<tc>, window_params = [{transform_indices = @transform_0, window_bounds = array<i64: 8, 16, 512>}, {pipeline_mode = #tpu.pipeline_mode<synchronous>, transform_indices = @transform_1, window_bounds = array<i64: 128, 512>}, {transform_indices = @transform_2, window_bounds = array<i64: 8, 16, 128>}]} {
    %c0_i32 = arith.constant 0 : i32
    %0 = arith.cmpi eq, %arg1, %c0_i32 : i32
    %1 = arith.extui %0 : i1 to i32
    %c0_i32_0 = arith.constant 0 : i32
    %2 = arith.cmpi ne, %1, %c0_i32_0 : i32
    scf.if %2 {
      %cst_144 = arith.constant 0.000000e+00 : bf16
      %323 = vector.broadcast %cst_144 : bf16 to vector<16x128xbf16>
      %c0_145 = arith.constant 0 : index
      %c0_146 = arith.constant 0 : index
      %324 = vector.load %arg5[%c0_145, %c0_146] : memref<16x128xbf16, #tpu.memory_space<vmem>>, vector<16x128xbf16>
      tpu.vector_store %arg5[%c0_145, %c0_146], %323 {strides = array<i32>} : memref<16x128xbf16, #tpu.memory_space<vmem>>, vector<16x128xbf16>,
      %cst_147 = arith.constant 0.000000e+00 : f32
      %325 = vector.broadcast %cst_147 : f32 to vector<16x128xf32>
      %c0_148 = arith.constant 0 : index
      %c0_149 = arith.constant 0 : index
      %326 = vector.load %arg6[%c0_148, %c0_149] : memref<16x128xf32, #tpu.memory_space<vmem>>, vector<16x128xf32>
      tpu.vector_store %arg6[%c0_148, %c0_149], %325 {strides = array<i32>} : memref<16x128xf32, #tpu.memory_space<vmem>>, vector<16x128xf32>,
    } else {
    }
    %c0_i32_1 = arith.constant 0 : i32
    %3 = arith.index_cast %c0_i32_1 : i32 to index
    %c0 = arith.constant 0 : index
    %c0_2 = arith.constant 0 : index
    %4 = vector.load %arg2[%3, %c0, %c0_2] : memref<8x16x512xf32, #tpu.memory_space<vmem>>, vector<1x16x512xf32>
    %5 = vector.shape_cast %4 : vector<1x16x512xf32> to vector<16x512xf32>
    %c0_3 = arith.constant 0 : index
    %c0_4 = arith.constant 0 : index
    %6 = vector.load %arg5[%c0_3, %c0_4] : memref<16x128xbf16, #tpu.memory_space<vmem>>, vector<16x128xbf16>
    %c0_5 = arith.constant 0 : index
    %c0_6 = arith.constant 0 : index
    %7 = vector.load %arg3[%c0_5, %c0_6] : memref<128x512xbf16, #tpu.memory_space<vmem>>, vector<128x512xbf16>
    %cst = arith.constant dense<0.000000e+00> : vector<16x512xf32>
    %8 = tpu.matmul %6, %7, %cst {dimension_numbers = #tpu.dot_dimension_numbers<[1], [0], [0], [1], [0, 0, 1, 1], [], []>} : vector<16x128xbf16>, vector<128x512xbf16>, vector<16x512xf32> -> vector<16x512xf32>
    %9 = arith.addf %5, %8 : vector<16x512xf32>
    %10 = vector.extract_strided_slice %9 {offsets = [0, 0], sizes = [16, 128], strides = [1, 1]} : vector<16x512xf32> to vector<16x128xf32>
    %11 = arith.negf %10 : vector<16x128xf32>
    %12 = math.exp %11 : vector<16x128xf32>
    %cst_7 = arith.constant 1.000000e+00 : f32
    %13 = vector.broadcast %cst_7 : f32 to vector<16x128xf32>
    %14 = arith.addf %13, %12 : vector<16x128xf32>
    %15 = arith.divf %13, %14 : vector<16x128xf32>
    %16 = vector.extract_strided_slice %9 {offsets = [0, 128], sizes = [16, 128], strides = [1, 1]} : vector<16x512xf32> to vector<16x128xf32>
    %17 = arith.negf %16 : vector<16x128xf32>
    %18 = math.exp %17 : vector<16x128xf32>
    %cst_8 = arith.constant 1.000000e+00 : f32
    %19 = vector.broadcast %cst_8 : f32 to vector<16x128xf32>
    %20 = arith.addf %19, %18 : vector<16x128xf32>
    %21 = arith.divf %19, %20 : vector<16x128xf32>
    %22 = vector.extract_strided_slice %9 {offsets = [0, 256], sizes = [16, 128], strides = [1, 1]} : vector<16x512xf32> to vector<16x128xf32>
    %23 = math.tanh %22 : vector<16x128xf32>
    %24 = vector.extract_strided_slice %9 {offsets = [0, 384], sizes = [16, 128], strides = [1, 1]} : vector<16x512xf32> to vector<16x128xf32>
    %25 = arith.negf %24 : vector<16x128xf32>
    %26 = math.exp %25 : vector<16x128xf32>
    %cst_9 = arith.constant 1.000000e+00 : f32
    %27 = vector.broadcast %cst_9 : f32 to vector<16x128xf32>
    %28 = arith.addf %27, %26 : vector<16x128xf32>
    %29 = arith.divf %27, %28 : vector<16x128xf32>
    %c0_10 = arith.constant 0 : index
    %c0_11 = arith.constant 0 : index
    %30 = vector.load %arg6[%c0_10, %c0_11] : memref<16x128xf32, #tpu.memory_space<vmem>>, vector<16x128xf32>
    %31 = arith.mulf %21, %30 : vector<16x128xf32>
    %32 = arith.mulf %15, %23 : vector<16x128xf32>
    %33 = arith.addf %31, %32 : vector<16x128xf32>
    %34 = math.tanh %33 : vector<16x128xf32>
    %35 = arith.mulf %29, %34 : vector<16x128xf32>
    %36 = arith.truncf %35 : vector<16x128xf32> to vector<16x128xbf16>
    %c0_12 = arith.constant 0 : index
    %c0_13 = arith.constant 0 : index
    %37 = vector.load %arg6[%c0_12, %c0_13] : memref<16x128xf32, #tpu.memory_space<vmem>>, vector<16x128xf32>
    tpu.vector_store %arg6[%c0_12, %c0_13], %33 {strides = array<i32>} : memref<16x128xf32, #tpu.memory_space<vmem>>, vector<16x128xf32>,
    %c0_14 = arith.constant 0 : index
    %c0_15 = arith.constant 0 : index
    %38 = vector.load %arg5[%c0_14, %c0_15] : memref<16x128xbf16, #tpu.memory_space<vmem>>, vector<16x128xbf16>
    tpu.vector_store %arg5[%c0_14, %c0_15], %36 {strides = array<i32>} : memref<16x128xbf16, #tpu.memory_space<vmem>>, vector<16x128xbf16>,
    %39 = arith.index_cast %c0_i32_1 : i32 to index
    %c0_16 = arith.constant 0 : index
    %c0_17 = arith.constant 0 : index
    %40 = vector.load %arg4[%39, %c0_16, %c0_17] : memref<8x16x128xbf16, #tpu.memory_space<vmem>>, vector<1x16x128xbf16>
    %41 = vector.shape_cast %40 : vector<1x16x128xbf16> to vector<16x128xbf16>
    %42 = vector.shape_cast %36 : vector<16x128xbf16> to vector<1x16x128xbf16>
    tpu.vector_store %arg4[%39, %c0_16, %c0_17], %42 {strides = array<i32>} : memref<8x16x128xbf16, #tpu.memory_space<vmem>>, vector<1x16x128xbf16>,
    %c1_i32 = arith.constant 1 : i32
    %43 = arith.index_cast %c1_i32 : i32 to index
    %c0_18 = arith.constant 0 : index
    %c0_19 = arith.constant 0 : index
    %44 = vector.load %arg2[%43, %c0_18, %c0_19] : memref<8x16x512xf32, #tpu.memory_space<vmem>>, vector<1x16x512xf32>
    %45 = vector.shape_cast %44 : vector<1x16x512xf32> to vector<16x512xf32>
    %c0_20 = arith.constant 0 : index
    %c0_21 = arith.constant 0 : index
    %46 = vector.load %arg5[%c0_20, %c0_21] : memref<16x128xbf16, #tpu.memory_space<vmem>>, vector<16x128xbf16>
    %c0_22 = arith.constant 0 : index
    %c0_23 = arith.constant 0 : index
    %47 = vector.load %arg3[%c0_22, %c0_23] : memref<128x512xbf16, #tpu.memory_space<vmem>>, vector<128x512xbf16>
    %cst_24 = arith.constant dense<0.000000e+00> : vector<16x512xf32>
    %48 = tpu.matmul %46, %47, %cst_24 {dimension_numbers = #tpu.dot_dimension_numbers<[1], [0], [0], [1], [0, 0, 1, 1], [], []>} : vector<16x128xbf16>, vector<128x512xbf16>, vector<16x512xf32> -> vector<16x512xf32>
    %49 = arith.addf %45, %48 : vector<16x512xf32>
    %50 = vector.extract_strided_slice %49 {offsets = [0, 0], sizes = [16, 128], strides = [1, 1]} : vector<16x512xf32> to vector<16x128xf32>
    %51 = arith.negf %50 : vector<16x128xf32>
    %52 = math.exp %51 : vector<16x128xf32>
    %cst_25 = arith.constant 1.000000e+00 : f32
    %53 = vector.broadcast %cst_25 : f32 to vector<16x128xf32>
    %54 = arith.addf %53, %52 : vector<16x128xf32>
    %55 = arith.divf %53, %54 : vector<16x128xf32>
    %56 = vector.extract_strided_slice %49 {offsets = [0, 128], sizes = [16, 128], strides = [1, 1]} : vector<16x512xf32> to vector<16x128xf32>
    %57 = arith.negf %56 : vector<16x128xf32>
    %58 = math.exp %57 : vector<16x128xf32>
    %cst_26 = arith.constant 1.000000e+00 : f32
    %59 = vector.broadcast %cst_26 : f32 to vector<16x128xf32>
    %60 = arith.addf %59, %58 : vector<16x128xf32>
    %61 = arith.divf %59, %60 : vector<16x128xf32>
    %62 = vector.extract_strided_slice %49 {offsets = [0, 256], sizes = [16, 128], strides = [1, 1]} : vector<16x512xf32> to vector<16x128xf32>
    %63 = math.tanh %62 : vector<16x128xf32>
    %64 = vector.extract_strided_slice %49 {offsets = [0, 384], sizes = [16, 128], strides = [1, 1]} : vector<16x512xf32> to vector<16x128xf32>
    %65 = arith.negf %64 : vector<16x128xf32>
    %66 = math.exp %65 : vector<16x128xf32>
    %cst_27 = arith.constant 1.000000e+00 : f32
    %67 = vector.broadcast %cst_27 : f32 to vector<16x128xf32>
    %68 = arith.addf %67, %66 : vector<16x128xf32>
    %69 = arith.divf %67, %68 : vector<16x128xf32>
    %c0_28 = arith.constant 0 : index
    %c0_29 = arith.constant 0 : index
    %70 = vector.load %arg6[%c0_28, %c0_29] : memref<16x128xf32, #tpu.memory_space<vmem>>, vector<16x128xf32>
    %71 = arith.mulf %61, %70 : vector<16x128xf32>
    %72 = arith.mulf %55, %63 : vector<16x128xf32>
    %73 = arith.addf %71, %72 : vector<16x128xf32>
    %74 = math.tanh %73 : vector<16x128xf32>
    %75 = arith.mulf %69, %74 : vector<16x128xf32>
    %76 = arith.truncf %75 : vector<16x128xf32> to vector<16x128xbf16>
    %c0_30 = arith.constant 0 : index
    %c0_31 = arith.constant 0 : index
    %77 = vector.load %arg6[%c0_30, %c0_31] : memref<16x128xf32, #tpu.memory_space<vmem>>, vector<16x128xf32>
    tpu.vector_store %arg6[%c0_30, %c0_31], %73 {strides = array<i32>} : memref<16x128xf32, #tpu.memory_space<vmem>>, vector<16x128xf32>,
    %c0_32 = arith.constant 0 : index
    %c0_33 = arith.constant 0 : index
    %78 = vector.load %arg5[%c0_32, %c0_33] : memref<16x128xbf16, #tpu.memory_space<vmem>>, vector<16x128xbf16>
    tpu.vector_store %arg5[%c0_32, %c0_33], %76 {strides = array<i32>} : memref<16x128xbf16, #tpu.memory_space<vmem>>, vector<16x128xbf16>,
    %79 = arith.index_cast %c1_i32 : i32 to index
    %c0_34 = arith.constant 0 : index
    %c0_35 = arith.constant 0 : index
    %80 = vector.load %arg4[%79, %c0_34, %c0_35] : memref<8x16x128xbf16, #tpu.memory_space<vmem>>, vector<1x16x128xbf16>
    %81 = vector.shape_cast %80 : vector<1x16x128xbf16> to vector<16x128xbf16>
    %82 = vector.shape_cast %76 : vector<16x128xbf16> to vector<1x16x128xbf16>
    tpu.vector_store %arg4[%79, %c0_34, %c0_35], %82 {strides = array<i32>} : memref<8x16x128xbf16, #tpu.memory_space<vmem>>, vector<1x16x128xbf16>,
    %c2_i32 = arith.constant 2 : i32
    %83 = arith.index_cast %c2_i32 : i32 to index
    %c0_36 = arith.constant 0 : index
    %c0_37 = arith.constant 0 : index
    %84 = vector.load %arg2[%83, %c0_36, %c0_37] : memref<8x16x512xf32, #tpu.memory_space<vmem>>, vector<1x16x512xf32>
    %85 = vector.shape_cast %84 : vector<1x16x512xf32> to vector<16x512xf32>
    %c0_38 = arith.constant 0 : index
    %c0_39 = arith.constant 0 : index
    %86 = vector.load %arg5[%c0_38, %c0_39] : memref<16x128xbf16, #tpu.memory_space<vmem>>, vector<16x128xbf16>
    %c0_40 = arith.constant 0 : index
    %c0_41 = arith.constant 0 : index
    %87 = vector.load %arg3[%c0_40, %c0_41] : memref<128x512xbf16, #tpu.memory_space<vmem>>, vector<128x512xbf16>
    %cst_42 = arith.constant dense<0.000000e+00> : vector<16x512xf32>
    %88 = tpu.matmul %86, %87, %cst_42 {dimension_numbers = #tpu.dot_dimension_numbers<[1], [0], [0], [1], [0, 0, 1, 1], [], []>} : vector<16x128xbf16>, vector<128x512xbf16>, vector<16x512xf32> -> vector<16x512xf32>
    %89 = arith.addf %85, %88 : vector<16x512xf32>
    %90 = vector.extract_strided_slice %89 {offsets = [0, 0], sizes = [16, 128], strides = [1, 1]} : vector<16x512xf32> to vector<16x128xf32>
    %91 = arith.negf %90 : vector<16x128xf32>
    %92 = math.exp %91 : vector<16x128xf32>
    %cst_43 = arith.constant 1.000000e+00 : f32
    %93 = vector.broadcast %cst_43 : f32 to vector<16x128xf32>
    %94 = arith.addf %93, %92 : vector<16x128xf32>
    %95 = arith.divf %93, %94 : vector<16x128xf32>
    %96 = vector.extract_strided_slice %89 {offsets = [0, 128], sizes = [16, 128], strides = [1, 1]} : vector<16x512xf32> to vector<16x128xf32>
    %97 = arith.negf %96 : vector<16x128xf32>
    %98 = math.exp %97 : vector<16x128xf32>
    %cst_44 = arith.constant 1.000000e+00 : f32
    %99 = vector.broadcast %cst_44 : f32 to vector<16x128xf32>
    %100 = arith.addf %99, %98 : vector<16x128xf32>
    %101 = arith.divf %99, %100 : vector<16x128xf32>
    %102 = vector.extract_strided_slice %89 {offsets = [0, 256], sizes = [16, 128], strides = [1, 1]} : vector<16x512xf32> to vector<16x128xf32>
    %103 = math.tanh %102 : vector<16x128xf32>
    %104 = vector.extract_strided_slice %89 {offsets = [0, 384], sizes = [16, 128], strides = [1, 1]} : vector<16x512xf32> to vector<16x128xf32>
    %105 = arith.negf %104 : vector<16x128xf32>
    %106 = math.exp %105 : vector<16x128xf32>
    %cst_45 = arith.constant 1.000000e+00 : f32
    %107 = vector.broadcast %cst_45 : f32 to vector<16x128xf32>
    %108 = arith.addf %107, %106 : vector<16x128xf32>
    %109 = arith.divf %107, %108 : vector<16x128xf32>
    %c0_46 = arith.constant 0 : index
    %c0_47 = arith.constant 0 : index
    %110 = vector.load %arg6[%c0_46, %c0_47] : memref<16x128xf32, #tpu.memory_space<vmem>>, vector<16x128xf32>
    %111 = arith.mulf %101, %110 : vector<16x128xf32>
    %112 = arith.mulf %95, %103 : vector<16x128xf32>
    %113 = arith.addf %111, %112 : vector<16x128xf32>
    %114 = math.tanh %113 : vector<16x128xf32>
    %115 = arith.mulf %109, %114 : vector<16x128xf32>
    %116 = arith.truncf %115 : vector<16x128xf32> to vector<16x128xbf16>
    %c0_48 = arith.constant 0 : index
    %c0_49 = arith.constant 0 : index
    %117 = vector.load %arg6[%c0_48, %c0_49] : memref<16x128xf32, #tpu.memory_space<vmem>>, vector<16x128xf32>
    tpu.vector_store %arg6[%c0_48, %c0_49], %113 {strides = array<i32>} : memref<16x128xf32, #tpu.memory_space<vmem>>, vector<16x128xf32>,
    %c0_50 = arith.constant 0 : index
    %c0_51 = arith.constant 0 : index
    %118 = vector.load %arg5[%c0_50, %c0_51] : memref<16x128xbf16, #tpu.memory_space<vmem>>, vector<16x128xbf16>
    tpu.vector_store %arg5[%c0_50, %c0_51], %116 {strides = array<i32>} : memref<16x128xbf16, #tpu.memory_space<vmem>>, vector<16x128xbf16>,
    %119 = arith.index_cast %c2_i32 : i32 to index
    %c0_52 = arith.constant 0 : index
    %c0_53 = arith.constant 0 : index
    %120 = vector.load %arg4[%119, %c0_52, %c0_53] : memref<8x16x128xbf16, #tpu.memory_space<vmem>>, vector<1x16x128xbf16>
    %121 = vector.shape_cast %120 : vector<1x16x128xbf16> to vector<16x128xbf16>
    %122 = vector.shape_cast %116 : vector<16x128xbf16> to vector<1x16x128xbf16>
    tpu.vector_store %arg4[%119, %c0_52, %c0_53], %122 {strides = array<i32>} : memref<8x16x128xbf16, #tpu.memory_space<vmem>>, vector<1x16x128xbf16>,
    %c3_i32 = arith.constant 3 : i32
    %123 = arith.index_cast %c3_i32 : i32 to index
    %c0_54 = arith.constant 0 : index
    %c0_55 = arith.constant 0 : index
    %124 = vector.load %arg2[%123, %c0_54, %c0_55] : memref<8x16x512xf32, #tpu.memory_space<vmem>>, vector<1x16x512xf32>
    %125 = vector.shape_cast %124 : vector<1x16x512xf32> to vector<16x512xf32>
    %c0_56 = arith.constant 0 : index
    %c0_57 = arith.constant 0 : index
    %126 = vector.load %arg5[%c0_56, %c0_57] : memref<16x128xbf16, #tpu.memory_space<vmem>>, vector<16x128xbf16>
    %c0_58 = arith.constant 0 : index
    %c0_59 = arith.constant 0 : index
    %127 = vector.load %arg3[%c0_58, %c0_59] : memref<128x512xbf16, #tpu.memory_space<vmem>>, vector<128x512xbf16>
    %cst_60 = arith.constant dense<0.000000e+00> : vector<16x512xf32>
    %128 = tpu.matmul %126, %127, %cst_60 {dimension_numbers = #tpu.dot_dimension_numbers<[1], [0], [0], [1], [0, 0, 1, 1], [], []>} : vector<16x128xbf16>, vector<128x512xbf16>, vector<16x512xf32> -> vector<16x512xf32>
    %129 = arith.addf %125, %128 : vector<16x512xf32>
    %130 = vector.extract_strided_slice %129 {offsets = [0, 0], sizes = [16, 128], strides = [1, 1]} : vector<16x512xf32> to vector<16x128xf32>
    %131 = arith.negf %130 : vector<16x128xf32>
    %132 = math.exp %131 : vector<16x128xf32>
    %cst_61 = arith.constant 1.000000e+00 : f32
    %133 = vector.broadcast %cst_61 : f32 to vector<16x128xf32>
    %134 = arith.addf %133, %132 : vector<16x128xf32>
    %135 = arith.divf %133, %134 : vector<16x128xf32>
    %136 = vector.extract_strided_slice %129 {offsets = [0, 128], sizes = [16, 128], strides = [1, 1]} : vector<16x512xf32> to vector<16x128xf32>
    %137 = arith.negf %136 : vector<16x128xf32>
    %138 = math.exp %137 : vector<16x128xf32>
    %cst_62 = arith.constant 1.000000e+00 : f32
    %139 = vector.broadcast %cst_62 : f32 to vector<16x128xf32>
    %140 = arith.addf %139, %138 : vector<16x128xf32>
    %141 = arith.divf %139, %140 : vector<16x128xf32>
    %142 = vector.extract_strided_slice %129 {offsets = [0, 256], sizes = [16, 128], strides = [1, 1]} : vector<16x512xf32> to vector<16x128xf32>
    %143 = math.tanh %142 : vector<16x128xf32>
    %144 = vector.extract_strided_slice %129 {offsets = [0, 384], sizes = [16, 128], strides = [1, 1]} : vector<16x512xf32> to vector<16x128xf32>
    %145 = arith.negf %144 : vector<16x128xf32>
    %146 = math.exp %145 : vector<16x128xf32>
    %cst_63 = arith.constant 1.000000e+00 : f32
    %147 = vector.broadcast %cst_63 : f32 to vector<16x128xf32>
    %148 = arith.addf %147, %146 : vector<16x128xf32>
    %149 = arith.divf %147, %148 : vector<16x128xf32>
    %c0_64 = arith.constant 0 : index
    %c0_65 = arith.constant 0 : index
    %150 = vector.load %arg6[%c0_64, %c0_65] : memref<16x128xf32, #tpu.memory_space<vmem>>, vector<16x128xf32>
    %151 = arith.mulf %141, %150 : vector<16x128xf32>
    %152 = arith.mulf %135, %143 : vector<16x128xf32>
    %153 = arith.addf %151, %152 : vector<16x128xf32>
    %154 = math.tanh %153 : vector<16x128xf32>
    %155 = arith.mulf %149, %154 : vector<16x128xf32>
    %156 = arith.truncf %155 : vector<16x128xf32> to vector<16x128xbf16>
    %c0_66 = arith.constant 0 : index
    %c0_67 = arith.constant 0 : index
    %157 = vector.load %arg6[%c0_66, %c0_67] : memref<16x128xf32, #tpu.memory_space<vmem>>, vector<16x128xf32>
    tpu.vector_store %arg6[%c0_66, %c0_67], %153 {strides = array<i32>} : memref<16x128xf32, #tpu.memory_space<vmem>>, vector<16x128xf32>,
    %c0_68 = arith.constant 0 : index
    %c0_69 = arith.constant 0 : index
    %158 = vector.load %arg5[%c0_68, %c0_69] : memref<16x128xbf16, #tpu.memory_space<vmem>>, vector<16x128xbf16>
    tpu.vector_store %arg5[%c0_68, %c0_69], %156 {strides = array<i32>} : memref<16x128xbf16, #tpu.memory_space<vmem>>, vector<16x128xbf16>,
    %159 = arith.index_cast %c3_i32 : i32 to index
    %c0_70 = arith.constant 0 : index
    %c0_71 = arith.constant 0 : index
    %160 = vector.load %arg4[%159, %c0_70, %c0_71] : memref<8x16x128xbf16, #tpu.memory_space<vmem>>, vector<1x16x128xbf16>
    %161 = vector.shape_cast %160 : vector<1x16x128xbf16> to vector<16x128xbf16>
    %162 = vector.shape_cast %156 : vector<16x128xbf16> to vector<1x16x128xbf16>
    tpu.vector_store %arg4[%159, %c0_70, %c0_71], %162 {strides = array<i32>} : memref<8x16x128xbf16, #tpu.memory_space<vmem>>, vector<1x16x128xbf16>,
    %c4_i32 = arith.constant 4 : i32
    %163 = arith.index_cast %c4_i32 : i32 to index
    %c0_72 = arith.constant 0 : index
    %c0_73 = arith.constant 0 : index
    %164 = vector.load %arg2[%163, %c0_72, %c0_73] : memref<8x16x512xf32, #tpu.memory_space<vmem>>, vector<1x16x512xf32>
    %165 = vector.shape_cast %164 : vector<1x16x512xf32> to vector<16x512xf32>
    %c0_74 = arith.constant 0 : index
    %c0_75 = arith.constant 0 : index
    %166 = vector.load %arg5[%c0_74, %c0_75] : memref<16x128xbf16, #tpu.memory_space<vmem>>, vector<16x128xbf16>
    %c0_76 = arith.constant 0 : index
    %c0_77 = arith.constant 0 : index
    %167 = vector.load %arg3[%c0_76, %c0_77] : memref<128x512xbf16, #tpu.memory_space<vmem>>, vector<128x512xbf16>
    %cst_78 = arith.constant dense<0.000000e+00> : vector<16x512xf32>
    %168 = tpu.matmul %166, %167, %cst_78 {dimension_numbers = #tpu.dot_dimension_numbers<[1], [0], [0], [1], [0, 0, 1, 1], [], []>} : vector<16x128xbf16>, vector<128x512xbf16>, vector<16x512xf32> -> vector<16x512xf32>
    %169 = arith.addf %165, %168 : vector<16x512xf32>
    %170 = vector.extract_strided_slice %169 {offsets = [0, 0], sizes = [16, 128], strides = [1, 1]} : vector<16x512xf32> to vector<16x128xf32>
    %171 = arith.negf %170 : vector<16x128xf32>
    %172 = math.exp %171 : vector<16x128xf32>
    %cst_79 = arith.constant 1.000000e+00 : f32
    %173 = vector.broadcast %cst_79 : f32 to vector<16x128xf32>
    %174 = arith.addf %173, %172 : vector<16x128xf32>
    %175 = arith.divf %173, %174 : vector<16x128xf32>
    %176 = vector.extract_strided_slice %169 {offsets = [0, 128], sizes = [16, 128], strides = [1, 1]} : vector<16x512xf32> to vector<16x128xf32>
    %177 = arith.negf %176 : vector<16x128xf32>
    %178 = math.exp %177 : vector<16x128xf32>
    %cst_80 = arith.constant 1.000000e+00 : f32
    %179 = vector.broadcast %cst_80 : f32 to vector<16x128xf32>
    %180 = arith.addf %179, %178 : vector<16x128xf32>
    %181 = arith.divf %179, %180 : vector<16x128xf32>
    %182 = vector.extract_strided_slice %169 {offsets = [0, 256], sizes = [16, 128], strides = [1, 1]} : vector<16x512xf32> to vector<16x128xf32>
    %183 = math.tanh %182 : vector<16x128xf32>
    %184 = vector.extract_strided_slice %169 {offsets = [0, 384], sizes = [16, 128], strides = [1, 1]} : vector<16x512xf32> to vector<16x128xf32>
    %185 = arith.negf %184 : vector<16x128xf32>
    %186 = math.exp %185 : vector<16x128xf32>
    %cst_81 = arith.constant 1.000000e+00 : f32
    %187 = vector.broadcast %cst_81 : f32 to vector<16x128xf32>
    %188 = arith.addf %187, %186 : vector<16x128xf32>
    %189 = arith.divf %187, %188 : vector<16x128xf32>
    %c0_82 = arith.constant 0 : index
    %c0_83 = arith.constant 0 : index
    %190 = vector.load %arg6[%c0_82, %c0_83] : memref<16x128xf32, #tpu.memory_space<vmem>>, vector<16x128xf32>
    %191 = arith.mulf %181, %190 : vector<16x128xf32>
    %192 = arith.mulf %175, %183 : vector<16x128xf32>
    %193 = arith.addf %191, %192 : vector<16x128xf32>
    %194 = math.tanh %193 : vector<16x128xf32>
    %195 = arith.mulf %189, %194 : vector<16x128xf32>
    %196 = arith.truncf %195 : vector<16x128xf32> to vector<16x128xbf16>
    %c0_84 = arith.constant 0 : index
    %c0_85 = arith.constant 0 : index
    %197 = vector.load %arg6[%c0_84, %c0_85] : memref<16x128xf32, #tpu.memory_space<vmem>>, vector<16x128xf32>
    tpu.vector_store %arg6[%c0_84, %c0_85], %193 {strides = array<i32>} : memref<16x128xf32, #tpu.memory_space<vmem>>, vector<16x128xf32>,
    %c0_86 = arith.constant 0 : index
    %c0_87 = arith.constant 0 : index
    %198 = vector.load %arg5[%c0_86, %c0_87] : memref<16x128xbf16, #tpu.memory_space<vmem>>, vector<16x128xbf16>
    tpu.vector_store %arg5[%c0_86, %c0_87], %196 {strides = array<i32>} : memref<16x128xbf16, #tpu.memory_space<vmem>>, vector<16x128xbf16>,
    %199 = arith.index_cast %c4_i32 : i32 to index
    %c0_88 = arith.constant 0 : index
    %c0_89 = arith.constant 0 : index
    %200 = vector.load %arg4[%199, %c0_88, %c0_89] : memref<8x16x128xbf16, #tpu.memory_space<vmem>>, vector<1x16x128xbf16>
    %201 = vector.shape_cast %200 : vector<1x16x128xbf16> to vector<16x128xbf16>
    %202 = vector.shape_cast %196 : vector<16x128xbf16> to vector<1x16x128xbf16>
    tpu.vector_store %arg4[%199, %c0_88, %c0_89], %202 {strides = array<i32>} : memref<8x16x128xbf16, #tpu.memory_space<vmem>>, vector<1x16x128xbf16>,
    %c5_i32 = arith.constant 5 : i32
    %203 = arith.index_cast %c5_i32 : i32 to index
    %c0_90 = arith.constant 0 : index
    %c0_91 = arith.constant 0 : index
    %204 = vector.load %arg2[%203, %c0_90, %c0_91] : memref<8x16x512xf32, #tpu.memory_space<vmem>>, vector<1x16x512xf32>
    %205 = vector.shape_cast %204 : vector<1x16x512xf32> to vector<16x512xf32>
    %c0_92 = arith.constant 0 : index
    %c0_93 = arith.constant 0 : index
    %206 = vector.load %arg5[%c0_92, %c0_93] : memref<16x128xbf16, #tpu.memory_space<vmem>>, vector<16x128xbf16>
    %c0_94 = arith.constant 0 : index
    %c0_95 = arith.constant 0 : index
    %207 = vector.load %arg3[%c0_94, %c0_95] : memref<128x512xbf16, #tpu.memory_space<vmem>>, vector<128x512xbf16>
    %cst_96 = arith.constant dense<0.000000e+00> : vector<16x512xf32>
    %208 = tpu.matmul %206, %207, %cst_96 {dimension_numbers = #tpu.dot_dimension_numbers<[1], [0], [0], [1], [0, 0, 1, 1], [], []>} : vector<16x128xbf16>, vector<128x512xbf16>, vector<16x512xf32> -> vector<16x512xf32>
    %209 = arith.addf %205, %208 : vector<16x512xf32>
    %210 = vector.extract_strided_slice %209 {offsets = [0, 0], sizes = [16, 128], strides = [1, 1]} : vector<16x512xf32> to vector<16x128xf32>
    %211 = arith.negf %210 : vector<16x128xf32>
    %212 = math.exp %211 : vector<16x128xf32>
    %cst_97 = arith.constant 1.000000e+00 : f32
    %213 = vector.broadcast %cst_97 : f32 to vector<16x128xf32>
    %214 = arith.addf %213, %212 : vector<16x128xf32>
    %215 = arith.divf %213, %214 : vector<16x128xf32>
    %216 = vector.extract_strided_slice %209 {offsets = [0, 128], sizes = [16, 128], strides = [1, 1]} : vector<16x512xf32> to vector<16x128xf32>
    %217 = arith.negf %216 : vector<16x128xf32>
    %218 = math.exp %217 : vector<16x128xf32>
    %cst_98 = arith.constant 1.000000e+00 : f32
    %219 = vector.broadcast %cst_98 : f32 to vector<16x128xf32>
    %220 = arith.addf %219, %218 : vector<16x128xf32>
    %221 = arith.divf %219, %220 : vector<16x128xf32>
    %222 = vector.extract_strided_slice %209 {offsets = [0, 256], sizes = [16, 128], strides = [1, 1]} : vector<16x512xf32> to vector<16x128xf32>
    %223 = math.tanh %222 : vector<16x128xf32>
    %224 = vector.extract_strided_slice %209 {offsets = [0, 384], sizes = [16, 128], strides = [1, 1]} : vector<16x512xf32> to vector<16x128xf32>
    %225 = arith.negf %224 : vector<16x128xf32>
    %226 = math.exp %225 : vector<16x128xf32>
    %cst_99 = arith.constant 1.000000e+00 : f32
    %227 = vector.broadcast %cst_99 : f32 to vector<16x128xf32>
    %228 = arith.addf %227, %226 : vector<16x128xf32>
    %229 = arith.divf %227, %228 : vector<16x128xf32>
    %c0_100 = arith.constant 0 : index
    %c0_101 = arith.constant 0 : index
    %230 = vector.load %arg6[%c0_100, %c0_101] : memref<16x128xf32, #tpu.memory_space<vmem>>, vector<16x128xf32>
    %231 = arith.mulf %221, %230 : vector<16x128xf32>
    %232 = arith.mulf %215, %223 : vector<16x128xf32>
    %233 = arith.addf %231, %232 : vector<16x128xf32>
    %234 = math.tanh %233 : vector<16x128xf32>
    %235 = arith.mulf %229, %234 : vector<16x128xf32>
    %236 = arith.truncf %235 : vector<16x128xf32> to vector<16x128xbf16>
    %c0_102 = arith.constant 0 : index
    %c0_103 = arith.constant 0 : index
    %237 = vector.load %arg6[%c0_102, %c0_103] : memref<16x128xf32, #tpu.memory_space<vmem>>, vector<16x128xf32>
    tpu.vector_store %arg6[%c0_102, %c0_103], %233 {strides = array<i32>} : memref<16x128xf32, #tpu.memory_space<vmem>>, vector<16x128xf32>,
    %c0_104 = arith.constant 0 : index
    %c0_105 = arith.constant 0 : index
    %238 = vector.load %arg5[%c0_104, %c0_105] : memref<16x128xbf16, #tpu.memory_space<vmem>>, vector<16x128xbf16>
    tpu.vector_store %arg5[%c0_104, %c0_105], %236 {strides = array<i32>} : memref<16x128xbf16, #tpu.memory_space<vmem>>, vector<16x128xbf16>,
    %239 = arith.index_cast %c5_i32 : i32 to index
    %c0_106 = arith.constant 0 : index
    %c0_107 = arith.constant 0 : index
    %240 = vector.load %arg4[%239, %c0_106, %c0_107] : memref<8x16x128xbf16, #tpu.memory_space<vmem>>, vector<1x16x128xbf16>
    %241 = vector.shape_cast %240 : vector<1x16x128xbf16> to vector<16x128xbf16>
    %242 = vector.shape_cast %236 : vector<16x128xbf16> to vector<1x16x128xbf16>
    tpu.vector_store %arg4[%239, %c0_106, %c0_107], %242 {strides = array<i32>} : memref<8x16x128xbf16, #tpu.memory_space<vmem>>, vector<1x16x128xbf16>,
    %c6_i32 = arith.constant 6 : i32
    %243 = arith.index_cast %c6_i32 : i32 to index
    %c0_108 = arith.constant 0 : index
    %c0_109 = arith.constant 0 : index
    %244 = vector.load %arg2[%243, %c0_108, %c0_109] : memref<8x16x512xf32, #tpu.memory_space<vmem>>, vector<1x16x512xf32>
    %245 = vector.shape_cast %244 : vector<1x16x512xf32> to vector<16x512xf32>
    %c0_110 = arith.constant 0 : index
    %c0_111 = arith.constant 0 : index
    %246 = vector.load %arg5[%c0_110, %c0_111] : memref<16x128xbf16, #tpu.memory_space<vmem>>, vector<16x128xbf16>
    %c0_112 = arith.constant 0 : index
    %c0_113 = arith.constant 0 : index
    %247 = vector.load %arg3[%c0_112, %c0_113] : memref<128x512xbf16, #tpu.memory_space<vmem>>, vector<128x512xbf16>
    %cst_114 = arith.constant dense<0.000000e+00> : vector<16x512xf32>
    %248 = tpu.matmul %246, %247, %cst_114 {dimension_numbers = #tpu.dot_dimension_numbers<[1], [0], [0], [1], [0, 0, 1, 1], [], []>} : vector<16x128xbf16>, vector<128x512xbf16>, vector<16x512xf32> -> vector<16x512xf32>
    %249 = arith.addf %245, %248 : vector<16x512xf32>
    %250 = vector.extract_strided_slice %249 {offsets = [0, 0], sizes = [16, 128], strides = [1, 1]} : vector<16x512xf32> to vector<16x128xf32>
    %251 = arith.negf %250 : vector<16x128xf32>
    %252 = math.exp %251 : vector<16x128xf32>
    %cst_115 = arith.constant 1.000000e+00 : f32
    %253 = vector.broadcast %cst_115 : f32 to vector<16x128xf32>
    %254 = arith.addf %253, %252 : vector<16x128xf32>
    %255 = arith.divf %253, %254 : vector<16x128xf32>
    %256 = vector.extract_strided_slice %249 {offsets = [0, 128], sizes = [16, 128], strides = [1, 1]} : vector<16x512xf32> to vector<16x128xf32>
    %257 = arith.negf %256 : vector<16x128xf32>
    %258 = math.exp %257 : vector<16x128xf32>
    %cst_116 = arith.constant 1.000000e+00 : f32
    %259 = vector.broadcast %cst_116 : f32 to vector<16x128xf32>
    %260 = arith.addf %259, %258 : vector<16x128xf32>
    %261 = arith.divf %259, %260 : vector<16x128xf32>
    %262 = vector.extract_strided_slice %249 {offsets = [0, 256], sizes = [16, 128], strides = [1, 1]} : vector<16x512xf32> to vector<16x128xf32>
    %263 = math.tanh %262 : vector<16x128xf32>
    %264 = vector.extract_strided_slice %249 {offsets = [0, 384], sizes = [16, 128], strides = [1, 1]} : vector<16x512xf32> to vector<16x128xf32>
    %265 = arith.negf %264 : vector<16x128xf32>
    %266 = math.exp %265 : vector<16x128xf32>
    %cst_117 = arith.constant 1.000000e+00 : f32
    %267 = vector.broadcast %cst_117 : f32 to vector<16x128xf32>
    %268 = arith.addf %267, %266 : vector<16x128xf32>
    %269 = arith.divf %267, %268 : vector<16x128xf32>
    %c0_118 = arith.constant 0 : index
    %c0_119 = arith.constant 0 : index
    %270 = vector.load %arg6[%c0_118, %c0_119] : memref<16x128xf32, #tpu.memory_space<vmem>>, vector<16x128xf32>
    %271 = arith.mulf %261, %270 : vector<16x128xf32>
    %272 = arith.mulf %255, %263 : vector<16x128xf32>
    %273 = arith.addf %271, %272 : vector<16x128xf32>
    %274 = math.tanh %273 : vector<16x128xf32>
    %275 = arith.mulf %269, %274 : vector<16x128xf32>
    %276 = arith.truncf %275 : vector<16x128xf32> to vector<16x128xbf16>
    %c0_120 = arith.constant 0 : index
    %c0_121 = arith.constant 0 : index
    %277 = vector.load %arg6[%c0_120, %c0_121] : memref<16x128xf32, #tpu.memory_space<vmem>>, vector<16x128xf32>
    tpu.vector_store %arg6[%c0_120, %c0_121], %273 {strides = array<i32>} : memref<16x128xf32, #tpu.memory_space<vmem>>, vector<16x128xf32>,
    %c0_122 = arith.constant 0 : index
    %c0_123 = arith.constant 0 : index
    %278 = vector.load %arg5[%c0_122, %c0_123] : memref<16x128xbf16, #tpu.memory_space<vmem>>, vector<16x128xbf16>
    tpu.vector_store %arg5[%c0_122, %c0_123], %276 {strides = array<i32>} : memref<16x128xbf16, #tpu.memory_space<vmem>>, vector<16x128xbf16>,
    %279 = arith.index_cast %c6_i32 : i32 to index
    %c0_124 = arith.constant 0 : index
    %c0_125 = arith.constant 0 : index
    %280 = vector.load %arg4[%279, %c0_124, %c0_125] : memref<8x16x128xbf16, #tpu.memory_space<vmem>>, vector<1x16x128xbf16>
    %281 = vector.shape_cast %280 : vector<1x16x128xbf16> to vector<16x128xbf16>
    %282 = vector.shape_cast %276 : vector<16x128xbf16> to vector<1x16x128xbf16>
    tpu.vector_store %arg4[%279, %c0_124, %c0_125], %282 {strides = array<i32>} : memref<8x16x128xbf16, #tpu.memory_space<vmem>>, vector<1x16x128xbf16>,
    %c7_i32 = arith.constant 7 : i32
    %283 = arith.index_cast %c7_i32 : i32 to index
    %c0_126 = arith.constant 0 : index
    %c0_127 = arith.constant 0 : index
    %284 = vector.load %arg2[%283, %c0_126, %c0_127] : memref<8x16x512xf32, #tpu.memory_space<vmem>>, vector<1x16x512xf32>
    %285 = vector.shape_cast %284 : vector<1x16x512xf32> to vector<16x512xf32>
    %c0_128 = arith.constant 0 : index
    %c0_129 = arith.constant 0 : index
    %286 = vector.load %arg5[%c0_128, %c0_129] : memref<16x128xbf16, #tpu.memory_space<vmem>>, vector<16x128xbf16>
    %c0_130 = arith.constant 0 : index
    %c0_131 = arith.constant 0 : index
    %287 = vector.load %arg3[%c0_130, %c0_131] : memref<128x512xbf16, #tpu.memory_space<vmem>>, vector<128x512xbf16>
    %cst_132 = arith.constant dense<0.000000e+00> : vector<16x512xf32>
    %288 = tpu.matmul %286, %287, %cst_132 {dimension_numbers = #tpu.dot_dimension_numbers<[1], [0], [0], [1], [0, 0, 1, 1], [], []>} : vector<16x128xbf16>, vector<128x512xbf16>, vector<16x512xf32> -> vector<16x512xf32>
    %289 = arith.addf %285, %288 : vector<16x512xf32>
    %290 = vector.extract_strided_slice %289 {offsets = [0, 0], sizes = [16, 128], strides = [1, 1]} : vector<16x512xf32> to vector<16x128xf32>
    %291 = arith.negf %290 : vector<16x128xf32>
    %292 = math.exp %291 : vector<16x128xf32>
    %cst_133 = arith.constant 1.000000e+00 : f32
    %293 = vector.broadcast %cst_133 : f32 to vector<16x128xf32>
    %294 = arith.addf %293, %292 : vector<16x128xf32>
    %295 = arith.divf %293, %294 : vector<16x128xf32>
    %296 = vector.extract_strided_slice %289 {offsets = [0, 128], sizes = [16, 128], strides = [1, 1]} : vector<16x512xf32> to vector<16x128xf32>
    %297 = arith.negf %296 : vector<16x128xf32>
    %298 = math.exp %297 : vector<16x128xf32>
    %cst_134 = arith.constant 1.000000e+00 : f32
    %299 = vector.broadcast %cst_134 : f32 to vector<16x128xf32>
    %300 = arith.addf %299, %298 : vector<16x128xf32>
    %301 = arith.divf %299, %300 : vector<16x128xf32>
    %302 = vector.extract_strided_slice %289 {offsets = [0, 256], sizes = [16, 128], strides = [1, 1]} : vector<16x512xf32> to vector<16x128xf32>
    %303 = math.tanh %302 : vector<16x128xf32>
    %304 = vector.extract_strided_slice %289 {offsets = [0, 384], sizes = [16, 128], strides = [1, 1]} : vector<16x512xf32> to vector<16x128xf32>
    %305 = arith.negf %304 : vector<16x128xf32>
    %306 = math.exp %305 : vector<16x128xf32>
    %cst_135 = arith.constant 1.000000e+00 : f32
    %307 = vector.broadcast %cst_135 : f32 to vector<16x128xf32>
    %308 = arith.addf %307, %306 : vector<16x128xf32>
    %309 = arith.divf %307, %308 : vector<16x128xf32>
    %c0_136 = arith.constant 0 : index
    %c0_137 = arith.constant 0 : index
    %310 = vector.load %arg6[%c0_136, %c0_137] : memref<16x128xf32, #tpu.memory_space<vmem>>, vector<16x128xf32>
    %311 = arith.mulf %301, %310 : vector<16x128xf32>
    %312 = arith.mulf %295, %303 : vector<16x128xf32>
    %313 = arith.addf %311, %312 : vector<16x128xf32>
    %314 = math.tanh %313 : vector<16x128xf32>
    %315 = arith.mulf %309, %314 : vector<16x128xf32>
    %316 = arith.truncf %315 : vector<16x128xf32> to vector<16x128xbf16>
    %c0_138 = arith.constant 0 : index
    %c0_139 = arith.constant 0 : index
    %317 = vector.load %arg6[%c0_138, %c0_139] : memref<16x128xf32, #tpu.memory_space<vmem>>, vector<16x128xf32>
    tpu.vector_store %arg6[%c0_138, %c0_139], %313 {strides = array<i32>} : memref<16x128xf32, #tpu.memory_space<vmem>>, vector<16x128xf32>,
    %c0_140 = arith.constant 0 : index
    %c0_141 = arith.constant 0 : index
    %318 = vector.load %arg5[%c0_140, %c0_141] : memref<16x128xbf16, #tpu.memory_space<vmem>>, vector<16x128xbf16>
    tpu.vector_store %arg5[%c0_140, %c0_141], %316 {strides = array<i32>} : memref<16x128xbf16, #tpu.memory_space<vmem>>, vector<16x128xbf16>,
    %319 = arith.index_cast %c7_i32 : i32 to index
    %c0_142 = arith.constant 0 : index
    %c0_143 = arith.constant 0 : index
    %320 = vector.load %arg4[%319, %c0_142, %c0_143] : memref<8x16x128xbf16, #tpu.memory_space<vmem>>, vector<1x16x128xbf16>
    %321 = vector.shape_cast %320 : vector<1x16x128xbf16> to vector<16x128xbf16>
    %322 = vector.shape_cast %316 : vector<16x128xbf16> to vector<1x16x128xbf16>
    tpu.vector_store %arg4[%319, %c0_142, %c0_143], %322 {strides = array<i32>} : memref<8x16x128xbf16, #tpu.memory_space<vmem>>, vector<1x16x128xbf16>,
    %c8_i32 = arith.constant 8 : i32
    return
  }
  func.func @transform_0(%arg0: i32, %arg1: i32) -> (i32, i32, i32) {
    %c0_i32 = arith.constant 0 : i32
    %c0_i32_0 = arith.constant 0 : i32
    return %arg1, %arg0, %c0_i32 : i32, i32, i32
  }
  func.func @transform_1(%arg0: i32, %arg1: i32) -> (i32, i32) {
    %c0_i32 = arith.constant 0 : i32
    %c0_i32_0 = arith.constant 0 : i32
    %c0_i32_1 = arith.constant 0 : i32
    return %c0_i32, %c0_i32_0 : i32, i32
  }
  func.func @transform_2(%arg0: i32, %arg1: i32) -> (i32, i32, i32) {
    %c0_i32 = arith.constant 0 : i32
    %c0_i32_0 = arith.constant 0 : i32
    return %arg1, %arg0, %c0_i32 : i32, i32, i32
  }
}

module attributes {stable_mosaic.version = 11 : i64} {
  func.func @_matmul_bias_kernel(%arg0: i32, %arg1: i32, %arg2: memref<128x128xbf16, #tpu.memory_space<vmem>>, %arg3: memref<128x128xbf16, #tpu.memory_space<vmem>>, %arg4: memref<1x128xf32, #tpu.memory_space<vmem>>, %arg5: memref<128x128xf32, #tpu.memory_space<vmem>>) attributes {dimension_semantics = [#tpu.dimension_semantics<parallel>, #tpu.dimension_semantics<parallel>], iteration_bounds = array<i64: 1, 1>, scalar_prefetch = 0 : i64, scratch_operands = 0 : i64, tpu.core_type = #tpu.core_type<tc>, window_params = [{transform_indices = @transform_0, window_bounds = array<i64: 128, 128>}, {transform_indices = @transform_1, window_bounds = array<i64: 128, 128>}, {transform_indices = @transform_2, window_bounds = array<i64: 1, 128>}, {transform_indices = @transform_3, window_bounds = array<i64: 128, 128>}]} {
    %c0 = arith.constant 0 : index
    %c0_0 = arith.constant 0 : index
    %0 = vector.load %arg2[%c0, %c0_0] : memref<128x128xbf16, #tpu.memory_space<vmem>>, vector<128x128xbf16>
    %c0_1 = arith.constant 0 : index
    %c0_2 = arith.constant 0 : index
    %1 = vector.load %arg3[%c0_1, %c0_2] : memref<128x128xbf16, #tpu.memory_space<vmem>>, vector<128x128xbf16>
    %cst = arith.constant dense<0.000000e+00> : vector<128x128xf32>
    %2 = tpu.matmul %0, %1, %cst {dimension_numbers = #tpu.dot_dimension_numbers<[1], [0], [0], [1], [0, 0, 1, 1], [], []>} : vector<128x128xbf16>, vector<128x128xbf16>, vector<128x128xf32> -> vector<128x128xf32>
    %c0_3 = arith.constant 0 : index
    %c0_4 = arith.constant 0 : index
    %3 = vector.load %arg4[%c0_3, %c0_4] : memref<1x128xf32, #tpu.memory_space<vmem>>, vector<1x128xf32>
    %4 = vector.broadcast %3 : vector<1x128xf32> to vector<128x128xf32>
    %5 = arith.addf %2, %4 : vector<128x128xf32>
    %c0_5 = arith.constant 0 : index
    %c0_6 = arith.constant 0 : index
    %6 = vector.load %arg5[%c0_5, %c0_6] : memref<128x128xf32, #tpu.memory_space<vmem>>, vector<128x128xf32>
    tpu.vector_store %arg5[%c0_5, %c0_6], %5 {strides = array<i32>} : memref<128x128xf32, #tpu.memory_space<vmem>>, vector<128x128xf32>,
    return
  }
  func.func @transform_0(%arg0: i32, %arg1: i32) -> (i32, i32) {
    %c0_i32 = arith.constant 0 : i32
    %c0_i32_0 = arith.constant 0 : i32
    return %arg1, %c0_i32 : i32, i32
  }
  func.func @transform_1(%arg0: i32, %arg1: i32) -> (i32, i32) {
    %c0_i32 = arith.constant 0 : i32
    %c0_i32_0 = arith.constant 0 : i32
    return %c0_i32, %arg0 : i32, i32
  }
  func.func @transform_2(%arg0: i32, %arg1: i32) -> (i32, i32) {
    %c0_i32 = arith.constant 0 : i32
    %c0_i32_0 = arith.constant 0 : i32
    return %c0_i32, %arg0 : i32, i32
  }
  func.func @transform_3(%arg0: i32, %arg1: i32) -> (i32, i32) {
    %c0_i32 = arith.constant 0 : i32
    return %arg1, %arg0 : i32, i32
  }
}

</mosaic_0001>

<bundles_post_ra>
// kernel: decoder_rnn_forward.5
= control target key start
LH: loop header
LB: loop body
LE: loop exit
PB: predicated region body
PF: predicated region fallthrough
CT: control target
= control target key end

     0   :  { %s439_s1 = inlined_call_operand.vmem [shape: bf16[128,128], index: 1, kind: input, shape index: {}]   ;;  %s440_s2 = inlined_call_operand.vmem [shape: f32[1,128], index: 2, kind: input, shape index: {}]   ;;  %s441_s0 = inlined_call_operand.vmem [shape: bf16[128,128], index: 0, kind: input, shape index: {}]   ;;  %s442_s3 = inlined_call_operand.vmem [shape: f32[128,128], index: 3, kind: output, shape index: {}]  }
   0x1   :  { %v294_v0 = vld [vmem:[%s439_s1 + $0x38] sm:$0xff]  ;;  %v293_v1 = vld [vmem:[%s439_s1 + $0x30] sm:$0xff]  ;;  %v292_v2 = vld [vmem:[%s439_s1 + $0x28] sm:$0xff] }
   0x2   :  { %146 = vmatpush.bf16.msra.mxu0 %v294_v0  ;;  %295 = vmatpush.bf16.msra.mxu1 %v294_v0  ;;  %v291_v3 = vld [vmem:[%s439_s1 + $0x20] sm:$0xff]  ;;  %v290_v4 = vld [vmem:[%s439_s1 + $0x18] sm:$0xff]  ;;  %v289_v5 = vld [vmem:[%s439_s1 + $0x10] sm:$0xff] }
   0x3   :  { %296 = vmatpush.bf16.msra.mxu2 %v294_v0  ;;  %297 = vmatpush.bf16.msra.mxu3 %v294_v0  ;;  %v288_v6 = vld [vmem:[%s439_s1 + $0x8] sm:$0xff]  ;;  %v287_v7 = vld [vmem:[%s439_s1] sm:$0xff]  ;;  %v281_v9 = vld [vmem:[%s441_s0 + $0x10] sm:$0xff] }
   0x4   :  { %v279_v8 = vld [vmem:[%s441_s0] sm:$0xff]  ;;  %v285_v11 = vld [vmem:[%s441_s0 + $0x30] sm:$0xff]  ;;  %v280_v12 = vld [vmem:[%s441_s0 + $0x8] sm:$0xff] }
   0x5   :  { %v283_v10 = vld [vmem:[%s441_s0 + $0x20] sm:$0xff]  ;;  %v282_v13 = vld [vmem:[%s441_s0 + $0x18] sm:$0xff]  ;;  %v284_v14 = vld [vmem:[%s441_s0 + $0x28] sm:$0xff] }
   0x6   :  { %147 = vmatpush.bf16.msra.mxu0 %v293_v1  ;;  %298 = vmatpush.bf16.msra.mxu1 %v293_v1  ;;  %v286_v15 = vld [vmem:[%s441_s0 + $0x38] sm:$0xff]  ;;  %v319_v16 = vld [vmem:[%s440_s2] ss:$0 sm:$0xff] }
   0x7   :  { %299 = vmatpush.bf16.msra.mxu2 %v293_v1  ;;  %300 = vmatpush.bf16.msra.mxu3 %v293_v1 }
   0xa   :  { %148 = vmatpush.bf16.msra.mxu0 %v292_v2  ;;  %301 = vmatpush.bf16.msra.mxu1 %v292_v2 }
   0xb   :  { %302 = vmatpush.bf16.msra.mxu2 %v292_v2  ;;  %303 = vmatpush.bf16.msra.mxu3 %v292_v2 }
   0xe   :  { %149 = vmatpush.bf16.msra.mxu0 %v291_v3  ;;  %304 = vmatpush.bf16.msra.mxu1 %v291_v3 }
   0xf   :  { %305 = vmatpush.bf16.msra.mxu2 %v291_v3  ;;  %306 = vmatpush.bf16.msra.mxu3 %v291_v3 }
  0x12   :  { %150 = vmatpush.bf16.msra.mxu0 %v290_v4  ;;  %307 = vmatpush.bf16.msra.mxu1 %v290_v4 }
  0x13   :  { %308 = vmatpush.bf16.msra.mxu2 %v290_v4  ;;  %309 = vmatpush.bf16.msra.mxu3 %v290_v4 }
  0x16   :  { %151 = vmatpush.bf16.msra.mxu0 %v289_v5  ;;  %310 = vmatpush.bf16.msra.mxu1 %v289_v5 }
  0x17   :  { %311 = vmatpush.bf16.msra.mxu2 %v289_v5  ;;  %312 = vmatpush.bf16.msra.mxu3 %v289_v5 }
  0x1a   :  { %152 = vmatpush.bf16.msra.mxu0 %v288_v6  ;;  %313 = vmatpush.bf16.msra.mxu1 %v288_v6 }
  0x1b   :  { %314 = vmatpush.bf16.msra.mxu2 %v288_v6  ;;  %315 = vmatpush.bf16.msra.mxu3 %v288_v6 }
  0x1e   :  { %153 = vmatpush.bf16.msra.mxu0 %v287_v7  ;;  %316 = vmatpush.bf16.msra.mxu1 %v287_v7 }
  0x1f   :  { %317 = vmatpush.bf16.msra.mxu2 %v287_v7  ;;  %318 = vmatpush.bf16.msra.mxu3 %v287_v7 }
  0x21   :  { %154 = vmatmul.bf16.vlgmr.msra.gmra.mxu0 %v279_v8  ;;  %164 = vmatmul.bf16.vlgmr.msra.gmra.mxu1 %v281_v9 }
  0x22   :  { %174 = vmatmul.bf16.vlgmr.msra.gmra.mxu2 %v283_v10  ;;  %184 = vmatmul.bf16.vlgmr.msra.gmra.mxu3 %v285_v11 }
  0x31   :  { %159 = vmatmul.bf16.gmra.mxu0 %v280_v12  ;;  %169 = vmatmul.bf16.gmra.mxu1 %v282_v13 }
  0x32   :  { %179 = vmatmul.bf16.gmra.mxu2 %v284_v14  ;;  %189 = vmatmul.bf16.gmra.mxu3 %v286_v15 }
  0x9e   :  { %v155_v17 = vpop.f32.mrf.mxu0  ;;  %v165_v18 = vpop.f32.mrf.mxu1 }
  0x9f   :  { %v156_v19 = vadd.f32 %v319_v16, %v155_v17  ;;  %v166_v20 = vadd.f32 %v319_v16, %v165_v18 }
  0xa1   :  { %195 = vst [vmem:[%s442_s3] sm:$0xff] %v156_v19 }
  0xa2   :  { %199 = vst [vmem:[%s442_s3 + $0x20] sm:$0xff] %v166_v20 }
  0xa5   :  { %v175_v21 = vpop.f32.mrf.mxu2  ;;  %v185_v22 = vpop.f32.mrf.mxu3 }
  0xa6   :  { %v176_v23 = vadd.f32 %v319_v16, %v175_v21  ;;  %v186_v24 = vadd.f32 %v319_v16, %v185_v22  ;;  %v157_v25 = vpop.f32.mrf.mxu0  ;;  %v167_v26 = vpop.f32.mrf.mxu1 }
  0xa7   :  { %v158_v27 = vadd.f32 %v319_v16, %v157_v25  ;;  %v168_v28 = vadd.f32 %v319_v16, %v167_v26 }
  0xa8   :  { %203 = vst [vmem:[%s442_s3 + $0x40] sm:$0xff] %v176_v23 }
  0xa9   :  { %207 = vst [vmem:[%s442_s3 + $0x60] sm:$0xff] %v186_v24 }
  0xaa   :  { %196 = vst [vmem:[%s442_s3 + $0x8] sm:$0xff] %v158_v27 }
  0xab   :  { %200 = vst [vmem:[%s442_s3 + $0x28] sm:$0xff] %v168_v28 }
  0xad   :  { %v177_v29 = vpop.f32.mrf.mxu2  ;;  %v187_v30 = vpop.f32.mrf.mxu3 }
  0xae   :  { %v178_v31 = vadd.f32 %v319_v16, %v177_v29  ;;  %v188_v32 = vadd.f32 %v319_v16, %v187_v30  ;;  %v160_v33 = vpop.f32.mrf.mxu0  ;;  %v170_v34 = vpop.f32.mrf.mxu1 }
  0xaf   :  { %v161_v35 = vadd.f32 %v319_v16, %v160_v33  ;;  %v171_v36 = vadd.f32 %v319_v16, %v170_v34 }
  0xb0   :  { %204 = vst [vmem:[%s442_s3 + $0x48] sm:$0xff] %v178_v31 }
  0xb1   :  { %208 = vst [vmem:[%s442_s3 + $0x68] sm:$0xff] %v188_v32 }
  0xb2   :  { %197 = vst [vmem:[%s442_s3 + $0x10] sm:$0xff] %v161_v35 }
  0xb3   :  { %201 = vst [vmem:[%s442_s3 + $0x30] sm:$0xff] %v171_v36 }
  0xb5   :  { %v180_v37 = vpop.f32.mrf.mxu2  ;;  %v190_v38 = vpop.f32.mrf.mxu3 }
  0xb6   :  { %v181_v39 = vadd.f32 %v319_v16, %v180_v37  ;;  %v191_v40 = vadd.f32 %v319_v16, %v190_v38  ;;  %v162_v41 = vpop.f32.mrf.mxu0  ;;  %v172_v42 = vpop.f32.mrf.mxu1 }
  0xb7   :  { %v163_v43 = vadd.f32 %v319_v16, %v162_v41  ;;  %v173_v44 = vadd.f32 %v319_v16, %v172_v42 }
  0xb8   :  { %205 = vst [vmem:[%s442_s3 + $0x50] sm:$0xff] %v181_v39 }
  0xb9   :  { %209 = vst [vmem:[%s442_s3 + $0x70] sm:$0xff] %v191_v40 }
  0xba   :  { %198 = vst [vmem:[%s442_s3 + $0x18] sm:$0xff] %v163_v43 }
  0xbb   :  { %202 = vst [vmem:[%s442_s3 + $0x38] sm:$0xff] %v173_v44 }
  0xbd   :  { %v182_v45 = vpop.f32.mrf.mxu2  ;;  %v192_v46 = vpop.f32.mrf.mxu3 }
  0xbe   :  { %v183_v47 = vadd.f32 %v319_v16, %v182_v45  ;;  %v193_v48 = vadd.f32 %v319_v16, %v192_v46 }
  0xc0   :  { %206 = vst [vmem:[%s442_s3 + $0x58] sm:$0xff] %v183_v47 }
  0xc1   :  { %210 = vst [vmem:[%s442_s3 + $0x78] sm:$0xff] %v193_v48 }

// kernel: decoder_rnn_forward.3
= control target key start
LH: loop header
LB: loop body
LE: loop exit
PB: predicated region body
PF: predicated region fallthrough
CT: control target
= control target key end

     0   :  { %s1247_s1 = inlined_call_operand.vmem [shape: bf16[128,512], index: 1, kind: input, shape index: {}]   ;;  %s1248_s0 = inlined_call_operand.vmem [shape: bf16[128,128], index: 0, kind: input, shape index: {}]   ;;  %s1249_s2 = inlined_call_operand.vmem [shape: f32[1,512], index: 2, kind: input, shape index: {}]   ;;  %s1250_s3 = inlined_call_operand.vmem [shape: f32[128,512], index: 3, kind: output, shape index: {}]  }
   0x1   :  { %v690_v0 = vld [vmem:[%s1247_s1 + $0xe0] sm:$0xf]  ;;  %v742_v1 = vld [vmem:[%s1247_s1 + $0xec] sm:$0xf0]  ;;  %v740_v2 = vld [vmem:[%s1247_s1 + $0xe4] sm:$0xf] }
   0x2   :  { %v691_v3 = vor.u32 %v742_v1, %v690_v0  ;;  %v692_v4 = vld [vmem:[%s1247_s1 + $0xf0] sm:$0xf0]  ;;  %v698_v5 = vld [vmem:[%s1247_s1 + $0xe8] sm:$0xf]  ;;  %v743_v6 = vld [vmem:[%s1247_s1 + $0xf4] sm:$0xf0] }
   0x3   :  { %v695_v7 = vor.u32 %v740_v2, %v692_v4  ;;  %v699_v8 = vor.u32 %v743_v6, %v698_v5  ;;  %v741_v9 = vld [vmem:[%s1247_s1 + $0xec] sm:$0xf]  ;;  %v700_v10 = vld [vmem:[%s1247_s1 + $0xf8] sm:$0xf0]  ;;  %v674_v11 = vld [vmem:[%s1247_s1 + $0xc0] sm:$0xf] }
   0x4   :  { %280 = vmatpush.bf16.msra.mxu0 %v691_v3  ;;  %v703_v12 = vor.u32 %v741_v9, %v700_v10  ;;  %v738_v13 = vld [vmem:[%s1247_s1 + $0xcc] sm:$0xf0]  ;;  %v736_v14 = vld [vmem:[%s1247_s1 + $0xc4] sm:$0xf]  ;;  %v676_v15 = vld [vmem:[%s1247_s1 + $0xd0] sm:$0xf0] }
   0x5   :  { %329 = vmatpush.bf16.msra.mxu1 %v695_v7  ;;  %378 = vmatpush.bf16.msra.mxu2 %v699_v8  ;;  %v675_v16 = vor.u32 %v738_v13, %v674_v11  ;;  %v679_v17 = vor.u32 %v736_v14, %v676_v15  ;;  %v682_v18 = vld [vmem:[%s1247_s1 + $0xc8] sm:$0xf]  ;;  %v739_v19 = vld [vmem:[%s1247_s1 + $0xd4] sm:$0xf0]  ;;  %v737_v20 = vld [vmem:[%s1247_s1 + $0xcc] sm:$0xf] }
   0x6   :  { %427 = vmatpush.bf16.msra.mxu3 %v703_v12  ;;  %v683_v21 = vor.u32 %v739_v19, %v682_v18  ;;  %v684_v22 = vld [vmem:[%s1247_s1 + $0xd8] sm:$0xf0]  ;;  %v658_v23 = vld [vmem:[%s1247_s1 + $0xa0] sm:$0xf]  ;;  %v734_v24 = vld [vmem:[%s1247_s1 + $0xac] sm:$0xf0] }
   0x7   :  { %v687_v25 = vor.u32 %v737_v20, %v684_v22  ;;  %v732_v26 = vld [vmem:[%s1247_s1 + $0xa4] sm:$0xf]  ;;  %v660_v27 = vld [vmem:[%s1247_s1 + $0xb0] sm:$0xf0]  ;;  %v666_v28 = vld [vmem:[%s1247_s1 + $0xa8] sm:$0xf]  ;;  %v659_v29 = vor.u32 %v734_v24, %v658_v23 }
   0x8   :  { %281 = vmatpush.bf16.msra.mxu0 %v675_v16  ;;  %v735_v30 = vld [vmem:[%s1247_s1 + $0xb4] sm:$0xf0]  ;;  %v733_v31 = vld [vmem:[%s1247_s1 + $0xac] sm:$0xf]  ;;  %v668_v32 = vld [vmem:[%s1247_s1 + $0xb8] sm:$0xf0]  ;;  %v663_v33 = vor.u32 %v732_v26, %v660_v27 }
   0x9   :  { %330 = vmatpush.bf16.msra.mxu1 %v679_v17  ;;  %379 = vmatpush.bf16.msra.mxu2 %v683_v21  ;;  %v667_v34 = vor.u32 %v735_v30, %v666_v28  ;;  %v642_v35 = vld [vmem:[%s1247_s1 + $0x80] sm:$0xf]  ;;  %v730_v36 = vld [vmem:[%s1247_s1 + $0x8c] sm:$0xf0]  ;;  %v728_v37 = vld [vmem:[%s1247_s1 + $0x84] sm:$0xf]  ;;  %v671_v38 = vor.u32 %v733_v31, %v668_v32 }
   0xa   :  { %428 = vmatpush.bf16.msra.mxu3 %v687_v25  ;;  %v644_v39 = vld [vmem:[%s1247_s1 + $0x90] sm:$0xf0]  ;;  %v650_v40 = vld [vmem:[%s1247_s1 + $0x88] sm:$0xf]  ;;  %v731_v41 = vld [vmem:[%s1247_s1 + $0x94] sm:$0xf0]  ;;  %v643_v44 = vor.u32 %v730_v36, %v642_v35 }
   0xb   :  { %v729_v42 = vld [vmem:[%s1247_s1 + $0x8c] sm:$0xf]  ;;  %v652_v43 = vld [vmem:[%s1247_s1 + $0x98] sm:$0xf0]  ;;  %v647_v45 = vor.u32 %v728_v37, %v644_v39  ;;  %v651_v46 = vor.u32 %v731_v41, %v650_v40  ;;  %v626_v47 = vld [vmem:[%s1247_s1 + $0x60] sm:$0xf] }
   0xc   :  { %282 = vmatpush.bf16.msra.mxu0 %v659_v29  ;;  %v726_v48 = vld [vmem:[%s1247_s1 + $0x6c] sm:$0xf0]  ;;  %v724_v49 = vld [vmem:[%s1247_s1 + $0x64] sm:$0xf]  ;;  %v655_v50 = vor.u32 %v729_v42, %v652_v43  ;;  %v628_v51 = vld [vmem:[%s1247_s1 + $0x70] sm:$0xf0] }
   0xd   :  { %331 = vmatpush.bf16.msra.mxu1 %v663_v33  ;;  %380 = vmatpush.bf16.msra.mxu2 %v667_v34  ;;  %v634_v52 = vld [vmem:[%s1247_s1 + $0x68] sm:$0xf]  ;;  %v727_v53 = vld [vmem:[%s1247_s1 + $0x74] sm:$0xf0]  ;;  %v725_v54 = vld [vmem:[%s1247_s1 + $0x6c] sm:$0xf]  ;;  %v627_v56 = vor.u32 %v726_v48, %v626_v47  ;;  %v631_v57 = vor.u32 %v724_v49, %v628_v51 }
   0xe   :  { %429 = vmatpush.bf16.msra.mxu3 %v671_v38  ;;  %v636_v55 = vld [vmem:[%s1247_s1 + $0x78] sm:$0xf0]  ;;  %v635_v58 = vor.u32 %v727_v53, %v634_v52  ;;  %v610_v59 = vld [vmem:[%s1247_s1 + $0x40] sm:$0xf]  ;;  %v722_v60 = vld [vmem:[%s1247_s1 + $0x4c] sm:$0xf0] }
   0xf   :  { %v720_v61 = vld [vmem:[%s1247_s1 + $0x44] sm:$0xf]  ;;  %v639_v62 = vor.u32 %v725_v54, %v636_v55  ;;  %v612_v63 = vld [vmem:[%s1247_s1 + $0x50] sm:$0xf0]  ;;  %v618_v0 = vld [vmem:[%s1247_s1 + $0x48] sm:$0xf]  ;;  %v611_v4 = vor.u32 %v722_v60, %v610_v59 }
  0x10   :  { %283 = vmatpush.bf16.msra.mxu0 %v643_v44  ;;  %v723_v1 = vld [vmem:[%s1247_s1 + $0x54] sm:$0xf0]  ;;  %v721_v2 = vld [vmem:[%s1247_s1 + $0x4c] sm:$0xf]  ;;  %v620_v3 = vld [vmem:[%s1247_s1 + $0x58] sm:$0xf0]  ;;  %v615_v5 = vor.u32 %v720_v61, %v612_v63 }
  0x11   :  { %332 = vmatpush.bf16.msra.mxu1 %v647_v45  ;;  %381 = vmatpush.bf16.msra.mxu2 %v651_v46  ;;  %v619_v6 = vor.u32 %v723_v1, %v618_v0  ;;  %v594_v7 = vld [vmem:[%s1247_s1 + $0x20] sm:$0xf]  ;;  %v718_v8 = vld [vmem:[%s1247_s1 + $0x2c] sm:$0xf0]  ;;  %v716_v9 = vld [vmem:[%s1247_s1 + $0x24] sm:$0xf]  ;;  %v623_v10 = vor.u32 %v721_v2, %v620_v3 }
  0x12   :  { %430 = vmatpush.bf16.msra.mxu3 %v655_v50  ;;  %v596_v11 = vld [vmem:[%s1247_s1 + $0x30] sm:$0xf0]  ;;  %v602_v12 = vld [vmem:[%s1247_s1 + $0x28] sm:$0xf]  ;;  %v719_v13 = vld [vmem:[%s1247_s1 + $0x34] sm:$0xf0]  ;;  %v595_v16 = vor.u32 %v718_v8, %v594_v7 }
  0x13   :  { %v717_v14 = vld [vmem:[%s1247_s1 + $0x2c] sm:$0xf]  ;;  %v604_v15 = vld [vmem:[%s1247_s1 + $0x38] sm:$0xf0]  ;;  %v599_v17 = vor.u32 %v716_v9, %v596_v11  ;;  %v603_v18 = vor.u32 %v719_v13, %v602_v12  ;;  %v578_v19 = vld [vmem:[%s1247_s1] sm:$0xf] }
  0x14   :  { %284 = vmatpush.bf16.msra.mxu0 %v627_v56  ;;  %v714_v20 = vld [vmem:[%s1247_s1 + $0xc] sm:$0xf0]  ;;  %v712_v21 = vld [vmem:[%s1247_s1 + $0x4] sm:$0xf]  ;;  %v607_v22 = vor.u32 %v717_v14, %v604_v15  ;;  %v580_v23 = vld [vmem:[%s1247_s1 + $0x10] sm:$0xf0] }
  0x15   :  { %333 = vmatpush.bf16.msra.mxu1 %v631_v57  ;;  %382 = vmatpush.bf16.msra.mxu2 %v635_v58  ;;  %v586_v24 = vld [vmem:[%s1247_s1 + $0x8] sm:$0xf]  ;;  %v715_v25 = vld [vmem:[%s1247_s1 + $0x14] sm:$0xf0]  ;;  %v713_v26 = vld [vmem:[%s1247_s1 + $0xc] sm:$0xf]  ;;  %v579_v28 = vor.u32 %v714_v20, %v578_v19  ;;  %v583_v29 = vor.u32 %v712_v21, %v580_v23 }
  0x16   :  { %431 = vmatpush.bf16.msra.mxu3 %v639_v62  ;;  %v588_v27 = vld [vmem:[%s1247_s1 + $0x18] sm:$0xf0]  ;;  %v587_v30 = vor.u32 %v715_v25, %v586_v24  ;;  %v704_v32 = vld [vmem:[%s1248_s0] sm:$0xff]  ;;  %v705_v33 = vld [vmem:[%s1248_s0 + $0x8] sm:$0xff] }
  0x17   :  { %v591_v31 = vor.u32 %v713_v26, %v588_v27  ;;  %v706_v34 = vld [vmem:[%s1248_s0 + $0x10] sm:$0xff]  ;;  %v707_v35 = vld [vmem:[%s1248_s0 + $0x18] sm:$0xff]  ;;  %v708_v36 = vld [vmem:[%s1248_s0 + $0x20] sm:$0xff] }
  0x18   :  { %285 = vmatpush.bf16.msra.mxu0 %v611_v4  ;;  %v709_v37 = vld [vmem:[%s1248_s0 + $0x28] sm:$0xff]  ;;  %v710_v38 = vld [vmem:[%s1248_s0 + $0x30] sm:$0xff]  ;;  %v711_v39 = vld [vmem:[%s1248_s0 + $0x38] sm:$0xff] }
  0x19   :  { %334 = vmatpush.bf16.msra.mxu1 %v615_v5  ;;  %383 = vmatpush.bf16.msra.mxu2 %v619_v6  ;;  %v62_v40 = vld [vmem:[%s1249_s2] sm:$0xf] }
  0x1a   :  { %432 = vmatpush.bf16.msra.mxu3 %v623_v10  ;;  %v983_v41 = vperm.slane %v62_v40, 0  ;;  %v985_v42 = vperm.slane %v62_v40, 1  ;;  %v995_v47 = vperm.slane %v62_v40, 2  ;;  %v997_v48 = vperm.slane %v62_v40, 3 }
  0x1c   :  { %286 = vmatpush.bf16.msra.mxu0 %v595_v16 }
  0x1d   :  { %335 = vmatpush.bf16.msra.mxu1 %v599_v17  ;;  %384 = vmatpush.bf16.msra.mxu2 %v603_v18 }
  0x1e   :  { %433 = vmatpush.bf16.msra.mxu3 %v607_v22 }
  0x20   :  { %287 = vmatpush.bf16.msra.mxu0 %v579_v28 }
  0x21   :  { %336 = vmatpush.bf16.msra.mxu1 %v583_v29  ;;  %385 = vmatpush.bf16.msra.mxu2 %v587_v30 }
  0x22   :  { %434 = vmatpush.bf16.msra.mxu3 %v591_v31 }
  0x23   :  { %288 = vmatmul.bf16.vlgmr.msra.gmra.mxu0 %v704_v32 }
  0x24   :  { %337 = vmatmul.bf16.vlgmr.msra.gmra.mxu1 %v704_v32  ;;  %386 = vmatmul.bf16.vlgmr.msra.gmra.mxu2 %v704_v32 }
  0x25   :  { %435 = vmatmul.bf16.vlgmr.msra.gmra.mxu3 %v704_v32 }
  0x33   :  { %293 = vmatmul.bf16.gmra.mxu0 %v705_v33 }
  0x34   :  { %342 = vmatmul.bf16.gmra.mxu1 %v705_v33  ;;  %391 = vmatmul.bf16.gmra.mxu2 %v705_v33 }
  0x35   :  { %440 = vmatmul.bf16.gmra.mxu3 %v705_v33 }
  0x43   :  { %298 = vmatmul.bf16.gmra.mxu0 %v706_v34 }
  0x44   :  { %347 = vmatmul.bf16.gmra.mxu1 %v706_v34  ;;  %396 = vmatmul.bf16.gmra.mxu2 %v706_v34 }
  0x45   :  { %445 = vmatmul.bf16.gmra.mxu3 %v706_v34 }
  0x53   :  { %303 = vmatmul.bf16.gmra.mxu0 %v707_v35 }
  0x54   :  { %352 = vmatmul.bf16.gmra.mxu1 %v707_v35  ;;  %401 = vmatmul.bf16.gmra.mxu2 %v707_v35 }
  0x55   :  { %450 = vmatmul.bf16.gmra.mxu3 %v707_v35 }
  0x63   :  { %308 = vmatmul.bf16.gmra.mxu0 %v708_v36 }
  0x64   :  { %357 = vmatmul.bf16.gmra.mxu1 %v708_v36  ;;  %406 = vmatmul.bf16.gmra.mxu2 %v708_v36 }
  0x65   :  { %455 = vmatmul.bf16.gmra.mxu3 %v708_v36 }
  0x73   :  { %313 = vmatmul.bf16.gmra.mxu0 %v709_v37 }
  0x74   :  { %362 = vmatmul.bf16.gmra.mxu1 %v709_v37  ;;  %411 = vmatmul.bf16.gmra.mxu2 %v709_v37 }
  0x75   :  { %460 = vmatmul.bf16.gmra.mxu3 %v709_v37 }
  0x83   :  { %318 = vmatmul.bf16.gmra.mxu0 %v710_v38 }
  0x84   :  { %367 = vmatmul.bf16.gmra.mxu1 %v710_v38  ;;  %416 = vmatmul.bf16.gmra.mxu2 %v710_v38 }
  0x85   :  { %465 = vmatmul.bf16.gmra.mxu3 %v710_v38 }
  0x93   :  { %323 = vmatmul.bf16.gmra.mxu0 %v711_v39 }
  0x94   :  { %372 = vmatmul.bf16.gmra.mxu1 %v711_v39  ;;  %421 = vmatmul.bf16.gmra.mxu2 %v711_v39 }
  0x95   :  { %470 = vmatmul.bf16.gmra.mxu3 %v711_v39 }
  0xa0   :  { %v289_v43 = vpop.f32.mrf.mxu0 }
  0xa1   :  { %v290_v44 = vadd.f32 %v289_v43, %v983_v41  ;;  %v338_v45 = vpop.f32.mrf.mxu1 }
  0xa2   :  { %v339_v46 = vadd.f32 %v338_v45, %v985_v42 }
  0xa3   :  { %476 = vst [vmem:[%s1250_s3] sm:$0xff] %v290_v44 }
  0xa4   :  { %477 = vst [vmem:[%s1250_s3 + $0x8] sm:$0xff] %v339_v46 }
  0xa7   :  { %v387_v49 = vpop.f32.mrf.mxu2 }
  0xa8   :  { %v388_v50 = vadd.f32 %v387_v49, %v995_v47  ;;  %v436_v51 = vpop.f32.mrf.mxu3  ;;  %v291_v52 = vpop.f32.mrf.mxu0 }
  0xa9   :  { %v437_v53 = vadd.f32 %v436_v51, %v997_v48  ;;  %v292_v54 = vadd.f32 %v291_v52, %v983_v41  ;;  %v340_v55 = vpop.f32.mrf.mxu1 }
  0xaa   :  { %478 = vst [vmem:[%s1250_s3 + $0x10] sm:$0xff] %v388_v50  ;;  %v341_v56 = vadd.f32 %v340_v55, %v985_v42 }
  0xab   :  { %479 = vst [vmem:[%s1250_s3 + $0x18] sm:$0xff] %v437_v53 }
  0xac   :  { %480 = vst [vmem:[%s1250_s3 + $0x20] sm:$0xff] %v292_v54 }
  0xad   :  { %481 = vst [vmem:[%s1250_s3 + $0x28] sm:$0xff] %v341_v56 }
  0xaf   :  { %v389_v57 = vpop.f32.mrf.mxu2 }
  0xb0   :  { %v390_v58 = vadd.f32 %v389_v57, %v995_v47  ;;  %v438_v59 = vpop.f32.mrf.mxu3  ;;  %v294_v60 = vpop.f32.mrf.mxu0 }
  0xb1   :  { %v439_v61 = vadd.f32 %v438_v59, %v997_v48  ;;  %v295_v62 = vadd.f32 %v294_v60, %v983_v41  ;;  %v343_v63 = vpop.f32.mrf.mxu1 }
  0xb2   :  { %482 = vst [vmem:[%s1250_s3 + $0x30] sm:$0xff] %v390_v58  ;;  %v344_v0 = vadd.f32 %v343_v63, %v985_v42 }
  0xb3   :  { %483 = vst [vmem:[%s1250_s3 + $0x38] sm:$0xff] %v439_v61 }
  0xb4   :  { %484 = vst [vmem:[%s1250_s3 + $0x40] sm:$0xff] %v295_v62 }
  0xb5   :  { %485 = vst [vmem:[%s1250_s3 + $0x48] sm:$0xff] %v344_v0 }
  0xb7   :  { %v392_v1 = vpop.f32.mrf.mxu2 }
  0xb8   :  { %v393_v2 = vadd.f32 %v392_v1, %v995_v47  ;;  %v441_v3 = vpop.f32.mrf.mxu3  ;;  %v296_v4 = vpop.f32.mrf.mxu0 }
  0xb9   :  { %v442_v5 = vadd.f32 %v441_v3, %v997_v48  ;;  %v297_v6 = vadd.f32 %v296_v4, %v983_v41  ;;  %v345_v7 = vpop.f32.mrf.mxu1 }
  0xba   :  { %486 = vst [vmem:[%s1250_s3 + $0x50] sm:$0xff] %v393_v2  ;;  %v346_v8 = vadd.f32 %v345_v7, %v985_v42 }
  0xbb   :  { %487 = vst [vmem:[%s1250_s3 + $0x58] sm:$0xff] %v442_v5 }
  0xbc   :  { %488 = vst [vmem:[%s1250_s3 + $0x60] sm:$0xff] %v297_v6 }
  0xbd   :  { %489 = vst [vmem:[%s1250_s3 + $0x68] sm:$0xff] %v346_v8 }
  0xbf   :  { %v394_v9 = vpop.f32.mrf.mxu2 }
  0xc0   :  { %v395_v10 = vadd.f32 %v394_v9, %v995_v47  ;;  %v443_v11 = vpop.f32.mrf.mxu3  ;;  %v299_v12 = vpop.f32.mrf.mxu0 }
  0xc1   :  { %v444_v13 = vadd.f32 %v443_v11, %v997_v48  ;;  %v300_v14 = vadd.f32 %v299_v12, %v983_v41  ;;  %v348_v15 = vpop.f32.mrf.mxu1 }
  0xc2   :  { %490 = vst [vmem:[%s1250_s3 + $0x70] sm:$0xff] %v395_v10  ;;  %v349_v16 = vadd.f32 %v348_v15, %v985_v42 }
  0xc3   :  { %491 = vst [vmem:[%s1250_s3 + $0x78] sm:$0xff] %v444_v13 }
  0xc4   :  { %492 = vst [vmem:[%s1250_s3 + $0x80] sm:$0xff] %v300_v14 }
  0xc5   :  { %493 = vst [vmem:[%s1250_s3 + $0x88] sm:$0xff] %v349_v16 }
  0xc7   :  { %v397_v17 = vpop.f32.mrf.mxu2 }
  0xc8   :  { %v398_v18 = vadd.f32 %v397_v17, %v995_v47  ;;  %v446_v19 = vpop.f32.mrf.mxu3  ;;  %v301_v20 = vpop.f32.mrf.mxu0 }
  0xc9   :  { %v447_v21 = vadd.f32 %v446_v19, %v997_v48  ;;  %v302_v22 = vadd.f32 %v301_v20, %v983_v41  ;;  %v350_v23 = vpop.f32.mrf.mxu1 }
  0xca   :  { %494 = vst [vmem:[%s1250_s3 + $0x90] sm:$0xff] %v398_v18  ;;  %v351_v24 = vadd.f32 %v350_v23, %v985_v42 }
  0xcb   :  { %495 = vst [vmem:[%s1250_s3 + $0x98] sm:$0xff] %v447_v21 }
  0xcc   :  { %496 = vst [vmem:[%s1250_s3 + $0xa0] sm:$0xff] %v302_v22 }
  0xcd   :  { %497 = vst [vmem:[%s1250_s3 + $0xa8] sm:$0xff] %v351_v24 }
  0xcf   :  { %v399_v25 = vpop.f32.mrf.mxu2 }
  0xd0   :  { %v400_v26 = vadd.f32 %v399_v25, %v995_v47  ;;  %v448_v27 = vpop.f32.mrf.mxu3  ;;  %v304_v28 = vpop.f32.mrf.mxu0 }
  0xd1   :  { %v449_v29 = vadd.f32 %v448_v27, %v997_v48  ;;  %v305_v30 = vadd.f32 %v304_v28, %v983_v41  ;;  %v353_v31 = vpop.f32.mrf.mxu1 }
  0xd2   :  { %498 = vst [vmem:[%s1250_s3 + $0xb0] sm:$0xff] %v400_v26  ;;  %v354_v32 = vadd.f32 %v353_v31, %v985_v42 }
  0xd3   :  { %499 = vst [vmem:[%s1250_s3 + $0xb8] sm:$0xff] %v449_v29 }
  0xd4   :  { %500 = vst [vmem:[%s1250_s3 + $0xc0] sm:$0xff] %v305_v30 }
  0xd5   :  { %501 = vst [vmem:[%s1250_s3 + $0xc8] sm:$0xff] %v354_v32 }
  0xd7   :  { %v402_v33 = vpop.f32.mrf.mxu2 }
  0xd8   :  { %v403_v34 = vadd.f32 %v402_v33, %v995_v47  ;;  %v451_v35 = vpop.f32.mrf.mxu3  ;;  %v306_v36 = vpop.f32.mrf.mxu0 }
  0xd9   :  { %v452_v37 = vadd.f32 %v451_v35, %v997_v48  ;;  %v307_v38 = vadd.f32 %v306_v36, %v983_v41  ;;  %v355_v39 = vpop.f32.mrf.mxu1 }
  0xda   :  { %502 = vst [vmem:[%s1250_s3 + $0xd0] sm:$0xff] %v403_v34  ;;  %v356_v40 = vadd.f32 %v355_v39, %v985_v42 }
  0xdb   :  { %503 = vst [vmem:[%s1250_s3 + $0xd8] sm:$0xff] %v452_v37 }
  0xdc   :  { %504 = vst [vmem:[%s1250_s3 + $0xe0] sm:$0xff] %v307_v38 }
  0xdd   :  { %505 = vst [vmem:[%s1250_s3 + $0xe8] sm:$0xff] %v356_v40 }
  0xdf   :  { %v404_v43 = vpop.f32.mrf.mxu2 }
  0xe0   :  { %v405_v44 = vadd.f32 %v404_v43, %v995_v47  ;;  %v453_v45 = vpop.f32.mrf.mxu3  ;;  %v309_v46 = vpop.f32.mrf.mxu0 }
  0xe1   :  { %v454_v49 = vadd.f32 %v453_v45, %v997_v48  ;;  %v310_v50 = vadd.f32 %v309_v46, %v983_v41  ;;  %v358_v51 = vpop.f32.mrf.mxu1 }
  0xe2   :  { %506 = vst [vmem:[%s1250_s3 + $0xf0] sm:$0xff] %v405_v44  ;;  %v359_v52 = vadd.f32 %v358_v51, %v985_v42 }
  0xe3   :  { %507 = vst [vmem:[%s1250_s3 + $0xf8] sm:$0xff] %v454_v49 }
  0xe4   :  { %508 = vst [vmem:[%s1250_s3 + $0x100] sm:$0xff] %v310_v50 }
  0xe5   :  { %509 = vst [vmem:[%s1250_s3 + $0x108] sm:$0xff] %v359_v52 }
  0xe7   :  { %v407_v53 = vpop.f32.mrf.mxu2 }
  0xe8   :  { %v408_v54 = vadd.f32 %v407_v53, %v995_v47  ;;  %v456_v55 = vpop.f32.mrf.mxu3  ;;  %v311_v56 = vpop.f32.mrf.mxu0 }
  0xe9   :  { %v457_v57 = vadd.f32 %v456_v55, %v997_v48  ;;  %v312_v58 = vadd.f32 %v311_v56, %v983_v41  ;;  %v360_v59 = vpop.f32.mrf.mxu1 }
  0xea   :  { %510 = vst [vmem:[%s1250_s3 + $0x110] sm:$0xff] %v408_v54  ;;  %v361_v60 = vadd.f32 %v360_v59, %v985_v42 }
  0xeb   :  { %511 = vst [vmem:[%s1250_s3 + $0x118] sm:$0xff] %v457_v57 }
  0xec   :  { %512 = vst [vmem:[%s1250_s3 + $0x120] sm:$0xff] %v312_v58 }
  0xed   :  { %513 = vst [vmem:[%s1250_s3 + $0x128] sm:$0xff] %v361_v60 }
  0xef   :  { %v409_v61 = vpop.f32.mrf.mxu2 }
  0xf0   :  { %v410_v62 = vadd.f32 %v409_v61, %v995_v47  ;;  %v458_v63 = vpop.f32.mrf.mxu3  ;;  %v314_v0 = vpop.f32.mrf.mxu0 }
  0xf1   :  { %v459_v1 = vadd.f32 %v458_v63, %v997_v48  ;;  %v315_v2 = vadd.f32 %v314_v0, %v983_v41  ;;  %v363_v3 = vpop.f32.mrf.mxu1 }
  0xf2   :  { %514 = vst [vmem:[%s1250_s3 + $0x130] sm:$0xff] %v410_v62  ;;  %v364_v4 = vadd.f32 %v363_v3, %v985_v42 }
  0xf3   :  { %515 = vst [vmem:[%s1250_s3 + $0x138] sm:$0xff] %v459_v1 }
  0xf4   :  { %516 = vst [vmem:[%s1250_s3 + $0x140] sm:$0xff] %v315_v2 }
  0xf5   :  { %517 = vst [vmem:[%s1250_s3 + $0x148] sm:$0xff] %v364_v4 }
  0xf7   :  { %v412_v5 = vpop.f32.mrf.mxu2 }
  0xf8   :  { %v413_v6 = vadd.f32 %v412_v5, %v995_v47  ;;  %v461_v7 = vpop.f32.mrf.mxu3  ;;  %v316_v8 = vpop.f32.mrf.mxu0 }
  0xf9   :  { %v462_v9 = vadd.f32 %v461_v7, %v997_v48  ;;  %v317_v10 = vadd.f32 %v316_v8, %v983_v41  ;;  %v365_v11 = vpop.f32.mrf.mxu1 }
  0xfa   :  { %518 = vst [vmem:[%s1250_s3 + $0x150] sm:$0xff] %v413_v6  ;;  %v366_v12 = vadd.f32 %v365_v11, %v985_v42 }
  0xfb   :  { %519 = vst [vmem:[%s1250_s3 + $0x158] sm:$0xff] %v462_v9 }
  0xfc   :  { %520 = vst [vmem:[%s1250_s3 + $0x160] sm:$0xff] %v317_v10 }
  0xfd   :  { %521 = vst [vmem:[%s1250_s3 + $0x168] sm:$0xff] %v366_v12 }
  0xff   :  { %v414_v13 = vpop.f32.mrf.mxu2 }
 0x100   :  { %v415_v14 = vadd.f32 %v414_v13, %v995_v47  ;;  %v463_v15 = vpop.f32.mrf.mxu3  ;;  %v319_v16 = vpop.f32.mrf.mxu0 }
 0x101   :  { %v464_v17 = vadd.f32 %v463_v15, %v997_v48  ;;  %v320_v18 = vadd.f32 %v319_v16, %v983_v41  ;;  %v368_v19 = vpop.f32.mrf.mxu1 }
 0x102   :  { %522 = vst [vmem:[%s1250_s3 + $0x170] sm:$0xff] %v415_v14  ;;  %v369_v20 = vadd.f32 %v368_v19, %v985_v42 }
 0x103   :  { %523 = vst [vmem:[%s1250_s3 + $0x178] sm:$0xff] %v464_v17 }
 0x104   :  { %524 = vst [vmem:[%s1250_s3 + $0x180] sm:$0xff] %v320_v18 }
 0x105   :  { %525 = vst [vmem:[%s1250_s3 + $0x188] sm:$0xff] %v369_v20 }
 0x107   :  { %v417_v21 = vpop.f32.mrf.mxu2 }
 0x108   :  { %v418_v22 = vadd.f32 %v417_v21, %v995_v47  ;;  %v466_v23 = vpop.f32.mrf.mxu3  ;;  %v321_v24 = vpop.f32.mrf.mxu0 }
 0x109   :  { %v467_v25 = vadd.f32 %v466_v23, %v997_v48  ;;  %v322_v26 = vadd.f32 %v321_v24, %v983_v41  ;;  %v370_v27 = vpop.f32.mrf.mxu1 }
 0x10a   :  { %526 = vst [vmem:[%s1250_s3 + $0x190] sm:$0xff] %v418_v22  ;;  %v371_v28 = vadd.f32 %v370_v27, %v985_v42 }
 0x10b   :  { %527 = vst [vmem:[%s1250_s3 + $0x198] sm:$0xff] %v467_v25 }
 0x10c   :  { %528 = vst [vmem:[%s1250_s3 + $0x1a0] sm:$0xff] %v322_v26 }
 0x10d   :  { %529 = vst [vmem:[%s1250_s3 + $0x1a8] sm:$0xff] %v371_v28 }
 0x10f   :  { %v419_v29 = vpop.f32.mrf.mxu2 }
 0x110   :  { %v420_v30 = vadd.f32 %v419_v29, %v995_v47  ;;  %v468_v31 = vpop.f32.mrf.mxu3  ;;  %v324_v32 = vpop.f32.mrf.mxu0 }
 0x111   :  { %v469_v33 = vadd.f32 %v468_v31, %v997_v48  ;;  %v325_v34 = vadd.f32 %v324_v32, %v983_v41  ;;  %v373_v35 = vpop.f32.mrf.mxu1 }
 0x112   :  { %530 = vst [vmem:[%s1250_s3 + $0x1b0] sm:$0xff] %v420_v30  ;;  %v374_v36 = vadd.f32 %v373_v35, %v985_v42 }
 0x113   :  { %531 = vst [vmem:[%s1250_s3 + $0x1b8] sm:$0xff] %v469_v33 }
 0x114   :  { %532 = vst [vmem:[%s1250_s3 + $0x1c0] sm:$0xff] %v325_v34 }
 0x115   :  { %533 = vst [vmem:[%s1250_s3 + $0x1c8] sm:$0xff] %v374_v36 }
 0x117   :  { %v422_v37 = vpop.f32.mrf.mxu2 }
 0x118   :  { %v423_v38 = vadd.f32 %v422_v37, %v995_v47  ;;  %v471_v39 = vpop.f32.mrf.mxu3  ;;  %v326_v40 = vpop.f32.mrf.mxu0 }
 0x119   :  { %v472_v43 = vadd.f32 %v471_v39, %v997_v48  ;;  %v327_v44 = vadd.f32 %v326_v40, %v983_v41  ;;  %v375_v45 = vpop.f32.mrf.mxu1 }
 0x11a   :  { %534 = vst [vmem:[%s1250_s3 + $0x1d0] sm:$0xff] %v423_v38  ;;  %v376_v46 = vadd.f32 %v375_v45, %v985_v42 }
 0x11b   :  { %535 = vst [vmem:[%s1250_s3 + $0x1d8] sm:$0xff] %v472_v43 }
 0x11c   :  { %536 = vst [vmem:[%s1250_s3 + $0x1e0] sm:$0xff] %v327_v44 }
 0x11d   :  { %537 = vst [vmem:[%s1250_s3 + $0x1e8] sm:$0xff] %v376_v46 }
 0x11f   :  { %v424_v41 = vpop.f32.mrf.mxu2 }
 0x120   :  { %v425_v49 = vadd.f32 %v424_v41, %v995_v47  ;;  %v473_v50 = vpop.f32.mrf.mxu3 }
 0x121   :  { %v474_v51 = vadd.f32 %v473_v50, %v997_v48 }
 0x122   :  { %538 = vst [vmem:[%s1250_s3 + $0x1f0] sm:$0xff] %v425_v49 }
 0x123   :  { %539 = vst [vmem:[%s1250_s3 + $0x1f8] sm:$0xff] %v474_v51 }

// kernel: decoder_rnn_forward.4
= control target key start
LH: loop header
LB: loop body
LE: loop exit
PB: predicated region body
PF: predicated region fallthrough
CT: control target
= control target key end

     0   :  { %s7932_s1 = inlined_call_operand.vmem [shape: bf16[128,512], index: 1, kind: input, shape index: {}]   ;;  %s7933_s0 = inlined_call_operand.vmem [shape: f32[8,16,512], index: 0, kind: input, shape index: {}]   ;;  %s7934_s2 = inlined_call_operand.vmem [shape: bf16[8,16,128], index: 2, kind: output, shape index: {}]  }
   0x1   :  { %v3420_v0 = vld [vmem:[%s7932_s1 + $0xe0] sm:$0xf]  ;;  %v4507_v1 = vld [vmem:[%s7932_s1 + $0xec] sm:$0xf0]  ;;  %v4505_v2 = vld [vmem:[%s7932_s1 + $0xe4] sm:$0xf] }
   0x2   :  { %v3421_v3 = vor.u32 %v4507_v1, %v3420_v0  ;;  %v3422_v4 = vld [vmem:[%s7932_s1 + $0xf0] sm:$0xf0]  ;;  %v4506_v5 = vld [vmem:[%s7932_s1 + $0xec] sm:$0xf]  ;;  %v3430_v6 = vld [vmem:[%s7932_s1 + $0xf8] sm:$0xf0] }
   0x3   :  { %v3425_v7 = vor.u32 %v4505_v2, %v3422_v4  ;;  %v3433_v8 = vor.u32 %v4506_v5, %v3430_v6  ;;  %v3404_v9 = vld [vmem:[%s7932_s1 + $0xc0] sm:$0xf]  ;;  %v4503_v10 = vld [vmem:[%s7932_s1 + $0xcc] sm:$0xf0]  ;;  %v4501_v11 = vld [vmem:[%s7932_s1 + $0xc4] sm:$0xf] }
   0x4   :  { %228 = vmatpush.bf16.msra.mxu0 %v3421_v3  ;;  %v3405_v12 = vor.u32 %v4503_v10, %v3404_v9  ;;  %v3406_v13 = vld [vmem:[%s7932_s1 + $0xd0] sm:$0xf0]  ;;  %v4502_v14 = vld [vmem:[%s7932_s1 + $0xcc] sm:$0xf]  ;;  %v3414_v15 = vld [vmem:[%s7932_s1 + $0xd8] sm:$0xf0] }
   0x5   :  { %242 = vmatpush.bf16.msra.mxu1 %v3425_v7  ;;  %270 = vmatpush.bf16.msra.mxu3 %v3433_v8  ;;  %v3409_v16 = vor.u32 %v4501_v11, %v3406_v13  ;;  %v3417_v17 = vor.u32 %v4502_v14, %v3414_v15  ;;  %v3428_v18 = vld [vmem:[%s7932_s1 + $0xe8] sm:$0xf]  ;;  %v4508_v19 = vld [vmem:[%s7932_s1 + $0xf4] sm:$0xf0]  ;;  %v3388_v20 = vld [vmem:[%s7932_s1 + $0xa0] sm:$0xf] }
   0x6   :  { %v3429_v21 = vor.u32 %v4508_v19, %v3428_v18  ;;  %v4499_v22 = vld [vmem:[%s7932_s1 + $0xac] sm:$0xf0]  ;;  %v4497_v23 = vld [vmem:[%s7932_s1 + $0xa4] sm:$0xf]  ;;  %v3390_v24 = vld [vmem:[%s7932_s1 + $0xb0] sm:$0xf0] }
   0x7   :  { %v4498_v25 = vld [vmem:[%s7932_s1 + $0xac] sm:$0xf]  ;;  %v3398_v26 = vld [vmem:[%s7932_s1 + $0xb8] sm:$0xf0]  ;;  %v3412_v27 = vld [vmem:[%s7932_s1 + $0xc8] sm:$0xf]  ;;  %v3389_v28 = vor.u32 %v4499_v22, %v3388_v20  ;;  %v3393_v32 = vor.u32 %v4497_v23, %v3390_v24 }
   0x8   :  { %229 = vmatpush.bf16.msra.mxu0 %v3405_v12  ;;  %256 = vmatpush.bf16.msra.mxu2 %v3429_v21  ;;  %v4504_v29 = vld [vmem:[%s7932_s1 + $0xd4] sm:$0xf0]  ;;  %v3372_v30 = vld [vmem:[%s7932_s1 + $0x80] sm:$0xf]  ;;  %v4495_v31 = vld [vmem:[%s7932_s1 + $0x8c] sm:$0xf0]  ;;  %v3401_v33 = vor.u32 %v4498_v25, %v3398_v26 }
   0x9   :  { %243 = vmatpush.bf16.msra.mxu1 %v3409_v16  ;;  %271 = vmatpush.bf16.msra.mxu3 %v3417_v17  ;;  %v3413_v34 = vor.u32 %v4504_v29, %v3412_v27  ;;  %v4493_v35 = vld [vmem:[%s7932_s1 + $0x84] sm:$0xf]  ;;  %v3374_v36 = vld [vmem:[%s7932_s1 + $0x90] sm:$0xf0]  ;;  %v4494_v37 = vld [vmem:[%s7932_s1 + $0x8c] sm:$0xf]  ;;  %v3373_v41 = vor.u32 %v4495_v31, %v3372_v30 }
   0xa   :  { %v3382_v38 = vld [vmem:[%s7932_s1 + $0x98] sm:$0xf0]  ;;  %v3396_v39 = vld [vmem:[%s7932_s1 + $0xa8] sm:$0xf]  ;;  %v4500_v40 = vld [vmem:[%s7932_s1 + $0xb4] sm:$0xf0]  ;;  %v3377_v45 = vor.u32 %v4493_v35, %v3374_v36 }
   0xb   :  { %v3397_v42 = vor.u32 %v4500_v40, %v3396_v39  ;;  %v3356_v43 = vld [vmem:[%s7932_s1 + $0x60] sm:$0xf]  ;;  %v4491_v44 = vld [vmem:[%s7932_s1 + $0x6c] sm:$0xf0]  ;;  %v3385_v46 = vor.u32 %v4494_v37, %v3382_v38  ;;  %v4489_v47 = vld [vmem:[%s7932_s1 + $0x64] sm:$0xf] }
   0xc   :  { %230 = vmatpush.bf16.msra.mxu0 %v3389_v28  ;;  %257 = vmatpush.bf16.msra.mxu2 %v3413_v34  ;;  %v3380_v48 = vld [vmem:[%s7932_s1 + $0x88] sm:$0xf]  ;;  %v4496_v49 = vld [vmem:[%s7932_s1 + $0x94] sm:$0xf0]  ;;  %v3358_v50 = vld [vmem:[%s7932_s1 + $0x70] sm:$0xf0]  ;;  %v3357_v53 = vor.u32 %v4491_v44, %v3356_v43 }
   0xd   :  { %244 = vmatpush.bf16.msra.mxu1 %v3393_v32  ;;  %272 = vmatpush.bf16.msra.mxu3 %v3401_v33  ;;  %v4490_v51 = vld [vmem:[%s7932_s1 + $0x6c] sm:$0xf]  ;;  %v3366_v52 = vld [vmem:[%s7932_s1 + $0x78] sm:$0xf0]  ;;  %v3381_v54 = vor.u32 %v4496_v49, %v3380_v48  ;;  %v3340_v55 = vld [vmem:[%s7932_s1 + $0x40] sm:$0xf]  ;;  %v3361_v57 = vor.u32 %v4489_v47, %v3358_v50 }
   0xe   :  { %v4487_v56 = vld [vmem:[%s7932_s1 + $0x4c] sm:$0xf0]  ;;  %v3369_v58 = vor.u32 %v4490_v51, %v3366_v52  ;;  %v4485_v59 = vld [vmem:[%s7932_s1 + $0x44] sm:$0xf]  ;;  %v3364_v60 = vld [vmem:[%s7932_s1 + $0x68] sm:$0xf] }
   0xf   :  { %v4492_v61 = vld [vmem:[%s7932_s1 + $0x74] sm:$0xf0]  ;;  %v3342_v62 = vld [vmem:[%s7932_s1 + $0x50] sm:$0xf0]  ;;  %v4486_v63 = vld [vmem:[%s7932_s1 + $0x4c] sm:$0xf]  ;;  %v3341_v2 = vor.u32 %v4487_v56, %v3340_v55 }
  0x10   :  { %231 = vmatpush.bf16.msra.mxu0 %v3373_v41  ;;  %258 = vmatpush.bf16.msra.mxu2 %v3397_v42  ;;  %v3350_v0 = vld [vmem:[%s7932_s1 + $0x58] sm:$0xf0]  ;;  %v3324_v1 = vld [vmem:[%s7932_s1 + $0x20] sm:$0xf]  ;;  %v3365_v3 = vor.u32 %v4492_v61, %v3364_v60  ;;  %v4483_v4 = vld [vmem:[%s7932_s1 + $0x2c] sm:$0xf0]  ;;  %v3345_v7 = vor.u32 %v4485_v59, %v3342_v62 }
  0x11   :  { %245 = vmatpush.bf16.msra.mxu1 %v3377_v45  ;;  %273 = vmatpush.bf16.msra.mxu3 %v3385_v46  ;;  %v4481_v5 = vld [vmem:[%s7932_s1 + $0x24] sm:$0xf]  ;;  %v3326_v6 = vld [vmem:[%s7932_s1 + $0x30] sm:$0xf0]  ;;  %v3353_v8 = vor.u32 %v4486_v63, %v3350_v0  ;;  %v3348_v9 = vld [vmem:[%s7932_s1 + $0x48] sm:$0xf]  ;;  %v3325_v14 = vor.u32 %v4483_v4, %v3324_v1 }
  0x12   :  { %v4488_v10 = vld [vmem:[%s7932_s1 + $0x54] sm:$0xf0]  ;;  %v5084_v11 = vmov 0   ;;  %v4482_v12 = vld [vmem:[%s7932_s1 + $0x2c] sm:$0xf]  ;;  %v3329_v18 = vor.u32 %v4481_v5, %v3326_v6  ;;  %v20_v34 = vld [vmem:[%s7933_s0] sm:$0xff] }
  0x13   :  { %16 = vst [vmem:[#allocation2] sm:$0xf] %v5084_v11  ;;  %v3334_v13 = vld [vmem:[%s7932_s1 + $0x38] sm:$0xf0]  ;;  %v3349_v15 = vor.u32 %v4488_v10, %v3348_v9  ;;  %v3308_v16 = vld [vmem:[%s7932_s1] sm:$0xf] }
  0x14   :  { %232 = vmatpush.bf16.msra.mxu0 %v3357_v53  ;;  %259 = vmatpush.bf16.msra.mxu2 %v3381_v54  ;;  %17 = vst [vmem:[#allocation2 + $0x4] sm:$0xf] %v5084_v11  ;;  %v4479_v17 = vld [vmem:[%s7932_s1 + $0xc] sm:$0xf0]  ;;  %v3337_v19 = vor.u32 %v4482_v12, %v3334_v13  ;;  %v4477_v20 = vld [vmem:[%s7932_s1 + $0x4] sm:$0xf] }
  0x15   :  { %246 = vmatpush.bf16.msra.mxu1 %v3361_v57  ;;  %274 = vmatpush.bf16.msra.mxu3 %v3369_v58  ;;  %v3332_v21 = vld [vmem:[%s7932_s1 + $0x28] sm:$0xf]  ;;  %v4484_v22 = vld [vmem:[%s7932_s1 + $0x34] sm:$0xf0]  ;;  %v3310_v23 = vld [vmem:[%s7932_s1 + $0x10] sm:$0xf0]  ;;  %v3309_v26 = vor.u32 %v4479_v17, %v3308_v16 }
  0x16   :  { %v4478_v24 = vld [vmem:[%s7932_s1 + $0xc] sm:$0xf]  ;;  %v3318_v25 = vld [vmem:[%s7932_s1 + $0x18] sm:$0xf0]  ;;  %v3333_v27 = vor.u32 %v4484_v22, %v3332_v21  ;;  %v3313_v28 = vor.u32 %v4477_v20, %v3310_v23  ;;  %v3316_v30 = vld [vmem:[%s7932_s1 + $0x8] sm:$0xf] }
  0x17   :  { %v3321_v29 = vor.u32 %v4478_v24, %v3318_v25  ;;  %v4480_v31 = vld [vmem:[%s7932_s1 + $0x14] sm:$0xf0]  ;;  %v21_v35 = vld [vmem:[%s7933_s0 + $0x8] sm:$0xff]  ;;  %v24_v43 = vld [vmem:[%s7933_s0 + $0x20] sm:$0xff] }
  0x18   :  { %233 = vmatpush.bf16.msra.mxu0 %v3341_v2  ;;  %260 = vmatpush.bf16.msra.mxu2 %v3365_v3  ;;  %v3317_v33 = vor.u32 %v4480_v31, %v3316_v30  ;;  %v23_v42 = vld [vmem:[%s7933_s0 + $0x18] sm:$0xff]  ;;  %v25_v44 = vld [vmem:[%s7933_s0 + $0x28] sm:$0xff]  ;;  %v3566_v46 = vld [vmem:[%s7932_s1 + $0xe0] sm:$0xf] }
  0x19   :  { %247 = vmatpush.bf16.msra.mxu1 %v3345_v7  ;;  %275 = vmatpush.bf16.msra.mxu3 %v3353_v8  ;;  %v4540_v47 = vld [vmem:[%s7932_s1 + $0xec] sm:$0xf0]  ;;  %v4538_v48 = vld [vmem:[%s7932_s1 + $0xe4] sm:$0xf]  ;;  %v3568_v52 = vld [vmem:[%s7932_s1 + $0xf0] sm:$0xf0] }
  0x1a   :  { %v3567_v51 = vor.u32 %v4540_v47, %v3566_v46  ;;  %v3574_v53 = vld [vmem:[%s7932_s1 + $0xe8] sm:$0xf]  ;;  %v4541_v54 = vld [vmem:[%s7932_s1 + $0xf4] sm:$0xf0]  ;;  %v3571_v57 = vor.u32 %v4538_v48, %v3568_v52  ;;  %v4539_v59 = vld [vmem:[%s7932_s1 + $0xec] sm:$0xf] }
  0x1b   :  { %v4476_v32 = vld [vmem:[#allocation2] sm:$0xff]  ;;  %v3575_v58 = vor.u32 %v4541_v54, %v3574_v53  ;;  %v3576_v60 = vld [vmem:[%s7932_s1 + $0xf8] sm:$0xf0]  ;;  %v4536_v3 = vld [vmem:[%s7932_s1 + $0xcc] sm:$0xf0] }
  0x1c   :  { %234 = vmatpush.bf16.msra.mxu0 %v3325_v14  ;;  %261 = vmatpush.bf16.msra.mxu2 %v3349_v15  ;;  %v3579_v63 = vor.u32 %v4539_v59, %v3576_v60  ;;  %v3550_v2 = vld [vmem:[%s7932_s1 + $0xc0] sm:$0xf]  ;;  %v27_v8 = vld [vmem:[%s7933_s0 + $0x38] sm:$0xff]  ;;  %v4534_v10 = vld [vmem:[%s7932_s1 + $0xc4] sm:$0xf] }
  0x1d   :  { %248 = vmatpush.bf16.msra.mxu1 %v3329_v18  ;;  %276 = vmatpush.bf16.msra.mxu3 %v3337_v19  ;;  %v3551_v9 = vor.u32 %v4536_v3, %v3550_v2  ;;  %v3552_v11 = vld [vmem:[%s7932_s1 + $0xd0] sm:$0xf0]  ;;  %v3558_v14 = vld [vmem:[%s7932_s1 + $0xc8] sm:$0xf]  ;;  %v4537_v15 = vld [vmem:[%s7932_s1 + $0xd4] sm:$0xf0] }
  0x1e   :  { %v4535_v16 = vld [vmem:[%s7932_s1 + $0xcc] sm:$0xf]  ;;  %v3560_v18 = vld [vmem:[%s7932_s1 + $0xd8] sm:$0xf0]  ;;  %v3534_v19 = vld [vmem:[%s7932_s1 + $0xa0] sm:$0xf]  ;;  %v3555_v21 = vor.u32 %v4534_v10, %v3552_v11 }
  0x1f   :  { %v22_v20 = vld [vmem:[%s7933_s0 + $0x10] sm:$0xff]  ;;  %v4530_v23 = vld [vmem:[%s7932_s1 + $0xa4] sm:$0xf]  ;;  %v3542_v30 = vld [vmem:[%s7932_s1 + $0xa8] sm:$0xf] }
  0x20   :  { %235 = vmatpush.bf16.msra.mxu0 %v3309_v26  ;;  %262 = vmatpush.bf16.msra.mxu2 %v3333_v27  ;;  %v4532_v22 = vld [vmem:[%s7932_s1 + $0xac] sm:$0xf0]  ;;  %v3559_v26 = vor.u32 %v4537_v15, %v3558_v14  ;;  %v3563_v27 = vor.u32 %v4535_v16, %v3560_v18  ;;  %v3544_v10 = vld [vmem:[%s7932_s1 + $0xb8] sm:$0xf0]  ;;  %v3518_v11 = vld [vmem:[%s7932_s1 + $0x80] sm:$0xf] }
  0x21   :  { %249 = vmatpush.bf16.msra.mxu1 %v3313_v28  ;;  %277 = vmatpush.bf16.msra.mxu3 %v3321_v29  ;;  %v3535_v28 = vor.u32 %v4532_v22, %v3534_v19  ;;  %v3536_v29 = vld [vmem:[%s7932_s1 + $0xb0] sm:$0xf0]  ;;  %v4526_v16 = vld [vmem:[%s7932_s1 + $0x84] sm:$0xf]  ;;  %v3526_v22 = vld [vmem:[%s7932_s1 + $0x88] sm:$0xf] }
  0x23   :  { %236 = vmatmul.bf16.vlgmr.msra.gmra.mxu0 %v4476_v32 }
  0x24   :  { %250 = vmatmul.bf16.vlgmr.msra.gmra.mxu1 %v4476_v32  ;;  %278 = vmatmul.bf16.vlgmr.msra.gmra.mxu3 %v4476_v32 }
  0x25   :  { %263 = vmatpush.bf16.msra.mxu2 %v3317_v33  ;;  %637 = vmatpush.bf16.msrb.mxu0 %v3567_v51  ;;  %v3539_v33 = vor.u32 %v4530_v23, %v3536_v29  ;;  %v26_v51 = vld [vmem:[%s7933_s0 + $0x30] sm:$0xff]  ;;  %v4529_v23 = vld [vmem:[%s7932_s1 + $0x94] sm:$0xf0] }
  0x26   :  { %651 = vmatpush.bf16.msrb.mxu1 %v3571_v57  ;;  %679 = vmatpush.bf16.msrb.mxu3 %v3579_v63 }
  0x28   :  { %264 = vmatmul.bf16.vlgmr.msra.gmra.mxu2 %v4476_v32 }
  0x29   :  { %665 = vmatpush.bf16.msrb.mxu2 %v3575_v58  ;;  %638 = vmatpush.bf16.msrb.mxu0 %v3551_v9  ;;  %v4531_v9 = vld [vmem:[%s7932_s1 + $0xac] sm:$0xf] }
  0x2a   :  { %652 = vmatpush.bf16.msrb.mxu1 %v3555_v21  ;;  %680 = vmatpush.bf16.msrb.mxu3 %v3563_v27  ;;  %v3528_v27 = vld [vmem:[%s7932_s1 + $0x98] sm:$0xf0] }
  0x2d   :  { %666 = vmatpush.bf16.msrb.mxu2 %v3559_v26  ;;  %639 = vmatpush.bf16.msrb.mxu0 %v3535_v28  ;;  %v4527_v26 = vld [vmem:[%s7932_s1 + $0x8c] sm:$0xf] }
  0x2e   :  { %653 = vmatpush.bf16.msrb.mxu1 %v3539_v33  ;;  %v3502_v33 = vld [vmem:[%s7932_s1 + $0x60] sm:$0xf] }
  0xa0   :  { %v237_v36 = vpop.f32.mrf.mxu0 }
  0xa1   :  { %v284_v37 = vadd.f32 %v237_v36, %v20_v34  ;;  %v251_v38 = vpop.f32.mrf.mxu1  ;;  %v4533_v34 = vld [vmem:[%s7932_s1 + $0xb4] sm:$0xf0] }
  0xa2   :  { %v285_v39 = vadd.f32 %v251_v38, %v21_v35  ;;  %v3543_v38 = vor.u32 %v4533_v34, %v3542_v30 }
  0xa3   :  { %v3434_v40 = vmul.f32 -1.442695, %v284_v37 }
  0xa4   :  { %v3436_v41 = vmul.f32 -1.442695, %v285_v39  ;;  %667 = vmatpush.bf16.msrb.mxu2 %v3543_v38 }
  0xa5   :  { %4828 = vpow2.f32 %v3434_v40 }
  0xa6   :  { %4830 = vpow2.f32 %v3436_v41 }
  0xa7   :  { %v279_v45 = vpop.f32.mrf.mxu3 }
  0xa8   :  { %v287_v49 = vadd.f32 %v279_v45, %v23_v42  ;;  %v239_v50 = vpop.f32.mrf.mxu0 }
  0xa9   :  { %v288_v55 = vadd.f32 %v239_v50, %v24_v43  ;;  %v253_v56 = vpop.f32.mrf.mxu1 }
  0xaa   :  { %v3438_v61 = vmul.f32 -1.442695, %v287_v49  ;;  %v289_v62 = vadd.f32 %v253_v56, %v25_v44 }
  0xab   :  { %v4829_v0 = vpop.eup %4828  ;;  %v3435_v1 = vmul.f32 -1.442695, %v288_v55  ;;  %v265_v12 = vpop.f32.mrf.mxu2 }
  0xac   :  { %v4831_v4 = vpop.eup %4830  ;;  %v5337_v5 = vadd.f32 1.0, %v4829_v0  ;;  %4832 = vpow2.f32 %v3438_v61  ;;  %v3437_v6 = vmul.f32 -1.442695, %v289_v62  ;;  %v286_v37 = vadd.f32 %v265_v12, %v22_v20 }
  0xad   :  { %v5339_v7 = vadd.f32 1.0, %v4831_v4  ;;  %4834 = vpow2.f32 %v3435_v1 }
  0xae   :  { %4836 = vrcp.f32 %v5337_v5  ;;  %v309_v43 = vand.u32 2147483647, %v5337_v5  ;;  %v311_v47 = vand.u32 2147483648, %v5337_v5  ;;  %vm305_vm0 = vweird.f32 %v5337_v5 }
  0xaf   :  { %4838 = vrcp.f32 %v5339_v7  ;;  %v281_v13 = vpop.f32.mrf.mxu3  ;;  %v349_v45 = vand.u32 2147483648, %v5339_v7  ;;  %v347_v49 = vand.u32 2147483647, %v5339_v7  ;;  %vm343_vm2 = vweird.f32 %v5339_v7 }
  0xb0   :  { %4840 = vpow2.f32 %v3437_v6  ;;  %v291_v17 = vadd.f32 %v281_v13, %v27_v8  ;;  %vm5410_vm3 = vcmp.eq.f32.partialorder %v309_v43, 8.507059e+37  ;;  %v312_v59 = vor.u32 1.1754944e-38, %v311_v47  ;;  %v3510_v47 = vld [vmem:[%s7932_s1 + $0x68] sm:$0xf] }
  0xb1   :  { %v350_v57 = vor.u32 1.1754944e-38, %v349_v45  ;;  %vm5427_vm6 = vcmp.eq.f32.partialorder %v347_v49, 8.507059e+37 }
  0xb2   :  { %v4833_v24 = vpop.eup %4832  ;;  %v3439_v25 = vmul.f32 -1.442695, %v291_v17  ;;  %v3520_v17 = vld [vmem:[%s7932_s1 + $0x90] sm:$0xf0] }
  0xb3   :  { %v4835_v31 = vpop.eup %4834  ;;  %v5382_v32 = vadd.f32 1.0, %v4833_v24  ;;  %v267_v52 = vpop.f32.mrf.mxu2 }
  0xb4   :  { %v5387_v35 = vpop.eup %4836  ;;  %v5389_v36 = vadd.f32 1.0, %v4835_v31  ;;  %4842 = vpow2.f32 %v3439_v25  ;;  %v290_v1 = vadd.f32 %v267_v52, %v26_v51  ;;  %v4523_v52 = vld [vmem:[%s7932_s1 + $0x6c] sm:$0xf] }
  0xb5   :  { %v4839_v39 = vpop.eup %4838  ;;  %v301_v40 = vmul.f32 %v5387_v35, %v5337_v5  ;;  %4844 = vrcp.f32 %v5382_v32  ;;  %vm306_vm1 = vweird.f32 %v5387_v35 }
  0xb6   :  { %v4841_v41 = vpop.eup %4840  ;;  %v339_v42 = vmul.f32 %v4839_v39, %v5339_v7  ;;  %4846 = vrcp.f32 %v5389_v36  ;;  %vm344_vm4 = vweird.f32 %v4839_v39  ;;  %vm5423_vm5 = vmor %vm305_vm0, %vm306_vm1  ;;  %v324_v2 = vand.u32 2147483647, %v5389_v36  ;;  %v4528_v7 = vld [vmem:[%s7932_s1 + $0x8c] sm:$0xf0] }
  0xb7   :  { %v302_v44 = vsub.f32 1.0, %v301_v40  ;;  %v5398_v46 = vadd.f32 1.0, %v4841_v41  ;;  %4848 = vtanh.f32 %v286_v37  ;;  %vm345_vm7 = vmor %vm343_vm2, %vm344_vm4  ;;  %vm320_vm8 = vweird.f32 %v5389_v36  ;;  %v4524_v40 = vld [vmem:[%s7932_s1 + $0x6c] sm:$0xf0]  ;;  %v4522_v41 = vld [vmem:[%s7932_s1 + $0x64] sm:$0xf] }
  0xb8   :  { %v340_v48 = vsub.f32 1.0, %v339_v42  ;;  %vm5472_vm10 = vcmp.eq.f32.partialorder %v324_v2, 8.507059e+37  ;;  %v326_v21 = vand.u32 2147483648, %v5389_v36  ;;  %v3547_v37 = vor.u32 %v4531_v9, %v3544_v10  ;;  %v3504_v42 = vld [vmem:[%s7932_s1 + $0x70] sm:$0xf0] }
  0xb9   :  { %4850 = vrcp.f32 %v5398_v46  ;;  %v303_v50 = vmul.f32 %v5387_v35, %v302_v44  ;;  %vm358_vm9 = vweird.f32 %v5398_v46  ;;  %v364_v19 = vand.u32 2147483648, %v5398_v46  ;;  %v4521_v9 = vld [vmem:[%s7932_s1 + $0x54] sm:$0xf0] }
  0xba   :  { %v4843_v53 = vpop.eup %4842  ;;  %v341_v54 = vmul.f32 %v4839_v39, %v340_v48  ;;  %v362_v31 = vand.u32 2147483647, %v5398_v46  ;;  %v3519_v38 = vor.u32 %v4528_v7, %v3518_v11  ;;  %v327_v45 = vor.u32 1.1754944e-38, %v326_v21  ;;  %v4525_v48 = vld [vmem:[%s7932_s1 + $0x74] sm:$0xf0]  ;;  %681 = vmatpush.bf16.msrb.mxu3 %v3547_v37 }
  0xbb   :  { %v5414_v56 = vpop.eup %4844  ;;  %v304_v58 = vadd.f32 %v5387_v35, %v303_v50  ;;  %v5417_v60 = vadd.f32 1.0, %v4843_v53  ;;  %v365_v50 = vor.u32 1.1754944e-38, %v364_v19  ;;  %v3512_v53 = vld [vmem:[%s7932_s1 + $0x78] sm:$0xf0]  ;;  %v3503_v0 = vor.u32 %v4524_v40, %v3502_v33  ;;  %v4514_v21 = vld [vmem:[%s7932_s1 + $0x24] sm:$0xf] }
  0xbc   :  { %v5419_v61 = vpop.eup %4846  ;;  %v342_v63 = vadd.f32 %v4839_v39, %v341_v54  ;;  %v379_v3 = vmul.f32 %v5414_v56, %v5382_v32  ;;  %640 = vmatpush.bf16.msrb.mxu0 %v3519_v38  ;;  %v3511_v2 = vor.u32 %v4525_v48, %v3510_v47  ;;  %vm363_vm15 = vcmp.eq.f32.partialorder %v362_v31, 8.507059e+37  ;;  %v4515_v31 = vld [vmem:[%s7932_s1 + $0x2c] sm:$0xf]  ;;  %v3454_v37 = vld [vmem:[%s7932_s1] sm:$0xf] }
  0xbd   :  { %v316_v4 = vmul.f32 %v5419_v61, %v5389_v36  ;;  %v308_v5 = vsel %vm5423_vm5, %v5387_v35, %v304_v58  ;;  %4852 = vrcp.f32 %v5417_v60  ;;  %v4849_v6 = vpop.eup %4848  ;;  %vm321_vm11 = vweird.f32 %v5419_v61  ;;  %v4512_v38 = vld [vmem:[%s7932_s1 + $0xc] sm:$0xf0] }
  0xbe   :  { %v346_v8 = vsel %vm345_vm7, %v4839_v39, %v342_v63  ;;  %v313_v14 = vsel %vm5410_vm3, %v312_v59, %v308_v5  ;;  %v380_v24 = vsub.f32 1.0, %v379_v3  ;;  %4854 = vtanh.f32 %v290_v1  ;;  %vm322_vm12 = vmor %vm320_vm8, %vm321_vm11  ;;  %v3486_v59 = vld [vmem:[%s7932_s1 + $0x40] sm:$0xf]  ;;  %v4518_v3 = vld [vmem:[%s7932_s1 + $0x44] sm:$0xf] }
  0xbf   :  { %v5456_v12 = vpop.eup %4850  ;;  %v317_v13 = vsub.f32 1.0, %v316_v4  ;;  %v351_v15 = vsel %vm5427_vm6, %v350_v57, %v346_v8  ;;  %v412_v30 = vmul.f32 %v4849_v6, %v313_v14  ;;  %v3523_v39 = vor.u32 %v4526_v16, %v3520_v17  ;;  %v3488_v4 = vld [vmem:[%s7932_s1 + $0x50] sm:$0xf0]  ;;  %v3496_v14 = vld [vmem:[%s7932_s1 + $0x58] sm:$0xf0] }
  0xc0   :  { %v354_v18 = vmul.f32 %v5456_v12, %v5398_v46  ;;  %v410_v29 = vmul.f32 0.0, %v351_v15  ;;  %vm359_vm13 = vweird.f32 %v5456_v12  ;;  %v381_v49 = vmul.f32 %v5414_v56, %v380_v24  ;;  %v3494_v46 = vld [vmem:[%s7932_s1 + $0x48] sm:$0xf]  ;;  %641 = vmatpush.bf16.msrb.mxu0 %v3503_v0  ;;  %v3470_v17 = vld [vmem:[%s7932_s1 + $0x20] sm:$0xf] }
  0xc1   :  { %v318_v25 = vmul.f32 %v5419_v61, %v317_v13  ;;  %v3527_v36 = vor.u32 %v4529_v23, %v3526_v22  ;;  %654 = vmatpush.bf16.msrb.mxu1 %v3523_v39  ;;  %v3531_v58 = vor.u32 %v4527_v26, %v3528_v27  ;;  %vm360_vm14 = vmor %vm358_vm9, %vm359_vm13  ;;  %v3507_v1 = vor.u32 %v4522_v41, %v3504_v42  ;;  %v3472_v22 = vld [vmem:[%s7932_s1 + $0x30] sm:$0xf0]  ;;  %v3478_v26 = vld [vmem:[%s7932_s1 + $0x28] sm:$0xf] }
  0xc2   :  { %v355_v28 = vsub.f32 1.0, %v354_v18  ;;  %v5538_v63 = vadd.f32 %v412_v30, %v410_v29  ;;  %v387_v10 = vand.u32 2147483647, %v5382_v32  ;;  %v3515_v7 = vor.u32 %v4523_v52, %v3512_v53  ;;  %v4516_v18 = vld [vmem:[%s7932_s1 + $0x2c] sm:$0xf0] }
  0xc3   :  { %v5495_v34 = vpop.eup %4852  ;;  %v319_v35 = vadd.f32 %v5419_v61, %v318_v25  ;;  %668 = vmatpush.bf16.msrb.mxu2 %v3527_v36  ;;  %682 = vmatpush.bf16.msrb.mxu3 %v3531_v58  ;;  %v3491_v16 = vor.u32 %v4518_v3, %v3488_v4  ;;  %vm384_vm0 = vweird.f32 %v5414_v56  ;;  %v389_v19 = vand.u32 2147483648, %v5382_v32  ;;  %v4517_v27 = vld [vmem:[%s7932_s1 + $0x34] sm:$0xf0]  ;;  %v4510_v41 = vld [vmem:[%s7932_s1 + $0x4] sm:$0xf] }
  0xc4   :  { %v356_v43 = vmul.f32 %v5456_v12, %v355_v28  ;;  %v394_v44 = vmul.f32 %v5495_v34, %v5417_v60  ;;  %v4855_v62 = vpop.eup %4854  ;;  %v3495_v20 = vor.u32 %v4521_v9, %v3494_v46  ;;  %v382_v23 = vadd.f32 %v5414_v56, %v381_v49  ;;  %v3456_v42 = vld [vmem:[%s7932_s1 + $0x10] sm:$0xf0]  ;;  %v4511_v52 = vld [vmem:[%s7932_s1 + $0xc] sm:$0xf]  ;;  %v3464_v53 = vld [vmem:[%s7932_s1 + $0x18] sm:$0xf0] }
  0xc5   :  { %v323_v51 = vsel %vm322_vm12, %v5419_v61, %v319_v35  ;;  %v4520_v61 = vld [vmem:[%s7932_s1 + $0x4c] sm:$0xf0]  ;;  %655 = vmatpush.bf16.msrb.mxu1 %v3507_v1  ;;  %4856 = vtanh.f32 %v5538_v63  ;;  %v404_v24 = vand.u32 2147483648, %v5417_v60  ;;  %vm399_vm1 = vweird.f32 %v5495_v34  ;;  %v3480_v35 = vld [vmem:[%s7932_s1 + $0x38] sm:$0xf0]  ;;  %v3440_v1 = vld [vmem:[%s7933_s0 + $0x40] sm:$0xff] }
  0xc6   :  { %v395_v54 = vsub.f32 1.0, %v394_v44  ;;  %v328_v55 = vsel %vm5472_vm10, %v327_v45, %v323_v51  ;;  %v357_v57 = vadd.f32 %v5456_v12, %v356_v43  ;;  %v3487_v13 = vor.u32 %v4520_v61, %v3486_v59  ;;  %v4513_v45 = vld [vmem:[%s7932_s1 + $0x14] sm:$0xf0]  ;;  %v3700_v44 = vld [vmem:[%s7932_s1 + $0xd0] sm:$0xf0] }
  0xc7   :  { %v413_v8 = vmul.f32 %v4855_v62, %v328_v55  ;;  %669 = vmatpush.bf16.msrb.mxu2 %v3511_v2  ;;  %683 = vmatpush.bf16.msrb.mxu3 %v3515_v7  ;;  %v3471_v30 = vor.u32 %v4516_v18, %v3470_v17  ;;  %vm383_vm2 = vweird.f32 %v5382_v32  ;;  %v3475_v33 = vor.u32 %v4514_v21, %v3472_v22  ;;  %v3441_v2 = vld [vmem:[%s7933_s0 + $0x48] sm:$0xff]  ;;  %v3443_v9 = vld [vmem:[%s7933_s0 + $0x58] sm:$0xff] }
  0xc8   :  { %v396_v5 = vmul.f32 %v5495_v34, %v395_v54  ;;  %v361_v6 = vsel %vm360_vm14, %v5456_v12, %v357_v57  ;;  %v4519_v12 = vld [vmem:[%s7932_s1 + $0x4c] sm:$0xf]  ;;  %642 = vmatpush.bf16.msrb.mxu0 %v3487_v13  ;;  %vm5608_vm3 = vmor %vm383_vm2, %vm384_vm0  ;;  %vm398_vm4 = vweird.f32 %v5417_v60  ;;  %v402_v39 = vand.u32 2147483647, %v5417_v60  ;;  %v3462_v60 = vld [vmem:[%s7932_s1 + $0x8] sm:$0xf] }
  0xc9   :  { %v366_v11 = vsel %vm363_vm15, %v365_v50, %v361_v6  ;;  %v3499_v29 = vor.u32 %v4519_v12, %v3496_v14  ;;  %656 = vmatpush.bf16.msrb.mxu1 %v3491_v16  ;;  %v3479_v40 = vor.u32 %v4517_v27, %v3478_v26  ;;  %v386_v43 = vsel %vm5608_vm3, %v5414_v56, %v382_v23  ;;  %vm5625_vm5 = vmor %vm398_vm4, %vm399_vm1  ;;  %v3714_v13 = vld [vmem:[%s7932_s1 + $0xe0] sm:$0xf]  ;;  %v4573_v12 = vld [vmem:[%s7932_s1 + $0xec] sm:$0xf0] }
  0xca   :  { %v411_v15 = vmul.f32 0.0, %v366_v11  ;;  %v397_v28 = vadd.f32 %v5495_v34, %v396_v5  ;;  %v3483_v56 = vor.u32 %v4515_v31, %v3480_v35  ;;  %v3455_v48 = vor.u32 %v4512_v38, %v3454_v37  ;;  %v3445_v11 = vld [vmem:[%s7933_s0 + $0x68] sm:$0xff]  ;;  %v4571_v14 = vld [vmem:[%s7932_s1 + $0xe4] sm:$0xf]  ;;  %v4574_v21 = vld [vmem:[%s7932_s1 + $0xf4] sm:$0xf0] }
  0xcb   :  { %670 = vmatpush.bf16.msrb.mxu2 %v3495_v20  ;;  %684 = vmatpush.bf16.msrb.mxu3 %v3499_v29  ;;  %v4857_v49 = vpop.eup %4856  ;;  %v390_v50 = vor.u32 1.1754944e-38, %v389_v19  ;;  %v405_v51 = vor.u32 1.1754944e-38, %v404_v24  ;;  %v3459_v36 = vor.u32 %v4510_v41, %v3456_v42  ;;  %vm388_vm6 = vcmp.eq.f32.partialorder %v387_v10, 8.507059e+37  ;;  %v3444_v10 = vld [vmem:[%s7933_s0 + $0x60] sm:$0xff]  ;;  %v3716_v19 = vld [vmem:[%s7932_s1 + $0xf0] sm:$0xf0] }
  0xcc   :  { %v5582_v25 = vadd.f32 %v413_v8, %v411_v15  ;;  %v401_v47 = vsel %vm5625_vm5, %v5495_v34, %v397_v28  ;;  %643 = vmatpush.bf16.msrb.mxu0 %v3471_v30  ;;  %vm403_vm7 = vcmp.eq.f32.partialorder %v402_v39, 8.507059e+37  ;;  %v3463_v34 = vor.u32 %v4513_v45, %v3462_v60  ;;  %v3722_v20 = vld [vmem:[%s7932_s1 + $0xe8] sm:$0xf]  ;;  %v4572_v27 = vld [vmem:[%s7932_s1 + $0xec] sm:$0xf] }
  0xcd   :  { %657 = vmatpush.bf16.msrb.mxu1 %v3475_v33  ;;  %v391_v55 = vsel %vm388_vm6, %v390_v50, %v386_v43  ;;  %v406_v57 = vsel %vm403_vm7, %v405_v51, %v401_v47  ;;  %v3467_v61 = vor.u32 %v4511_v52, %v3464_v53  ;;  %v3715_v18 = vor.u32 %v4573_v12, %v3714_v13  ;;  %v3724_v28 = vld [vmem:[%s7932_s1 + $0xf8] sm:$0xf0]  ;;  %v3698_v35 = vld [vmem:[%s7932_s1 + $0xc0] sm:$0xf]  ;;  %v4569_v39 = vld [vmem:[%s7932_s1 + $0xcc] sm:$0xf0] }
  0xce   :  { %4858 = vtanh.f32 %v5582_v25  ;;  %v418_v58 = vmul.f32 %v4857_v49, %v391_v55  ;;  %v3719_v24 = vor.u32 %v4571_v14, %v3716_v19  ;;  %v3723_v26 = vor.u32 %v4574_v21, %v3722_v20  ;;  %v4567_v43 = vld [vmem:[%s7932_s1 + $0xc4] sm:$0xf]  ;;  %v3706_v60 = vld [vmem:[%s7932_s1 + $0xc8] sm:$0xf]  ;;  %v4570_v45 = vld [vmem:[%s7932_s1 + $0xd4] sm:$0xf0] }
  0xcf   :  { %671 = vmatpush.bf16.msrb.mxu2 %v3479_v40  ;;  %685 = vmatpush.bf16.msrb.mxu3 %v3483_v56  ;;  %v3727_v30 = vor.u32 %v4572_v27, %v3724_v28  ;;  %v3699_v42 = vor.u32 %v4569_v39, %v3698_v35  ;;  %v4568_v47 = vld [vmem:[%s7932_s1 + $0xcc] sm:$0xf]  ;;  %v3447_v56 = vld [vmem:[%s7933_s0 + $0x78] sm:$0xff]  ;;  %v3682_v50 = vld [vmem:[%s7932_s1 + $0xa0] sm:$0xf]  ;;  %v3703_v51 = vor.u32 %v4567_v43, %v3700_v44 }
  0xd0   :  { %644 = vmatpush.bf16.msrb.mxu0 %v3455_v48  ;;  %v3708_v49 = vld [vmem:[%s7932_s1 + $0xd8] sm:$0xf0]  ;;  %v4563_v52 = vld [vmem:[%s7932_s1 + $0xa4] sm:$0xf]  ;;  %v3666_v27 = vld [vmem:[%s7932_s1 + $0x80] sm:$0xf] }
  0xd1   :  { %658 = vmatpush.bf16.msrb.mxu1 %v3459_v36  ;;  %v4565_v36 = vld [vmem:[%s7932_s1 + $0xac] sm:$0xf0]  ;;  %v3668_v35 = vld [vmem:[%s7932_s1 + $0x90] sm:$0xf0]  ;;  %v4562_v43 = vld [vmem:[%s7932_s1 + $0x94] sm:$0xf0] }
  0xd2   :  { %v3683_v55 = vor.u32 %v4565_v36, %v3682_v50  ;;  %v4561_v28 = vld [vmem:[%s7932_s1 + $0x8c] sm:$0xf0] }
  0xd3   :  { %672 = vmatpush.bf16.msrb.mxu2 %v3463_v34  ;;  %686 = vmatpush.bf16.msrb.mxu3 %v3467_v61  ;;  %v3707_v34 = vor.u32 %v4570_v45, %v3706_v60  ;;  %v3667_v36 = vor.u32 %v4561_v28, %v3666_v27  ;;  %v3636_v28 = vld [vmem:[%s7932_s1 + $0x50] sm:$0xf0]  ;;  %v4549_v44 = vld [vmem:[%s7932_s1 + $0x2c] sm:$0xf0] }
  0xd4   :  { %v4859_v54 = vpop.eup %4858  ;;  %1047 = vmatpush.bf16.msra.mxu0 %v3715_v18 }
  0xd5   :  { %v419_v59 = vmul.f32 %v4859_v54, %v406_v57  ;;  %1061 = vmatpush.bf16.msra.mxu1 %v3719_v24  ;;  %v3711_v54 = vor.u32 %v4568_v47, %v3708_v49  ;;  %v3684_v57 = vld [vmem:[%s7932_s1 + $0xb0] sm:$0xf0]  ;;  %v4606_v49 = vld [vmem:[%s7932_s1 + $0xec] sm:$0xf0] }
  0xd7   :  { %v4743_v62 = vpack.c.bf16 %v419_v59, %v418_v58  ;;  %1075 = vmatpush.bf16.msra.mxu2 %v3723_v26  ;;  %1089 = vmatpush.bf16.msra.mxu3 %v3727_v30  ;;  %v3690_v58 = vld [vmem:[%s7932_s1 + $0xa8] sm:$0xf]  ;;  %v4566_v59 = vld [vmem:[%s7932_s1 + $0xb4] sm:$0xf0] }
  0xd8   :  { %1048 = vmatpush.bf16.msra.mxu0 %v3699_v42  ;;  %v3674_v42 = vld [vmem:[%s7932_s1 + $0x88] sm:$0xf] }
  0xd9   :  { %4744 = vst [vmem:[#allocation2] sm:$0xff] %v4743_v62   ;;  %1062 = vmatpush.bf16.msra.mxu1 %v3703_v51 }
  0xda   :  { %4749 = vst [vmem:[%s7934_s2] sm:$0xff] %v4743_v62  }
  0xdb   :  { %1076 = vmatpush.bf16.msra.mxu2 %v3707_v34  ;;  %1090 = vmatpush.bf16.msra.mxu3 %v3711_v54 }
  0xdc   :  { %1049 = vmatpush.bf16.msra.mxu0 %v3683_v55 }
  0xe0   :  { %v4509_v0 = vld [vmem:[#allocation2] sm:$0xff]  ;;  %1050 = vmatpush.bf16.msra.mxu0 %v3667_v36 }
  0xe1   :  { %645 = vmatmul.bf16.vlgmr.msrb.gmra.mxu0 %v4509_v0  ;;  %659 = vmatmul.bf16.vlgmr.msrb.gmra.mxu1 %v4509_v0 }
  0xe2   :  { %673 = vmatmul.bf16.vlgmr.msrb.gmra.mxu2 %v4509_v0  ;;  %687 = vmatmul.bf16.vlgmr.msrb.gmra.mxu3 %v4509_v0 }
 0x15e   :  { %v646_v3 = vpop.f32.mrf.mxu0  ;;  %v660_v4 = vpop.f32.mrf.mxu1 }
 0x15f   :  { %v693_v5 = vadd.f32 %v3440_v1, %v646_v3  ;;  %v694_v6 = vadd.f32 %v3441_v2, %v660_v4  ;;  %v3687_v1 = vor.u32 %v4563_v52, %v3684_v57  ;;  %v4545_v57 = vld [vmem:[%s7932_s1 + $0xc] sm:$0xf0] }
 0x161   :  { %v3580_v8 = vmul.f32 -1.442695, %v693_v5  ;;  %v3582_v46 = vmul.f32 -1.442695, %v694_v6  ;;  %v3691_v6 = vor.u32 %v4566_v59, %v3690_v58  ;;  %1063 = vmatpush.bf16.msra.mxu1 %v3687_v1  ;;  %v4555_v58 = vld [vmem:[%s7932_s1 + $0x64] sm:$0xf] }
 0x162   :  { %v3652_v59 = vld [vmem:[%s7932_s1 + $0x70] sm:$0xf0] }
 0x163   :  { %4860 = vpow2.f32 %v3580_v8  ;;  %1077 = vmatpush.bf16.msra.mxu2 %v3691_v6  ;;  %v3660_v6 = vld [vmem:[%s7932_s1 + $0x78] sm:$0xf0] }
 0x164   :  { %4862 = vpow2.f32 %v3582_v46 }
 0x165   :  { %v688_v7 = vpop.f32.mrf.mxu3  ;;  %v674_v41 = vpop.f32.mrf.mxu2 }
 0x166   :  { %v696_v15 = vadd.f32 %v3443_v9, %v688_v7  ;;  %v648_v16 = vpop.f32.mrf.mxu0  ;;  %v662_v17 = vpop.f32.mrf.mxu1  ;;  %v3442_v9 = vld [vmem:[%s7933_s0 + $0x50] sm:$0xff] }
 0x167   :  { %v697_v22 = vadd.f32 %v3444_v10, %v648_v16  ;;  %v698_v23 = vadd.f32 %v3445_v11, %v662_v17  ;;  %v695_v19 = vadd.f32 %v3442_v9, %v674_v41 }
 0x168   :  { %v3584_v29 = vmul.f32 -1.442695, %v696_v15  ;;  %v3446_v15 = vld [vmem:[%s7933_s0 + $0x70] sm:$0xff] }
 0x169   :  { %v4861_v31 = vpop.eup %4860  ;;  %v3581_v33 = vmul.f32 -1.442695, %v697_v22  ;;  %v3583_v32 = vmul.f32 -1.442695, %v698_v23  ;;  %v4564_v22 = vld [vmem:[%s7932_s1 + $0xac] sm:$0xf] }
 0x16a   :  { %v4863_v37 = vpop.eup %4862  ;;  %v5689_v38 = vadd.f32 1.0, %v4861_v31  ;;  %4864 = vpow2.f32 %v3584_v29  ;;  %v3692_v23 = vld [vmem:[%s7932_s1 + $0xb8] sm:$0xf0] }
 0x16b   :  { %v5694_v40 = vadd.f32 1.0, %v4863_v37  ;;  %4866 = vpow2.f32 %v3581_v33  ;;  %v4559_v33 = vld [vmem:[%s7932_s1 + $0x84] sm:$0xf]  ;;  %v3695_v41 = vor.u32 %v4564_v22, %v3692_v23 }
 0x16c   :  { %4868 = vrcp.f32 %v5689_v38  ;;  %v718_v3 = vand.u32 2147483647, %v5689_v38  ;;  %v720_v4 = vand.u32 2147483648, %v5689_v38  ;;  %vm714_vm8 = vweird.f32 %v5689_v38  ;;  %v4551_v23 = vld [vmem:[%s7932_s1 + $0x44] sm:$0xf] }
 0x16d   :  { %4870 = vrcp.f32 %v5694_v40  ;;  %v690_v48 = vpop.f32.mrf.mxu3  ;;  %v758_v7 = vand.u32 2147483648, %v5694_v40  ;;  %v756_v13 = vand.u32 2147483647, %v5694_v40  ;;  %v676_v16 = vpop.f32.mrf.mxu2  ;;  %vm752_vm12 = vweird.f32 %v5694_v40  ;;  %1091 = vmatpush.bf16.msra.mxu3 %v3695_v41 }
 0x16e   :  { %4872 = vpow2.f32 %v3583_v32  ;;  %v700_v0 = vadd.f32 %v3447_v56, %v690_v48  ;;  %vm5764_vm9 = vcmp.eq.f32.partialorder %v718_v3, 8.507059e+37  ;;  %v5768_v21 = vor.u32 1.1754944e-38, %v720_v4  ;;  %v3650_v56 = vld [vmem:[%s7932_s1 + $0x60] sm:$0xf]  ;;  %v4558_v3 = vld [vmem:[%s7932_s1 + $0x74] sm:$0xf0] }
 0x16f   :  { %v699_v30 = vadd.f32 %v3446_v15, %v676_v16  ;;  %v759_v32 = vor.u32 1.1754944e-38, %v758_v7  ;;  %vm5814_vm14 = vcmp.eq.f32.partialorder %v756_v13, 8.507059e+37  ;;  %v3671_v52 = vor.u32 %v4559_v33, %v3668_v35  ;;  %v4556_v4 = vld [vmem:[%s7932_s1 + $0x6c] sm:$0xf]  ;;  %v4554_v33 = vld [vmem:[%s7932_s1 + $0x54] sm:$0xf0] }
 0x170   :  { %v4865_v53 = vpop.eup %4864  ;;  %v3585_v17 = vmul.f32 -1.442695, %v700_v0  ;;  %v3655_v16 = vor.u32 %v4555_v58, %v3652_v59  ;;  %v4552_v35 = vld [vmem:[%s7932_s1 + $0x4c] sm:$0xf] }
 0x171   :  { %v4867_v61 = vpop.eup %4866  ;;  %v5737_v62 = vadd.f32 1.0, %v4865_v53  ;;  %v4557_v53 = vld [vmem:[%s7932_s1 + $0x6c] sm:$0xf0]  ;;  %1064 = vmatpush.bf16.msra.mxu1 %v3671_v52 }
 0x172   :  { %v5739_v2 = vpop.eup %4868  ;;  %v5743_v5 = vadd.f32 1.0, %v4867_v61  ;;  %v3658_v61 = vld [vmem:[%s7932_s1 + $0x68] sm:$0xf]  ;;  %v3651_v15 = vor.u32 %v4557_v53, %v3650_v56  ;;  %v4550_v56 = vld [vmem:[%s7932_s1 + $0x34] sm:$0xf0] }
 0x173   :  { %v5745_v8 = vpop.eup %4870  ;;  %v710_v46 = vmul.f32 %v5739_v2, %v5689_v38  ;;  %4874 = vrcp.f32 %v5737_v62  ;;  %vm715_vm10 = vweird.f32 %v5739_v2  ;;  %v3676_v38 = vld [vmem:[%s7932_s1 + $0x98] sm:$0xf0]  ;;  %v4548_v53 = vld [vmem:[%s7932_s1 + $0x2c] sm:$0xf] }
 0x174   :  { %v4873_v10 = vpop.eup %4872  ;;  %v748_v11 = vmul.f32 %v5745_v8, %v5694_v40  ;;  %4876 = vrcp.f32 %v5743_v5  ;;  %vm753_vm11 = vweird.f32 %v5745_v8  ;;  %v733_v31 = vand.u32 2147483647, %v5743_v5  ;;  %vm5809_vm13 = vmor %vm714_vm8, %vm715_vm10  ;;  %v4560_v40 = vld [vmem:[%s7932_s1 + $0x8c] sm:$0xf]  ;;  %1051 = vmatpush.bf16.msra.mxu0 %v3651_v15 }
 0x175   :  { %v711_v12 = vsub.f32 1.0, %v710_v46  ;;  %v5758_v14 = vadd.f32 1.0, %v4873_v10  ;;  %v735_v47 = vand.u32 2147483648, %v5743_v5  ;;  %vm5832_vm15 = vmor %vm752_vm12, %vm753_vm11  ;;  %vm729_vm1 = vweird.f32 %v5743_v5  ;;  %v3634_v10 = vld [vmem:[%s7932_s1 + $0x40] sm:$0xf]  ;;  %1065 = vmatpush.bf16.msra.mxu1 %v3655_v16 }
 0x176   :  { %v749_v18 = vsub.f32 1.0, %v748_v11  ;;  %vm5851_vm0 = vcmp.eq.f32.partialorder %v733_v31, 8.507059e+37  ;;  %v4553_v11 = vld [vmem:[%s7932_s1 + $0x4c] sm:$0xf0] }
 0x177   :  { %v712_v24 = vmul.f32 %v5739_v2, %v711_v12  ;;  %4878 = vrcp.f32 %v5758_v14  ;;  %v773_v26 = vand.u32 2147483648, %v5758_v14  ;;  %v771_v51 = vand.u32 2147483647, %v5758_v14 }
 0x178   :  { %v750_v29 = vmul.f32 %v5745_v8, %v749_v18  ;;  %4880 = vpow2.f32 %v3585_v17  ;;  %v736_v9 = vor.u32 1.1754944e-38, %v735_v47  ;;  %v3679_v12 = vor.u32 %v4560_v40, %v3676_v38  ;;  %v3620_v40 = vld [vmem:[%s7932_s1 + $0x30] sm:$0xf0]  ;;  %v3626_v38 = vld [vmem:[%s7932_s1 + $0x28] sm:$0xf] }
 0x179   :  { %v5795_v37 = vpop.eup %4874  ;;  %v713_v39 = vadd.f32 %v5739_v2, %v712_v24  ;;  %v5836_v50 = vor.u32 1.1754944e-38, %v773_v26  ;;  %4882 = vtanh.f32 %v695_v19  ;;  %v3659_v24 = vor.u32 %v4558_v3, %v3658_v61 }
 0x17a   :  { %v751_v60 = vadd.f32 %v5745_v8, %v750_v29  ;;  %v5828_v48 = vpop.eup %4876  ;;  %v5847_v54 = vmul.f32 %v5795_v37, %v5737_v62  ;;  %4884 = vtanh.f32 %v699_v30  ;;  %1092 = vmatpush.bf16.msra.mxu3 %v3679_v12  ;;  %v3663_v26 = vor.u32 %v4556_v4, %v3660_v6  ;;  %v3642_v29 = vld [vmem:[%s7932_s1 + $0x48] sm:$0xf] }
 0x17b   :  { %v717_v34 = vsel %vm5809_vm13, %v5739_v2, %v713_v39  ;;  %v725_v55 = vmul.f32 %v5828_v48, %v5743_v5  ;;  %v3675_v2 = vor.u32 %v4562_v43, %v3674_v42  ;;  %vm730_vm2 = vweird.f32 %v5828_v48  ;;  %v3618_v43 = vld [vmem:[%s7932_s1 + $0x20] sm:$0xf]  ;;  %v3610_v6 = vld [vmem:[%s7932_s1 + $0x8] sm:$0xf] }
 0x17c   :  { %v755_v1 = vsel %vm5832_vm15, %v5745_v8, %v751_v60  ;;  %v722_v13 = vsel %vm5764_vm9, %v5768_v21, %v717_v34  ;;  %v789_v18 = vsub.f32 1.0, %v5847_v54  ;;  %vm5902_vm3 = vmor %vm729_vm1, %vm730_vm2  ;;  %v3635_v27 = vor.u32 %v4553_v11, %v3634_v10  ;;  %v4547_v60 = vld [vmem:[%s7932_s1 + $0x24] sm:$0xf] }
 0x17d   :  { %v5864_v0 = vpop.eup %4878  ;;  %v726_v46 = vsub.f32 1.0, %v725_v55  ;;  %1078 = vmatpush.bf16.msra.mxu2 %v3675_v2  ;;  %v760_v17 = vsel %vm5814_vm14, %v759_v32, %v755_v1  ;;  %v3644_v32 = vld [vmem:[%s7932_s1 + $0x58] sm:$0xf0]  ;;  %vm767_vm5 = vweird.f32 %v5758_v14  ;;  %v3639_v47 = vor.u32 %v4551_v23, %v3636_v28  ;;  %v4543_v1 = vld [vmem:[%s7932_s1 + $0x4] sm:$0xf] }
 0x17e   :  { %v763_v8 = vmul.f32 %v5864_v0, %v5758_v14  ;;  %v4881_v7 = vpop.eup %4880  ;;  %vm768_vm4 = vweird.f32 %v5864_v0  ;;  %v819_v41 = vmul.f32 %v760_v17, %v5538_v63  ;;  %vm772_vm7 = vcmp.eq.f32.partialorder %v771_v51, 8.507059e+37  ;;  %1093 = vmatpush.bf16.msra.mxu3 %v3663_v26  ;;  %1052 = vmatpush.bf16.msra.mxu0 %v3635_v27  ;;  %v3628_v14 = vld [vmem:[%s7932_s1 + $0x38] sm:$0xf0]  ;;  %v3602_v51 = vld [vmem:[%s7932_s1] sm:$0xf] }
 0x17f   :  { %v727_v22 = vmul.f32 %v5828_v48, %v726_v46  ;;  %v5906_v21 = vadd.f32 1.0, %v4881_v7  ;;  %v4883_v5 = vpop.eup %4882  ;;  %vm5953_vm6 = vmor %vm767_vm5, %vm768_vm4  ;;  %v3643_v36 = vor.u32 %v4554_v33, %v3642_v29  ;;  %v3647_v52 = vor.u32 %v4552_v35, %v3644_v32  ;;  %1066 = vmatpush.bf16.msra.mxu1 %v3639_v47  ;;  %v3604_v2 = vld [vmem:[%s7932_s1 + $0x10] sm:$0xf0]  ;;  %v3592_v47 = vld [vmem:[%s7933_s0 + $0xa0] sm:$0xff] }
 0x180   :  { %v764_v19 = vsub.f32 1.0, %v763_v8  ;;  %v4885_v39 = vpop.eup %4884  ;;  %v821_v42 = vmul.f32 %v4883_v5, %v722_v13  ;;  %v3619_v55 = vor.u32 %v4549_v44, %v3618_v43  ;;  %v3623_v61 = vor.u32 %v4547_v60, %v3620_v40  ;;  %v3612_v13 = vld [vmem:[%s7932_s1 + $0x18] sm:$0xf0]  ;;  %v3593_v40 = vld [vmem:[%s7933_s0 + $0xa8] sm:$0xff] }
 0x181   :  { %v728_v31 = vadd.f32 %v5828_v48, %v727_v22  ;;  %4886 = vrcp.f32 %v5906_v21  ;;  %1079 = vmatpush.bf16.msra.mxu2 %v3659_v24  ;;  %v790_v3 = vmul.f32 %v5795_v37, %v789_v18  ;;  %v3631_v8 = vor.u32 %v4548_v53, %v3628_v14  ;;  %v4607_v14 = vld [vmem:[%s7932_s1 + $0xf4] sm:$0xf0] }
 0x182   :  { %v765_v30 = vmul.f32 %v5864_v0, %v764_v19  ;;  %v5976_v58 = vadd.f32 %v821_v42, %v819_v41  ;;  %1094 = vmatpush.bf16.msra.mxu3 %v3647_v52  ;;  %1053 = vmatpush.bf16.msra.mxu0 %v3619_v55  ;;  %v3607_v7 = vor.u32 %v4543_v1, %v3604_v2  ;;  %vm793_vm8 = vweird.f32 %v5795_v37  ;;  %v3870_v55 = vld [vmem:[%s7932_s1 + $0xe8] sm:$0xf]  ;;  %v3872_v1 = vld [vmem:[%s7932_s1 + $0xf8] sm:$0xf0] }
 0x183   :  { %v732_v63 = vsel %vm5902_vm3, %v5828_v48, %v728_v31  ;;  %1067 = vmatpush.bf16.msra.mxu1 %v3623_v61  ;;  %v791_v15 = vadd.f32 %v5795_v37, %v790_v3  ;;  %vm792_vm9 = vweird.f32 %v5737_v62  ;;  %v798_v17 = vand.u32 2147483648, %v5737_v62 }
 0x184   :  { %v766_v45 = vadd.f32 %v5864_v0, %v765_v30  ;;  %v737_v48 = vsel %vm5851_vm0, %v736_v9, %v732_v63  ;;  %v3603_v9 = vor.u32 %v4545_v57, %v3602_v51  ;;  %4888 = vtanh.f32 %v5976_v58  ;;  %vm794_vm11 = vmor %vm792_vm9, %vm793_vm8 }
 0x185   :  { %v822_v54 = vmul.f32 %v4885_v39, %v737_v48  ;;  %1080 = vmatpush.bf16.msra.mxu2 %v3643_v36  ;;  %v813_v18 = vand.u32 2147483648, %v5906_v21  ;;  %v796_v22 = vand.u32 2147483647, %v5737_v62  ;;  %v811_v20 = vand.u32 2147483647, %v5906_v21  ;;  %v3589_v39 = vld [vmem:[%s7933_s0 + $0x88] sm:$0xff] }
 0x186   :  { %v770_v34 = vsel %vm5953_vm6, %v5864_v0, %v766_v45  ;;  %v3627_v0 = vor.u32 %v4550_v56, %v3626_v38  ;;  %1095 = vmatpush.bf16.msra.mxu3 %v3631_v8  ;;  %1054 = vmatpush.bf16.msra.mxu0 %v3603_v9  ;;  %v795_v24 = vsel %vm794_vm11, %v5795_v37, %v791_v15  ;;  %vm807_vm12 = vweird.f32 %v5906_v21  ;;  %v3591_v45 = vld [vmem:[%s7933_s0 + $0x98] sm:$0xff]  ;;  %v3862_v56 = vld [vmem:[%s7932_s1 + $0xe0] sm:$0xf]  ;;  %v4604_v48 = vld [vmem:[%s7932_s1 + $0xe4] sm:$0xf] }
 0x187   :  { %v775_v59 = vsel %vm772_vm7, %v5836_v50, %v770_v34  ;;  %v4546_v50 = vld [vmem:[%s7932_s1 + $0x14] sm:$0xf0]  ;;  %v4887_v46 = vpop.eup %4886  ;;  %1068 = vmatpush.bf16.msra.mxu1 %v3607_v7  ;;  %v799_v28 = vor.u32 1.1754944e-38, %v798_v17  ;;  %v814_v29 = vor.u32 1.1754944e-38, %v813_v18  ;;  %vm797_vm14 = vcmp.eq.f32.partialorder %v796_v22, 8.507059e+37 }
 0x188   :  { %v820_v4 = vmul.f32 %v775_v59, %v5582_v25  ;;  %v803_v11 = vmul.f32 %v4887_v46, %v5906_v21  ;;  %v4544_v25 = vld [vmem:[%s7932_s1 + $0xc] sm:$0xf]  ;;  %v3611_v12 = vor.u32 %v4546_v50, %v3610_v6  ;;  %vm808_vm10 = vweird.f32 %v4887_v46  ;;  %v3588_v21 = vld [vmem:[%s7933_s0 + $0x80] sm:$0xff]  ;;  %v3848_v15 = vld [vmem:[%s7932_s1 + $0xd0] sm:$0xf0] }
 0x189   :  { %1081 = vmatpush.bf16.msra.mxu2 %v3627_v0  ;;  %v3615_v19 = vor.u32 %v4544_v25, %v3612_v13  ;;  %vm809_vm13 = vmor %vm807_vm12, %vm808_vm10  ;;  %vm812_vm15 = vcmp.eq.f32.partialorder %v811_v20, 8.507059e+37  ;;  %v800_v30 = vsel %vm797_vm14, %v799_v28, %v795_v24  ;;  %v3863_v34 = vor.u32 %v4606_v49, %v3862_v56  ;;  %v4605_v0 = vld [vmem:[%s7932_s1 + $0xec] sm:$0xf]  ;;  %v3846_v50 = vld [vmem:[%s7932_s1 + $0xc0] sm:$0xf] }
 0x18a   :  { %v5993_v10 = vadd.f32 %v822_v54, %v820_v4  ;;  %v804_v16 = vsub.f32 1.0, %v803_v11  ;;  %v4889_v27 = vpop.eup %4888  ;;  %v3864_v54 = vld [vmem:[%s7932_s1 + $0xf0] sm:$0xf0]  ;;  %v3871_v61 = vor.u32 %v4607_v14, %v3870_v55  ;;  %v3875_v3 = vor.u32 %v4605_v0, %v3872_v1  ;;  %v4602_v11 = vld [vmem:[%s7932_s1 + $0xcc] sm:$0xf0] }
 0x18b   :  { %1096 = vmatpush.bf16.msra.mxu3 %v3615_v19  ;;  %v827_v33 = vmul.f32 %v4889_v27, %v800_v30  ;;  %v3867_v59 = vor.u32 %v4604_v48, %v3864_v54  ;;  %1457 = vmatpush.bf16.msrb.mxu0 %v3863_v34  ;;  %v3847_v13 = vor.u32 %v4602_v11, %v3846_v50  ;;  %v4603_v17 = vld [vmem:[%s7932_s1 + $0xd4] sm:$0xf0]  ;;  %v4601_v18 = vld [vmem:[%s7932_s1 + $0xcc] sm:$0xf]  ;;  %v3830_v20 = vld [vmem:[%s7932_s1 + $0xa0] sm:$0xf] }
 0x18c   :  { %4890 = vtanh.f32 %v5993_v10  ;;  %v805_v23 = vmul.f32 %v4887_v46, %v804_v16  ;;  %v3854_v16 = vld [vmem:[%s7932_s1 + $0xc8] sm:$0xf]  ;;  %v3595_v19 = vld [vmem:[%s7933_s0 + $0xb8] sm:$0xff]  ;;  %v4596_v27 = vld [vmem:[%s7932_s1 + $0xa4] sm:$0xf] }
 0x18d   :  { %1082 = vmatpush.bf16.msra.mxu2 %v3611_v12  ;;  %1471 = vmatpush.bf16.msrb.mxu1 %v3867_v59  ;;  %v4600_v12 = vld [vmem:[%s7932_s1 + $0xc4] sm:$0xf]  ;;  %v3832_v30 = vld [vmem:[%s7932_s1 + $0xb0] sm:$0xf0]  ;;  %v3814_v0 = vld [vmem:[%s7932_s1 + $0x80] sm:$0xf] }
 0x18e   :  { %v806_v26 = vadd.f32 %v4887_v46, %v805_v23  ;;  %v3856_v23 = vld [vmem:[%s7932_s1 + $0xd8] sm:$0xf0]  ;;  %v3851_v24 = vor.u32 %v4600_v12, %v3848_v15  ;;  %v4594_v1 = vld [vmem:[%s7932_s1 + $0x8c] sm:$0xf0]  ;;  %v3816_v50 = vld [vmem:[%s7932_s1 + $0x90] sm:$0xf0] }
 0x18f   :  { %1499 = vmatpush.bf16.msrb.mxu3 %v3875_v3  ;;  %1458 = vmatpush.bf16.msrb.mxu0 %v3847_v13  ;;  %v3822_v13 = vld [vmem:[%s7932_s1 + $0x88] sm:$0xf]  ;;  %v4595_v12 = vld [vmem:[%s7932_s1 + $0x94] sm:$0xf0]  ;;  %v4582_v15 = vld [vmem:[%s7932_s1 + $0x2c] sm:$0xf0] }
 0x190   :  { %v810_v62 = vsel %vm809_vm13, %v4887_v46, %v806_v26  ;;  %v4598_v26 = vld [vmem:[%s7932_s1 + $0xac] sm:$0xf0] }
 0x191   :  { %v815_v31 = vsel %vm812_vm15, %v814_v29, %v810_v62  ;;  %1485 = vmatpush.bf16.msrb.mxu2 %v3871_v61  ;;  %v3855_v29 = vor.u32 %v4603_v17, %v3854_v16  ;;  %v3831_v62 = vor.u32 %v4598_v26, %v3830_v20  ;;  %1472 = vmatpush.bf16.msrb.mxu1 %v3851_v24 }
 0x192   :  { %v4891_v5 = vpop.eup %4890  ;;  %v3815_v26 = vor.u32 %v4594_v1, %v3814_v0  ;;  %v3784_v1 = vld [vmem:[%s7932_s1 + $0x50] sm:$0xf0] }
 0x193   :  { %v828_v35 = vmul.f32 %v4891_v5, %v815_v31  ;;  %v3859_v5 = vor.u32 %v4601_v18, %v3856_v23  ;;  %v3838_v31 = vld [vmem:[%s7932_s1 + $0xa8] sm:$0xf]  ;;  %1459 = vmatpush.bf16.msrb.mxu0 %v3831_v62  ;;  %v4639_v23 = vld [vmem:[%s7932_s1 + $0xec] sm:$0xf0] }
 0x195   :  { %v4753_v32 = vpack.c.bf16 %v828_v35, %v827_v33  ;;  %v4599_v33 = vld [vmem:[%s7932_s1 + $0xb4] sm:$0xf0]  ;;  %1486 = vmatpush.bf16.msrb.mxu2 %v3855_v29  ;;  %1500 = vmatpush.bf16.msrb.mxu3 %v3859_v5 }
 0x197   :  { %4754 = vst [vmem:[#allocation2] sm:$0xff] %v4753_v32   ;;  %1460 = vmatpush.bf16.msrb.mxu0 %v3815_v26 }
 0x198   :  { %4820 = vst [vmem:[%s7934_s2 + $0x8] sm:$0xff] %v4753_v32  }
 0x19e   :  { %v4542_v37 = vld [vmem:[#allocation2] sm:$0xff] }
 0x19f   :  { %1055 = vmatmul.bf16.vlgmr.msra.gmra.mxu0 %v4542_v37  ;;  %1069 = vmatmul.bf16.vlgmr.msra.gmra.mxu1 %v4542_v37 }
 0x1a0   :  { %1083 = vmatmul.bf16.vlgmr.msra.gmra.mxu2 %v4542_v37  ;;  %1097 = vmatmul.bf16.vlgmr.msra.gmra.mxu3 %v4542_v37 }
 0x21c   :  { %v1056_v41 = vpop.f32.mrf.mxu0  ;;  %v1070_v42 = vpop.f32.mrf.mxu1 }
 0x21d   :  { %v1103_v43 = vadd.f32 %v3588_v21, %v1056_v41  ;;  %v1104_v44 = vadd.f32 %v3589_v39, %v1070_v42  ;;  %v3835_v21 = vor.u32 %v4596_v27, %v3832_v30  ;;  %v4578_v30 = vld [vmem:[%s7932_s1 + $0xc] sm:$0xf0] }
 0x21f   :  { %v3728_v60 = vmul.f32 -1.442695, %v1103_v43  ;;  %v3730_v63 = vmul.f32 -1.442695, %v1104_v44  ;;  %v3839_v44 = vor.u32 %v4599_v33, %v3838_v31  ;;  %1473 = vmatpush.bf16.msrb.mxu1 %v3835_v21  ;;  %v4588_v31 = vld [vmem:[%s7932_s1 + $0x64] sm:$0xf] }
 0x220   :  { %v3800_v33 = vld [vmem:[%s7932_s1 + $0x70] sm:$0xf0] }
 0x221   :  { %4892 = vpow2.f32 %v3728_v60  ;;  %1487 = vmatpush.bf16.msrb.mxu2 %v3839_v44  ;;  %v3808_v44 = vld [vmem:[%s7932_s1 + $0x78] sm:$0xf0] }
 0x222   :  { %4894 = vpow2.f32 %v3730_v63 }
 0x223   :  { %v1098_v38 = vpop.f32.mrf.mxu3  ;;  %v1084_v25 = vpop.f32.mrf.mxu2 }
 0x224   :  { %v1106_v36 = vadd.f32 %v3591_v45, %v1098_v38  ;;  %v1058_v52 = vpop.f32.mrf.mxu0  ;;  %v1072_v53 = vpop.f32.mrf.mxu1  ;;  %v3590_v45 = vld [vmem:[%s7933_s0 + $0x90] sm:$0xff] }
 0x225   :  { %v1107_v51 = vadd.f32 %v3592_v47, %v1058_v52  ;;  %v1108_v57 = vadd.f32 %v3593_v40, %v1072_v53  ;;  %v1105_v54 = vadd.f32 %v3590_v45, %v1084_v25 }
 0x226   :  { %v3732_v2 = vmul.f32 -1.442695, %v1106_v36  ;;  %v3594_v36 = vld [vmem:[%s7933_s0 + $0xb0] sm:$0xff] }
 0x227   :  { %v4893_v4 = vpop.eup %4892  ;;  %v3729_v6 = vmul.f32 -1.442695, %v1107_v51  ;;  %v3731_v9 = vmul.f32 -1.442695, %v1108_v57  ;;  %v4597_v51 = vld [vmem:[%s7932_s1 + $0xac] sm:$0xf] }
 0x228   :  { %v4895_v46 = vpop.eup %4894  ;;  %v6058_v8 = vadd.f32 1.0, %v4893_v4  ;;  %4896 = vpow2.f32 %v3732_v2  ;;  %v3840_v57 = vld [vmem:[%s7932_s1 + $0xb8] sm:$0xf0] }
 0x229   :  { %v6063_v7 = vadd.f32 1.0, %v4895_v46  ;;  %4898 = vpow2.f32 %v3729_v6  ;;  %v4592_v6 = vld [vmem:[%s7932_s1 + $0x84] sm:$0xf]  ;;  %v3843_v25 = vor.u32 %v4597_v51, %v3840_v57 }
 0x22a   :  { %4900 = vrcp.f32 %v6058_v8  ;;  %v1128_v41 = vand.u32 2147483647, %v6058_v8  ;;  %v1130_v42 = vand.u32 2147483648, %v6058_v8  ;;  %vm1124_vm0 = vweird.f32 %v6058_v8  ;;  %v4584_v57 = vld [vmem:[%s7932_s1 + $0x44] sm:$0xf] }
 0x22b   :  { %4902 = vrcp.f32 %v6063_v7  ;;  %v1100_v22 = vpop.f32.mrf.mxu3  ;;  %v1168_v38 = vand.u32 2147483648, %v6063_v7  ;;  %v1166_v56 = vand.u32 2147483647, %v6063_v7  ;;  %v1086_v52 = vpop.f32.mrf.mxu2  ;;  %vm1162_vm4 = vweird.f32 %v6063_v7  ;;  %1501 = vmatpush.bf16.msrb.mxu3 %v3843_v25 }
 0x22c   :  { %4904 = vpow2.f32 %v3731_v9  ;;  %v1110_v37 = vadd.f32 %v3595_v19, %v1100_v22  ;;  %vm6133_vm1 = vcmp.eq.f32.partialorder %v1128_v41, 8.507059e+37  ;;  %v6137_v14 = vor.u32 1.1754944e-38, %v1130_v42  ;;  %v3798_v19 = vld [vmem:[%s7932_s1 + $0x60] sm:$0xf]  ;;  %v4591_v41 = vld [vmem:[%s7932_s1 + $0x74] sm:$0xf0] }
 0x22d   :  { %v1109_v3 = vadd.f32 %v3594_v36, %v1086_v52  ;;  %v1169_v9 = vor.u32 1.1754944e-38, %v1168_v38  ;;  %vm6183_vm6 = vcmp.eq.f32.partialorder %v1166_v56, 8.507059e+37  ;;  %v3819_v27 = vor.u32 %v4592_v6, %v3816_v50  ;;  %v4589_v42 = vld [vmem:[%s7932_s1 + $0x6c] sm:$0xf]  ;;  %v4587_v6 = vld [vmem:[%s7932_s1 + $0x54] sm:$0xf0] }
 0x22e   :  { %v4897_v28 = vpop.eup %4896  ;;  %v3733_v53 = vmul.f32 -1.442695, %v1110_v37  ;;  %v3803_v52 = vor.u32 %v4588_v31, %v3800_v33  ;;  %v4585_v50 = vld [vmem:[%s7932_s1 + $0x4c] sm:$0xf] }
 0x22f   :  { %v4899_v35 = vpop.eup %4898  ;;  %v6106_v32 = vadd.f32 1.0, %v4897_v28  ;;  %v4590_v28 = vld [vmem:[%s7932_s1 + $0x6c] sm:$0xf0]  ;;  %1474 = vmatpush.bf16.msrb.mxu1 %v3819_v27 }
 0x230   :  { %v6108_v39 = vpop.eup %4900  ;;  %v6112_v43 = vadd.f32 1.0, %v4899_v35  ;;  %v3806_v35 = vld [vmem:[%s7932_s1 + $0x68] sm:$0xf]  ;;  %v3799_v36 = vor.u32 %v4590_v28, %v3798_v19  ;;  %v4583_v19 = vld [vmem:[%s7932_s1 + $0x34] sm:$0xf0] }
 0x231   :  { %v6114_v60 = vpop.eup %4902  ;;  %v1120_v63 = vmul.f32 %v6108_v39, %v6058_v8  ;;  %4906 = vrcp.f32 %v6106_v32  ;;  %vm1125_vm2 = vweird.f32 %v6108_v39  ;;  %v3824_v8 = vld [vmem:[%s7932_s1 + $0x98] sm:$0xf0]  ;;  %v4581_v28 = vld [vmem:[%s7932_s1 + $0x2c] sm:$0xf] }
 0x232   :  { %v4905_v47 = vpop.eup %4904  ;;  %v1158_v40 = vmul.f32 %v6114_v60, %v6063_v7  ;;  %4908 = vrcp.f32 %v6112_v43  ;;  %vm1163_vm3 = vweird.f32 %v6114_v60  ;;  %v1143_v4 = vand.u32 2147483647, %v6112_v43  ;;  %vm6178_vm5 = vmor %vm1124_vm0, %vm1125_vm2  ;;  %v4593_v7 = vld [vmem:[%s7932_s1 + $0x8c] sm:$0xf]  ;;  %1461 = vmatpush.bf16.msrb.mxu0 %v3799_v36 }
 0x233   :  { %v1121_v49 = vsub.f32 1.0, %v1120_v63  ;;  %v6127_v48 = vadd.f32 1.0, %v4905_v47  ;;  %v1145_v18 = vand.u32 2147483648, %v6112_v43  ;;  %vm6201_vm7 = vmor %vm1162_vm4, %vm1163_vm3  ;;  %vm1139_vm9 = vweird.f32 %v6112_v43  ;;  %v3782_v47 = vld [vmem:[%s7932_s1 + $0x40] sm:$0xf]  ;;  %1475 = vmatpush.bf16.msrb.mxu1 %v3803_v52 }
 0x234   :  { %v1159_v34 = vsub.f32 1.0, %v1158_v40  ;;  %vm6220_vm8 = vcmp.eq.f32.partialorder %v1143_v4, 8.507059e+37  ;;  %v4586_v40 = vld [vmem:[%s7932_s1 + $0x4c] sm:$0xf0] }
 0x235   :  { %v1122_v59 = vmul.f32 %v6108_v39, %v1121_v49  ;;  %4910 = vrcp.f32 %v6127_v48  ;;  %v1183_v61 = vand.u32 2147483648, %v6127_v48  ;;  %v1181_v24 = vand.u32 2147483647, %v6127_v48 }
 0x236   :  { %v1160_v2 = vmul.f32 %v6114_v60, %v1159_v34  ;;  %4912 = vpow2.f32 %v3733_v53  ;;  %v1146_v45 = vor.u32 1.1754944e-38, %v1145_v18  ;;  %v3827_v49 = vor.u32 %v4593_v7, %v3824_v8  ;;  %v3768_v7 = vld [vmem:[%s7932_s1 + $0x30] sm:$0xf0]  ;;  %v3774_v8 = vld [vmem:[%s7932_s1 + $0x28] sm:$0xf] }
 0x237   :  { %v6164_v46 = vpop.eup %4906  ;;  %v1123_v11 = vadd.f32 %v6108_v39, %v1122_v59  ;;  %v6205_v20 = vor.u32 1.1754944e-38, %v1183_v61  ;;  %4914 = vtanh.f32 %v1105_v54  ;;  %v3807_v59 = vor.u32 %v4591_v41, %v3806_v35 }
 0x238   :  { %v1161_v16 = vadd.f32 %v6114_v60, %v1160_v2  ;;  %v6197_v22 = vpop.eup %4908  ;;  %v6216_v5 = vmul.f32 %v6164_v46, %v6106_v32  ;;  %4916 = vtanh.f32 %v1109_v3  ;;  %1502 = vmatpush.bf16.msrb.mxu3 %v3827_v49  ;;  %v3811_v61 = vor.u32 %v4589_v42, %v3808_v44  ;;  %v3790_v2 = vld [vmem:[%s7932_s1 + $0x48] sm:$0xf] }
 0x239   :  { %v1127_v29 = vsel %vm6178_vm5, %v6108_v39, %v1123_v11  ;;  %v1135_v62 = vmul.f32 %v6197_v22, %v6112_v43  ;;  %v3823_v39 = vor.u32 %v4595_v12, %v3822_v13  ;;  %vm1140_vm10 = vweird.f32 %v6197_v22  ;;  %v3766_v12 = vld [vmem:[%s7932_s1 + $0x20] sm:$0xf]  ;;  %v3758_v44 = vld [vmem:[%s7932_s1 + $0x8] sm:$0xf] }
 0x23a   :  { %v1165_v21 = vsel %vm6201_vm7, %v6114_v60, %v1161_v16  ;;  %v1132_v56 = vsel %vm6133_vm1, %v6137_v14, %v1127_v29  ;;  %v1199_v34 = vsub.f32 1.0, %v6216_v5  ;;  %vm6271_vm11 = vmor %vm1139_vm9, %vm1140_vm10  ;;  %v3783_v0 = vor.u32 %v4586_v40, %v3782_v47  ;;  %v4580_v16 = vld [vmem:[%s7932_s1 + $0x24] sm:$0xf] }
 0x23b   :  { %v6233_v37 = vpop.eup %4910  ;;  %v1136_v63 = vsub.f32 1.0, %v1135_v62  ;;  %1488 = vmatpush.bf16.msrb.mxu2 %v3823_v39  ;;  %v1170_v53 = vsel %vm6183_vm6, %v1169_v9, %v1165_v21  ;;  %v3792_v9 = vld [vmem:[%s7932_s1 + $0x58] sm:$0xf0]  ;;  %vm1177_vm13 = vweird.f32 %v6127_v48  ;;  %v3787_v18 = vor.u32 %v4584_v57, %v3784_v1  ;;  %v4576_v21 = vld [vmem:[%s7932_s1 + $0x4] sm:$0xf] }
 0x23c   :  { %v1173_v60 = vmul.f32 %v6233_v37, %v6127_v48  ;;  %v4913_v38 = vpop.eup %4912  ;;  %vm1178_vm12 = vweird.f32 %v6233_v37  ;;  %v1229_v25 = vmul.f32 %v1170_v53, %v5976_v58  ;;  %vm1182_vm15 = vcmp.eq.f32.partialorder %v1181_v24, 8.507059e+37  ;;  %1503 = vmatpush.bf16.msrb.mxu3 %v3811_v61  ;;  %1462 = vmatpush.bf16.msrb.mxu0 %v3783_v0  ;;  %v3776_v48 = vld [vmem:[%s7932_s1 + $0x38] sm:$0xf0]  ;;  %v3750_v24 = vld [vmem:[%s7932_s1] sm:$0xf] }
 0x23d   :  { %v1137_v51 = vmul.f32 %v6197_v22, %v1136_v63  ;;  %v6275_v14 = vadd.f32 1.0, %v4913_v38  ;;  %v4915_v43 = vpop.eup %4914  ;;  %vm6322_vm14 = vmor %vm1177_vm13, %vm1178_vm12  ;;  %v3791_v26 = vor.u32 %v4587_v6, %v3790_v2  ;;  %v3795_v27 = vor.u32 %v4585_v50, %v3792_v9  ;;  %1476 = vmatpush.bf16.msrb.mxu1 %v3787_v18  ;;  %v3752_v39 = vld [vmem:[%s7932_s1 + $0x10] sm:$0xf0]  ;;  %v3740_v18 = vld [vmem:[%s7933_s0 + $0xe0] sm:$0xff] }
 0x23e   :  { %v1174_v54 = vsub.f32 1.0, %v1173_v60  ;;  %v4917_v11 = vpop.eup %4916  ;;  %v1231_v13 = vmul.f32 %v4915_v43, %v1132_v56  ;;  %v3767_v62 = vor.u32 %v4582_v15, %v3766_v12  ;;  %v3771_v35 = vor.u32 %v4580_v16, %v3768_v7  ;;  %v3760_v56 = vld [vmem:[%s7932_s1 + $0x18] sm:$0xf0]  ;;  %v3741_v7 = vld [vmem:[%s7933_s0 + $0xe8] sm:$0xff] }
 0x23f   :  { %v1138_v4 = vadd.f32 %v6197_v22, %v1137_v51  ;;  %4918 = vrcp.f32 %v6275_v14  ;;  %1489 = vmatpush.bf16.msrb.mxu2 %v3807_v59  ;;  %v1200_v41 = vmul.f32 %v6164_v46, %v1199_v34  ;;  %v3779_v60 = vor.u32 %v4581_v28, %v3776_v48  ;;  %v4640_v48 = vld [vmem:[%s7932_s1 + $0xf4] sm:$0xf0] }
 0x240   :  { %v1175_v3 = vmul.f32 %v6233_v37, %v1174_v54  ;;  %v6345_v31 = vadd.f32 %v1231_v13, %v1229_v25  ;;  %1504 = vmatpush.bf16.msrb.mxu3 %v3795_v27  ;;  %1463 = vmatpush.bf16.msrb.mxu0 %v3767_v62  ;;  %v3755_v38 = vor.u32 %v4576_v21, %v3752_v39  ;;  %vm1203_vm0 = vweird.f32 %v6164_v46  ;;  %v4018_v62 = vld [vmem:[%s7932_s1 + $0xe8] sm:$0xf]  ;;  %v4020_v21 = vld [vmem:[%s7932_s1 + $0xf8] sm:$0xf0] }
 0x241   :  { %v1142_v58 = vsel %vm6271_vm11, %v6197_v22, %v1138_v4  ;;  %1477 = vmatpush.bf16.msrb.mxu1 %v3771_v35  ;;  %v1201_v36 = vadd.f32 %v6164_v46, %v1200_v41  ;;  %vm1202_vm1 = vweird.f32 %v6106_v32  ;;  %v1208_v53 = vand.u32 2147483648, %v6106_v32 }
 0x242   :  { %v1176_v17 = vadd.f32 %v6233_v37, %v1175_v3  ;;  %v1147_v22 = vsel %vm6220_vm8, %v1146_v45, %v1142_v58  ;;  %v3751_v45 = vor.u32 %v4578_v30, %v3750_v24  ;;  %4920 = vtanh.f32 %v6345_v31  ;;  %vm1204_vm3 = vmor %vm1202_vm1, %vm1203_vm0 }
 0x243   :  { %v1232_v5 = vmul.f32 %v4917_v11, %v1147_v22  ;;  %1490 = vmatpush.bf16.msrb.mxu2 %v3791_v26  ;;  %v1223_v34 = vand.u32 2147483648, %v6275_v14  ;;  %v1206_v51 = vand.u32 2147483647, %v6106_v32  ;;  %v1221_v55 = vand.u32 2147483647, %v6275_v14  ;;  %v3737_v11 = vld [vmem:[%s7933_s0 + $0xc8] sm:$0xff] }
 0x244   :  { %v1180_v29 = vsel %vm6322_vm14, %v6233_v37, %v1176_v17  ;;  %v3775_v37 = vor.u32 %v4583_v19, %v3774_v8  ;;  %1505 = vmatpush.bf16.msrb.mxu3 %v3779_v60  ;;  %1464 = vmatpush.bf16.msrb.mxu0 %v3751_v45  ;;  %v1205_v59 = vsel %vm1204_vm3, %v6164_v46, %v1201_v36  ;;  %vm1217_vm4 = vweird.f32 %v6275_v14  ;;  %v3739_v17 = vld [vmem:[%s7933_s0 + $0xd8] sm:$0xff]  ;;  %v4010_v19 = vld [vmem:[%s7932_s1 + $0xe0] sm:$0xf]  ;;  %v4637_v22 = vld [vmem:[%s7932_s1 + $0xe4] sm:$0xf] }
 0x245   :  { %v1185_v33 = vsel %vm1182_vm15, %v6205_v20, %v1180_v29  ;;  %v4579_v20 = vld [vmem:[%s7932_s1 + $0x14] sm:$0xf0]  ;;  %v4919_v63 = vpop.eup %4918  ;;  %1478 = vmatpush.bf16.msrb.mxu1 %v3755_v38  ;;  %v1209_v1 = vor.u32 1.1754944e-38, %v1208_v53  ;;  %v1224_v2 = vor.u32 1.1754944e-38, %v1223_v34  ;;  %vm1207_vm6 = vcmp.eq.f32.partialorder %v1206_v51, 8.507059e+37 }
 0x246   :  { %v1230_v42 = vmul.f32 %v1185_v33, %v5993_v10  ;;  %v1213_v40 = vmul.f32 %v4919_v63, %v6275_v14  ;;  %v4577_v10 = vld [vmem:[%s7932_s1 + $0xc] sm:$0xf]  ;;  %v3759_v49 = vor.u32 %v4579_v20, %v3758_v44  ;;  %vm1218_vm2 = vweird.f32 %v4919_v63  ;;  %v3736_v14 = vld [vmem:[%s7933_s0 + $0xc0] sm:$0xff]  ;;  %v3996_v36 = vld [vmem:[%s7932_s1 + $0xd0] sm:$0xf0] }
 0x247   :  { %1491 = vmatpush.bf16.msrb.mxu2 %v3775_v37  ;;  %v3763_v54 = vor.u32 %v4577_v10, %v3760_v56  ;;  %vm1219_vm5 = vmor %vm1217_vm4, %vm1218_vm2  ;;  %vm1222_vm7 = vcmp.eq.f32.partialorder %v1221_v55, 8.507059e+37  ;;  %v1210_v3 = vsel %vm1207_vm6, %v1209_v1, %v1205_v59  ;;  %v4011_v29 = vor.u32 %v4639_v23, %v4010_v19  ;;  %v4638_v37 = vld [vmem:[%s7932_s1 + $0xec] sm:$0xf]  ;;  %v3994_v20 = vld [vmem:[%s7932_s1 + $0xc0] sm:$0xf] }
 0x248   :  { %v6362_v47 = vadd.f32 %v1232_v5, %v1230_v42  ;;  %v1214_v52 = vsub.f32 1.0, %v1213_v40  ;;  %v4921_v0 = vpop.eup %4920  ;;  %v4012_v5 = vld [vmem:[%s7932_s1 + $0xf0] sm:$0xf0]  ;;  %v4019_v35 = vor.u32 %v4640_v48, %v4018_v62  ;;  %v4023_v41 = vor.u32 %v4638_v37, %v4020_v21  ;;  %v4635_v40 = vld [vmem:[%s7932_s1 + $0xcc] sm:$0xf0] }
 0x249   :  { %1506 = vmatpush.bf16.msrb.mxu3 %v3763_v54  ;;  %v1237_v6 = vmul.f32 %v4921_v0, %v1210_v3  ;;  %v4015_v33 = vor.u32 %v4637_v22, %v4012_v5  ;;  %1867 = vmatpush.bf16.msra.mxu0 %v4011_v29  ;;  %v3995_v56 = vor.u32 %v4635_v40, %v3994_v20  ;;  %v4636_v53 = vld [vmem:[%s7932_s1 + $0xd4] sm:$0xf0]  ;;  %v4634_v34 = vld [vmem:[%s7932_s1 + $0xcc] sm:$0xf]  ;;  %v3978_v55 = vld [vmem:[%s7932_s1 + $0xa0] sm:$0xf] }
 0x24a   :  { %4922 = vtanh.f32 %v6362_v47  ;;  %v1215_v57 = vmul.f32 %v4919_v63, %v1214_v52  ;;  %v4002_v52 = vld [vmem:[%s7932_s1 + $0xc8] sm:$0xf]  ;;  %v3743_v54 = vld [vmem:[%s7933_s0 + $0xf8] sm:$0xff]  ;;  %v4629_v0 = vld [vmem:[%s7932_s1 + $0xa4] sm:$0xf] }
 0x24b   :  { %1492 = vmatpush.bf16.msrb.mxu2 %v3759_v49  ;;  %1881 = vmatpush.bf16.msra.mxu1 %v4015_v33  ;;  %v4633_v49 = vld [vmem:[%s7932_s1 + $0xc4] sm:$0xf]  ;;  %v3980_v3 = vld [vmem:[%s7932_s1 + $0xb0] sm:$0xf0]  ;;  %v3962_v37 = vld [vmem:[%s7932_s1 + $0x80] sm:$0xf] }
 0x24c   :  { %v1216_v61 = vadd.f32 %v4919_v63, %v1215_v57  ;;  %v4004_v57 = vld [vmem:[%s7932_s1 + $0xd8] sm:$0xf0]  ;;  %v3999_v59 = vor.u32 %v4633_v49, %v3996_v36  ;;  %v4627_v21 = vld [vmem:[%s7932_s1 + $0x8c] sm:$0xf0]  ;;  %v3964_v20 = vld [vmem:[%s7932_s1 + $0x90] sm:$0xf0] }
 0x24d   :  { %1909 = vmatpush.bf16.msra.mxu3 %v4023_v41  ;;  %1868 = vmatpush.bf16.msra.mxu0 %v3995_v56  ;;  %v3970_v56 = vld [vmem:[%s7932_s1 + $0x88] sm:$0xf]  ;;  %v4628_v49 = vld [vmem:[%s7932_s1 + $0x94] sm:$0xf0]  ;;  %v4615_v36 = vld [vmem:[%s7932_s1 + $0x2c] sm:$0xf0] }
 0x24e   :  { %v1220_v32 = vsel %vm1219_vm5, %v4919_v63, %v1216_v61  ;;  %v4631_v61 = vld [vmem:[%s7932_s1 + $0xac] sm:$0xf0] }
 0x24f   :  { %v1225_v4 = vsel %vm1222_vm7, %v1224_v2, %v1220_v32  ;;  %1895 = vmatpush.bf16.msra.mxu2 %v4019_v35  ;;  %v4003_v2 = vor.u32 %v4636_v53, %v4002_v52  ;;  %v3979_v32 = vor.u32 %v4631_v61, %v3978_v55  ;;  %1882 = vmatpush.bf16.msra.mxu1 %v3999_v59 }
 0x250   :  { %v4923_v43 = vpop.eup %4922  ;;  %v3963_v61 = vor.u32 %v4627_v21, %v3962_v37  ;;  %v3932_v21 = vld [vmem:[%s7932_s1 + $0x50] sm:$0xf0] }
 0x251   :  { %v1238_v50 = vmul.f32 %v4923_v43, %v1225_v4  ;;  %v4007_v43 = vor.u32 %v4634_v34, %v4004_v57  ;;  %v3986_v4 = vld [vmem:[%s7932_s1 + $0xa8] sm:$0xf]  ;;  %1869 = vmatpush.bf16.msra.mxu0 %v3979_v32  ;;  %v4672_v57 = vld [vmem:[%s7932_s1 + $0xec] sm:$0xf0] }
 0x253   :  { %v4763_v9 = vpack.c.bf16 %v1238_v50, %v1237_v6  ;;  %v4632_v6 = vld [vmem:[%s7932_s1 + $0xb4] sm:$0xf0]  ;;  %1896 = vmatpush.bf16.msra.mxu2 %v4003_v2  ;;  %1910 = vmatpush.bf16.msra.mxu3 %v4007_v43 }
 0x255   :  { %4764 = vst [vmem:[#allocation2] sm:$0xff] %v4763_v9   ;;  %1870 = vmatpush.bf16.msra.mxu0 %v3963_v61 }
 0x256   :  { %4821 = vst [vmem:[%s7934_s2 + $0x10] sm:$0xff] %v4763_v9  }
 0x25c   :  { %v4575_v46 = vld [vmem:[#allocation2] sm:$0xff] }
 0x25d   :  { %1465 = vmatmul.bf16.vlgmr.msrb.gmra.mxu0 %v4575_v46  ;;  %1479 = vmatmul.bf16.vlgmr.msrb.gmra.mxu1 %v4575_v46 }
 0x25e   :  { %1493 = vmatmul.bf16.vlgmr.msrb.gmra.mxu2 %v4575_v46  ;;  %1507 = vmatmul.bf16.vlgmr.msrb.gmra.mxu3 %v4575_v46 }
 0x2da   :  { %v1466_v25 = vpop.f32.mrf.mxu0  ;;  %v1480_v13 = vpop.f32.mrf.mxu1 }
 0x2db   :  { %v1513_v12 = vadd.f32 %v3736_v14, %v1466_v25  ;;  %v1514_v15 = vadd.f32 %v3737_v11, %v1480_v13  ;;  %v3983_v14 = vor.u32 %v4629_v0, %v3980_v3  ;;  %v4611_v3 = vld [vmem:[%s7932_s1 + $0xc] sm:$0xf0] }
 0x2dd   :  { %v3876_v16 = vmul.f32 -1.442695, %v1513_v12  ;;  %v3878_v58 = vmul.f32 -1.442695, %v1514_v15  ;;  %v3987_v15 = vor.u32 %v4632_v6, %v3986_v4  ;;  %1883 = vmatpush.bf16.msra.mxu1 %v3983_v14  ;;  %v4621_v4 = vld [vmem:[%s7932_s1 + $0x64] sm:$0xf] }
 0x2de   :  { %v3948_v6 = vld [vmem:[%s7932_s1 + $0x70] sm:$0xf0] }
 0x2df   :  { %4924 = vpow2.f32 %v3876_v16  ;;  %1897 = vmatpush.bf16.msra.mxu2 %v3987_v15  ;;  %v3956_v15 = vld [vmem:[%s7932_s1 + $0x78] sm:$0xf0] }
 0x2e0   :  { %4926 = vpow2.f32 %v3878_v58 }
 0x2e1   :  { %v1508_v8 = vpop.f32.mrf.mxu3  ;;  %v1494_v10 = vpop.f32.mrf.mxu2 }
 0x2e2   :  { %v1516_v26 = vadd.f32 %v3739_v17, %v1508_v8  ;;  %v1468_v27 = vpop.f32.mrf.mxu0  ;;  %v1482_v28 = vpop.f32.mrf.mxu1  ;;  %v3738_v17 = vld [vmem:[%s7933_s0 + $0xd0] sm:$0xff] }
 0x2e3   :  { %v1517_v24 = vadd.f32 %v3740_v18, %v1468_v27  ;;  %v1518_v30 = vadd.f32 %v3741_v7, %v1482_v28  ;;  %v1515_v5 = vadd.f32 %v3738_v17, %v1494_v10 }
 0x2e4   :  { %v3880_v39 = vmul.f32 -1.442695, %v1516_v26  ;;  %v3742_v26 = vld [vmem:[%s7933_s0 + $0xf0] sm:$0xff] }
 0x2e5   :  { %v4925_v42 = vpop.eup %4924  ;;  %v3877_v44 = vmul.f32 -1.442695, %v1517_v24  ;;  %v3879_v45 = vmul.f32 -1.442695, %v1518_v30  ;;  %v4630_v24 = vld [vmem:[%s7932_s1 + $0xac] sm:$0xf] }
 0x2e6   :  { %v4927_v63 = vpop.eup %4926  ;;  %v6427_v60 = vadd.f32 1.0, %v4925_v42  ;;  %4928 = vpow2.f32 %v3880_v39  ;;  %v3988_v30 = vld [vmem:[%s7932_s1 + $0xb8] sm:$0xf0] }
 0x2e7   :  { %v6432_v38 = vadd.f32 1.0, %v4927_v63  ;;  %4930 = vpow2.f32 %v3877_v44  ;;  %v4625_v44 = vld [vmem:[%s7932_s1 + $0x84] sm:$0xf]  ;;  %v3991_v10 = vor.u32 %v4630_v24, %v3988_v30 }
 0x2e8   :  { %4932 = vrcp.f32 %v6427_v60  ;;  %v1538_v25 = vand.u32 2147483647, %v6427_v60  ;;  %v1540_v13 = vand.u32 2147483648, %v6427_v60  ;;  %vm1534_vm8 = vweird.f32 %v6427_v60  ;;  %v4617_v30 = vld [vmem:[%s7932_s1 + $0x44] sm:$0xf] }
 0x2e9   :  { %4934 = vrcp.f32 %v6432_v38  ;;  %v1510_v51 = vpop.f32.mrf.mxu3  ;;  %v1578_v8 = vand.u32 2147483648, %v6432_v38  ;;  %v1576_v19 = vand.u32 2147483647, %v6432_v38  ;;  %v1496_v27 = vpop.f32.mrf.mxu2  ;;  %vm1572_vm12 = vweird.f32 %v6432_v38  ;;  %1911 = vmatpush.bf16.msra.mxu3 %v3991_v10 }
 0x2ea   :  { %4936 = vpow2.f32 %v3879_v45  ;;  %v1520_v46 = vadd.f32 %v3743_v54, %v1510_v51  ;;  %vm6502_vm9 = vcmp.eq.f32.partialorder %v1538_v25, 8.507059e+37  ;;  %v6506_v48 = vor.u32 1.1754944e-38, %v1540_v13  ;;  %v3946_v54 = vld [vmem:[%s7932_s1 + $0x60] sm:$0xf]  ;;  %v4624_v25 = vld [vmem:[%s7932_s1 + $0x74] sm:$0xf0] }
 0x2eb   :  { %v1519_v41 = vadd.f32 %v3742_v26, %v1496_v27  ;;  %v1579_v45 = vor.u32 1.1754944e-38, %v1578_v8  ;;  %vm6552_vm14 = vcmp.eq.f32.partialorder %v1576_v19, 8.507059e+37  ;;  %v3967_v0 = vor.u32 %v4625_v44, %v3964_v20  ;;  %v4622_v13 = vld [vmem:[%s7932_s1 + $0x6c] sm:$0xf]  ;;  %v4620_v44 = vld [vmem:[%s7932_s1 + $0x54] sm:$0xf0] }
 0x2ec   :  { %v4929_v1 = vpop.eup %4928  ;;  %v3881_v28 = vmul.f32 -1.442695, %v1520_v46  ;;  %v3951_v27 = vor.u32 %v4621_v4, %v3948_v6  ;;  %v4618_v20 = vld [vmem:[%s7932_s1 + $0x4c] sm:$0xf] }
 0x2ed   :  { %v4931_v50 = vpop.eup %4930  ;;  %v6475_v9 = vadd.f32 1.0, %v4929_v1  ;;  %v4623_v1 = vld [vmem:[%s7932_s1 + $0x6c] sm:$0xf0]  ;;  %1884 = vmatpush.bf16.msra.mxu1 %v3967_v0 }
 0x2ee   :  { %v6477_v11 = vpop.eup %4932  ;;  %v6481_v12 = vadd.f32 1.0, %v4931_v50  ;;  %v3954_v50 = vld [vmem:[%s7932_s1 + $0x68] sm:$0xf]  ;;  %v3947_v26 = vor.u32 %v4623_v1, %v3946_v54  ;;  %v4616_v54 = vld [vmem:[%s7932_s1 + $0x34] sm:$0xf0] }
 0x2ef   :  { %v6483_v16 = vpop.eup %4934  ;;  %v1530_v58 = vmul.f32 %v6477_v11, %v6427_v60  ;;  %4938 = vrcp.f32 %v6475_v9  ;;  %vm1535_vm10 = vweird.f32 %v6477_v11  ;;  %v3972_v60 = vld [vmem:[%s7932_s1 + $0x98] sm:$0xf0]  ;;  %v4614_v1 = vld [vmem:[%s7932_s1 + $0x2c] sm:$0xf] }
 0x2f0   :  { %v4937_v18 = vpop.eup %4936  ;;  %v1568_v7 = vmul.f32 %v6483_v16, %v6432_v38  ;;  %4940 = vrcp.f32 %v6481_v12  ;;  %vm1573_vm11 = vweird.f32 %v6483_v16  ;;  %v1553_v42 = vand.u32 2147483647, %v6481_v12  ;;  %vm6547_vm13 = vmor %vm1534_vm8, %vm1535_vm10  ;;  %v4626_v38 = vld [vmem:[%s7932_s1 + $0x8c] sm:$0xf]  ;;  %1871 = vmatpush.bf16.msra.mxu0 %v3947_v26 }
 0x2f1   :  { %v1531_v23 = vsub.f32 1.0, %v1530_v58  ;;  %v6496_v22 = vadd.f32 1.0, %v4937_v18  ;;  %v1555_v34 = vand.u32 2147483648, %v6481_v12  ;;  %vm6570_vm15 = vmor %vm1572_vm12, %vm1573_vm11  ;;  %vm1549_vm1 = vweird.f32 %v6481_v12  ;;  %v3930_v18 = vld [vmem:[%s7932_s1 + $0x40] sm:$0xf]  ;;  %1885 = vmatpush.bf16.msra.mxu1 %v3951_v27 }
 0x2f2   :  { %v1569_v29 = vsub.f32 1.0, %v1568_v7  ;;  %vm6589_vm0 = vcmp.eq.f32.partialorder %v1553_v42, 8.507059e+37  ;;  %v4619_v7 = vld [vmem:[%s7932_s1 + $0x4c] sm:$0xf0] }
 0x2f3   :  { %v1532_v33 = vmul.f32 %v6477_v11, %v1531_v23  ;;  %4942 = vrcp.f32 %v6496_v22  ;;  %v1593_v35 = vand.u32 2147483648, %v6496_v22  ;;  %v1591_v59 = vand.u32 2147483647, %v6496_v22 }
 0x2f4   :  { %v1570_v39 = vmul.f32 %v6483_v16, %v1569_v29  ;;  %4944 = vpow2.f32 %v3881_v28  ;;  %v1556_v17 = vor.u32 1.1754944e-38, %v1555_v34  ;;  %v3975_v23 = vor.u32 %v4626_v38, %v3972_v60  ;;  %v3916_v38 = vld [vmem:[%s7932_s1 + $0x30] sm:$0xf0]  ;;  %v3922_v60 = vld [vmem:[%s7932_s1 + $0x28] sm:$0xf] }
 0x2f5   :  { %v6533_v63 = vpop.eup %4938  ;;  %v1533_v40 = vadd.f32 %v6477_v11, %v1532_v33  ;;  %v6574_v55 = vor.u32 1.1754944e-38, %v1593_v35  ;;  %4946 = vtanh.f32 %v1515_v5  ;;  %v3955_v33 = vor.u32 %v4624_v25, %v3954_v50 }
 0x2f6   :  { %v1571_v52 = vadd.f32 %v6483_v16, %v1570_v39  ;;  %v6566_v51 = vpop.eup %4940  ;;  %v6585_v43 = vmul.f32 %v6533_v63, %v6475_v9  ;;  %4948 = vtanh.f32 %v1519_v41  ;;  %1912 = vmatpush.bf16.msra.mxu3 %v3975_v23  ;;  %v3959_v35 = vor.u32 %v4622_v13, %v3956_v15  ;;  %v3938_v39 = vld [vmem:[%s7932_s1 + $0x48] sm:$0xf] }
 0x2f7   :  { %v1537_v2 = vsel %vm6547_vm13, %v6477_v11, %v1533_v40  ;;  %v1545_v32 = vmul.f32 %v6566_v51, %v6481_v12  ;;  %v3971_v11 = vor.u32 %v4628_v49, %v3970_v56  ;;  %vm1550_vm2 = vweird.f32 %v6566_v51  ;;  %v3914_v49 = vld [vmem:[%s7932_s1 + $0x20] sm:$0xf]  ;;  %v3906_v15 = vld [vmem:[%s7932_s1 + $0x8] sm:$0xf] }
 0x2f8   :  { %v1575_v14 = vsel %vm6570_vm15, %v6483_v16, %v1571_v52  ;;  %v1542_v19 = vsel %vm6502_vm9, %v6506_v48, %v1537_v2  ;;  %v1609_v29 = vsub.f32 1.0, %v6585_v43  ;;  %vm6640_vm3 = vmor %vm1549_vm1, %vm1550_vm2  ;;  %v3931_v37 = vor.u32 %v4619_v7, %v3930_v18  ;;  %v4613_v52 = vld [vmem:[%s7932_s1 + $0x24] sm:$0xf] }
 0x2f9   :  { %v6602_v46 = vpop.eup %4942  ;;  %v1546_v58 = vsub.f32 1.0, %v1545_v32  ;;  %1898 = vmatpush.bf16.msra.mxu2 %v3971_v11  ;;  %v1580_v28 = vsel %vm6552_vm14, %v1579_v45, %v1575_v14  ;;  %v3940_v45 = vld [vmem:[%s7932_s1 + $0x58] sm:$0xf0]  ;;  %vm1587_vm5 = vweird.f32 %v6496_v22  ;;  %v3935_v34 = vor.u32 %v4617_v30, %v3932_v21  ;;  %v4609_v14 = vld [vmem:[%s7932_s1 + $0x4] sm:$0xf] }
 0x2fa   :  { %v1583_v16 = vmul.f32 %v6602_v46, %v6496_v22  ;;  %v4945_v8 = vpop.eup %4944  ;;  %vm1588_vm4 = vweird.f32 %v6602_v46  ;;  %v1639_v10 = vmul.f32 %v1580_v28, %v6345_v31  ;;  %vm1592_vm7 = vcmp.eq.f32.partialorder %v1591_v59, 8.507059e+37  ;;  %1913 = vmatpush.bf16.msra.mxu3 %v3959_v35  ;;  %1872 = vmatpush.bf16.msra.mxu0 %v3931_v37  ;;  %v3924_v22 = vld [vmem:[%s7932_s1 + $0x38] sm:$0xf0]  ;;  %v3898_v59 = vld [vmem:[%s7932_s1] sm:$0xf] }
 0x2fb   :  { %v1547_v24 = vmul.f32 %v6566_v51, %v1546_v58  ;;  %v6644_v48 = vadd.f32 1.0, %v4945_v8  ;;  %v4947_v12 = vpop.eup %4946  ;;  %vm6691_vm6 = vmor %vm1587_vm5, %vm1588_vm4  ;;  %v3939_v61 = vor.u32 %v4620_v44, %v3938_v39  ;;  %v3943_v0 = vor.u32 %v4618_v20, %v3940_v45  ;;  %1886 = vmatpush.bf16.msra.mxu1 %v3935_v34  ;;  %v3900_v11 = vld [vmem:[%s7932_s1 + $0x10] sm:$0xf0]  ;;  %v3888_v34 = vld [vmem:[%s7933_s0 + $0x120] sm:$0xff] }
 0x2fc   :  { %v1584_v5 = vsub.f32 1.0, %v1583_v16  ;;  %v4949_v40 = vpop.eup %4948  ;;  %v1641_v56 = vmul.f32 %v4947_v12, %v1542_v19  ;;  %v3915_v32 = vor.u32 %v4615_v36, %v3914_v49  ;;  %v3919_v50 = vor.u32 %v4613_v52, %v3916_v38  ;;  %v3908_v19 = vld [vmem:[%s7932_s1 + $0x18] sm:$0xf0]  ;;  %v3889_v38 = vld [vmem:[%s7933_s0 + $0x128] sm:$0xff] }
 0x2fd   :  { %v1548_v42 = vadd.f32 %v6566_v51, %v1547_v24  ;;  %4950 = vrcp.f32 %v6644_v48  ;;  %1899 = vmatpush.bf16.msra.mxu2 %v3955_v33  ;;  %v1610_v25 = vmul.f32 %v6533_v63, %v1609_v29  ;;  %v3927_v16 = vor.u32 %v4614_v1, %v3924_v22  ;;  %v4673_v22 = vld [vmem:[%s7932_s1 + $0xf4] sm:$0xf0] }
 0x2fe   :  { %v1585_v41 = vmul.f32 %v6602_v46, %v1584_v5  ;;  %v6714_v4 = vadd.f32 %v1641_v56, %v1639_v10  ;;  %1914 = vmatpush.bf16.msra.mxu3 %v3943_v0  ;;  %1873 = vmatpush.bf16.msra.mxu0 %v3915_v32  ;;  %v3903_v8 = vor.u32 %v4609_v14, %v3900_v11  ;;  %vm1613_vm8 = vweird.f32 %v6533_v63  ;;  %v4166_v32 = vld [vmem:[%s7932_s1 + $0xe8] sm:$0xf]  ;;  %v4168_v14 = vld [vmem:[%s7932_s1 + $0xf8] sm:$0xf0] }
 0x2ff   :  { %v1552_v31 = vsel %vm6640_vm3, %v6566_v51, %v1548_v42  ;;  %1887 = vmatpush.bf16.msra.mxu1 %v3919_v50  ;;  %v1611_v26 = vadd.f32 %v6533_v63, %v1610_v25  ;;  %vm1612_vm9 = vweird.f32 %v6475_v9  ;;  %v1618_v28 = vand.u32 2147483648, %v6475_v9 }
 0x300   :  { %v1586_v53 = vadd.f32 %v6602_v46, %v1585_v41  ;;  %v1557_v51 = vsel %vm6589_vm0, %v1556_v17, %v1552_v31  ;;  %v3899_v17 = vor.u32 %v4611_v3, %v3898_v59  ;;  %4952 = vtanh.f32 %v6714_v4  ;;  %vm1614_vm11 = vmor %vm1612_vm9, %vm1613_vm8 }
 0x301   :  { %v1642_v43 = vmul.f32 %v4949_v40, %v1557_v51  ;;  %1900 = vmatpush.bf16.msra.mxu2 %v3939_v61  ;;  %v1633_v29 = vand.u32 2147483648, %v6644_v48  ;;  %v1616_v24 = vand.u32 2147483647, %v6475_v9  ;;  %v1631_v62 = vand.u32 2147483647, %v6644_v48  ;;  %v3885_v40 = vld [vmem:[%s7933_s0 + $0x108] sm:$0xff] }
 0x302   :  { %v1590_v2 = vsel %vm6691_vm6, %v6602_v46, %v1586_v53  ;;  %v3923_v46 = vor.u32 %v4616_v54, %v3922_v60  ;;  %1915 = vmatpush.bf16.msra.mxu3 %v3927_v16  ;;  %1874 = vmatpush.bf16.msra.mxu0 %v3899_v17  ;;  %v1615_v33 = vsel %vm1614_vm11, %v6533_v63, %v1611_v26  ;;  %vm1627_vm12 = vweird.f32 %v6644_v48  ;;  %v3887_v53 = vld [vmem:[%s7933_s0 + $0x118] sm:$0xff]  ;;  %v4158_v54 = vld [vmem:[%s7932_s1 + $0xe0] sm:$0xf]  ;;  %v4670_v51 = vld [vmem:[%s7932_s1 + $0xe4] sm:$0xf] }
 0x303   :  { %v1595_v6 = vsel %vm1592_vm7, %v6574_v55, %v1590_v2  ;;  %v4612_v55 = vld [vmem:[%s7932_s1 + $0x14] sm:$0xf0]  ;;  %v4951_v58 = vpop.eup %4950  ;;  %1888 = vmatpush.bf16.msra.mxu1 %v3903_v8  ;;  %v1619_v21 = vor.u32 1.1754944e-38, %v1618_v28  ;;  %v1634_v39 = vor.u32 1.1754944e-38, %v1633_v29  ;;  %vm1617_vm14 = vcmp.eq.f32.partialorder %v1616_v24, 8.507059e+37 }
 0x304   :  { %v1640_v13 = vmul.f32 %v1595_v6, %v6362_v47  ;;  %v1623_v7 = vmul.f32 %v4951_v58, %v6644_v48  ;;  %v4610_v47 = vld [vmem:[%s7932_s1 + $0xc] sm:$0xf]  ;;  %v3907_v23 = vor.u32 %v4612_v55, %v3906_v15  ;;  %vm1628_vm10 = vweird.f32 %v4951_v58  ;;  %v3884_v48 = vld [vmem:[%s7933_s0 + $0x100] sm:$0xff]  ;;  %v4144_v26 = vld [vmem:[%s7932_s1 + $0xd0] sm:$0xf0] }
 0x305   :  { %1901 = vmatpush.bf16.msra.mxu2 %v3923_v46  ;;  %v3911_v5 = vor.u32 %v4610_v47, %v3908_v19  ;;  %vm1629_vm13 = vmor %vm1627_vm12, %vm1628_vm10  ;;  %vm1632_vm15 = vcmp.eq.f32.partialorder %v1631_v62, 8.507059e+37  ;;  %v1620_v41 = vsel %vm1617_vm14, %v1619_v21, %v1615_v33  ;;  %v4159_v2 = vor.u32 %v4672_v57, %v4158_v54  ;;  %v4671_v46 = vld [vmem:[%s7932_s1 + $0xec] sm:$0xf]  ;;  %v4142_v55 = vld [vmem:[%s7932_s1 + $0xc0] sm:$0xf] }
 0x306   :  { %v6731_v18 = vadd.f32 %v1642_v43, %v1640_v13  ;;  %v1624_v27 = vsub.f32 1.0, %v1623_v7  ;;  %v4953_v37 = vpop.eup %4952  ;;  %v4160_v43 = vld [vmem:[%s7932_s1 + $0xf0] sm:$0xf0]  ;;  %v4167_v50 = vor.u32 %v4673_v22, %v4166_v32  ;;  %v4171_v25 = vor.u32 %v4671_v46, %v4168_v14  ;;  %v4668_v7 = vld [vmem:[%s7932_s1 + $0xcc] sm:$0xf0] }
 0x307   :  { %1916 = vmatpush.bf16.msra.mxu3 %v3911_v5  ;;  %v1647_v44 = vmul.f32 %v4953_v37, %v1620_v41  ;;  %v4163_v6 = vor.u32 %v4670_v51, %v4160_v43  ;;  %2277 = vmatpush.bf16.msrb.mxu0 %v4159_v2  ;;  %v4143_v19 = vor.u32 %v4668_v7, %v4142_v55  ;;  %v4669_v28 = vld [vmem:[%s7932_s1 + $0xd4] sm:$0xf0]  ;;  %v4667_v29 = vld [vmem:[%s7932_s1 + $0xcc] sm:$0xf]  ;;  %v4126_v62 = vld [vmem:[%s7932_s1 + $0xa0] sm:$0xf] }
 0x308   :  { %4954 = vtanh.f32 %v6731_v18  ;;  %v1625_v30 = vmul.f32 %v4951_v58, %v1624_v27  ;;  %v4150_v27 = vld [vmem:[%s7932_s1 + $0xc8] sm:$0xf]  ;;  %v3891_v5 = vld [vmem:[%s7933_s0 + $0x138] sm:$0xff]  ;;  %v4662_v37 = vld [vmem:[%s7932_s1 + $0xa4] sm:$0xf] }
 0x309   :  { %1902 = vmatpush.bf16.msra.mxu2 %v3907_v23  ;;  %2291 = vmatpush.bf16.msrb.mxu1 %v4163_v6  ;;  %v4666_v23 = vld [vmem:[%s7932_s1 + $0xc4] sm:$0xf]  ;;  %v4128_v41 = vld [vmem:[%s7932_s1 + $0xb0] sm:$0xf0]  ;;  %v4110_v46 = vld [vmem:[%s7932_s1 + $0x80] sm:$0xf] }
 0x30a   :  { %v1626_v35 = vadd.f32 %v4951_v58, %v1625_v30  ;;  %v4152_v30 = vld [vmem:[%s7932_s1 + $0xd8] sm:$0xf0]  ;;  %v4147_v33 = vor.u32 %v4666_v23, %v4144_v26  ;;  %v4660_v14 = vld [vmem:[%s7932_s1 + $0x8c] sm:$0xf0]  ;;  %v4112_v55 = vld [vmem:[%s7932_s1 + $0x90] sm:$0xf0] }
 0x30b   :  { %2319 = vmatpush.bf16.msrb.mxu3 %v4171_v25  ;;  %2278 = vmatpush.bf16.msrb.mxu0 %v4143_v19  ;;  %v4118_v19 = vld [vmem:[%s7932_s1 + $0x88] sm:$0xf]  ;;  %v4661_v23 = vld [vmem:[%s7932_s1 + $0x94] sm:$0xf0]  ;;  %v4648_v26 = vld [vmem:[%s7932_s1 + $0x2c] sm:$0xf0] }
 0x30c   :  { %v1630_v9 = vsel %vm1629_vm13, %v4951_v58, %v1626_v35  ;;  %v4664_v35 = vld [vmem:[%s7932_s1 + $0xac] sm:$0xf0] }
 0x30d   :  { %v1635_v42 = vsel %vm1632_vm15, %v1634_v39, %v1630_v9  ;;  %2305 = vmatpush.bf16.msrb.mxu2 %v4167_v50  ;;  %v4151_v39 = vor.u32 %v4669_v28, %v4150_v27  ;;  %v4127_v9 = vor.u32 %v4664_v35, %v4126_v62  ;;  %2292 = vmatpush.bf16.msrb.mxu1 %v4147_v33 }
 0x30e   :  { %v4955_v12 = vpop.eup %4954  ;;  %v4111_v35 = vor.u32 %v4660_v14, %v4110_v46  ;;  %v4080_v14 = vld [vmem:[%s7932_s1 + $0x50] sm:$0xf0] }
 0x30f   :  { %v1648_v20 = vmul.f32 %v4955_v12, %v1635_v42  ;;  %v4155_v12 = vor.u32 %v4667_v29, %v4152_v30  ;;  %v4134_v42 = vld [vmem:[%s7932_s1 + $0xa8] sm:$0xf]  ;;  %2279 = vmatpush.bf16.msrb.mxu0 %v4127_v9  ;;  %v4705_v30 = vld [vmem:[%s7932_s1 + $0xec] sm:$0xf0] }
 0x311   :  { %v4773_v45 = vpack.c.bf16 %v1648_v20, %v1647_v44  ;;  %v4665_v44 = vld [vmem:[%s7932_s1 + $0xb4] sm:$0xf0]  ;;  %2306 = vmatpush.bf16.msrb.mxu2 %v4151_v39  ;;  %2320 = vmatpush.bf16.msrb.mxu3 %v4155_v12 }
 0x313   :  { %4822 = vst [vmem:[%s7934_s2 + $0x18] sm:$0xff] %v4773_v45   ;;  %2280 = vmatpush.bf16.msrb.mxu0 %v4111_v35 }
 0x314   :  { %4774 = vst [vmem:[#allocation2] sm:$0xff] %v4773_v45  }
 0x31b   :  { %v4608_v63 = vld [vmem:[#allocation2] sm:$0xff] }
 0x31c   :  { %1875 = vmatmul.bf16.vlgmr.msra.gmra.mxu0 %v4608_v63  ;;  %1889 = vmatmul.bf16.vlgmr.msra.gmra.mxu1 %v4608_v63 }
 0x31d   :  { %1903 = vmatmul.bf16.vlgmr.msra.gmra.mxu2 %v4608_v63  ;;  %1917 = vmatmul.bf16.vlgmr.msra.gmra.mxu3 %v4608_v63 }
 0x399   :  { %v1876_v10 = vpop.f32.mrf.mxu0  ;;  %v1890_v56 = vpop.f32.mrf.mxu1 }
 0x39a   :  { %v1923_v49 = vadd.f32 %v3884_v48, %v1876_v10  ;;  %v1924_v36 = vadd.f32 %v3885_v40, %v1890_v56  ;;  %v4131_v48 = vor.u32 %v4662_v37, %v4128_v41  ;;  %v4644_v41 = vld [vmem:[%s7932_s1 + $0xc] sm:$0xf0] }
 0x39c   :  { %v4024_v52 = vmul.f32 -1.442695, %v1923_v49  ;;  %v4026_v31 = vmul.f32 -1.442695, %v1924_v36  ;;  %v4135_v36 = vor.u32 %v4665_v44, %v4134_v42  ;;  %2293 = vmatpush.bf16.msrb.mxu1 %v4131_v48  ;;  %v4654_v42 = vld [vmem:[%s7932_s1 + $0x64] sm:$0xf] }
 0x39d   :  { %v4096_v44 = vld [vmem:[%s7932_s1 + $0x70] sm:$0xf0] }
 0x39e   :  { %4956 = vpow2.f32 %v4024_v52  ;;  %2307 = vmatpush.bf16.msrb.mxu2 %v4135_v36  ;;  %v4104_v36 = vld [vmem:[%s7932_s1 + $0x78] sm:$0xf0] }
 0x39f   :  { %4958 = vpow2.f32 %v4026_v31 }
 0x3a0   :  { %v1918_v60 = vpop.f32.mrf.mxu3  ;;  %v1904_v47 = vpop.f32.mrf.mxu2 }
 0x3a1   :  { %v1926_v61 = vadd.f32 %v3887_v53, %v1918_v60  ;;  %v1878_v0 = vpop.f32.mrf.mxu0  ;;  %v1892_v1 = vpop.f32.mrf.mxu1  ;;  %v3886_v53 = vld [vmem:[%s7933_s0 + $0x110] sm:$0xff] }
 0x3a2   :  { %v1927_v59 = vadd.f32 %v3888_v34, %v1878_v0  ;;  %v1928_v3 = vadd.f32 %v3889_v38, %v1892_v1  ;;  %v1925_v43 = vadd.f32 %v3886_v53, %v1904_v47 }
 0x3a3   :  { %v4028_v11 = vmul.f32 -1.442695, %v1926_v61  ;;  %v3890_v61 = vld [vmem:[%s7933_s0 + $0x130] sm:$0xff] }
 0x3a4   :  { %v4957_v13 = vpop.eup %4956  ;;  %v4025_v15 = vmul.f32 -1.442695, %v1927_v59  ;;  %v4027_v17 = vmul.f32 -1.442695, %v1928_v3  ;;  %v4663_v59 = vld [vmem:[%s7932_s1 + $0xac] sm:$0xf] }
 0x3a5   :  { %v4959_v58 = vpop.eup %4958  ;;  %v6796_v16 = vadd.f32 1.0, %v4957_v13  ;;  %4960 = vpow2.f32 %v4028_v11  ;;  %v4136_v3 = vld [vmem:[%s7932_s1 + $0xb8] sm:$0xf0] }
 0x3a6   :  { %v6801_v8 = vadd.f32 1.0, %v4959_v58  ;;  %4962 = vpow2.f32 %v4025_v15  ;;  %v4658_v15 = vld [vmem:[%s7932_s1 + $0x84] sm:$0xf]  ;;  %v4139_v47 = vor.u32 %v4663_v59, %v4136_v3 }
 0x3a7   :  { %4964 = vrcp.f32 %v6796_v16  ;;  %v1948_v10 = vand.u32 2147483647, %v6796_v16  ;;  %v1950_v56 = vand.u32 2147483648, %v6796_v16  ;;  %vm1944_vm0 = vweird.f32 %v6796_v16  ;;  %v4650_v3 = vld [vmem:[%s7932_s1 + $0x44] sm:$0xf] }
 0x3a8   :  { %4966 = vrcp.f32 %v6801_v8  ;;  %v1920_v24 = vpop.f32.mrf.mxu3  ;;  %v1988_v60 = vand.u32 2147483648, %v6801_v8  ;;  %v1986_v54 = vand.u32 2147483647, %v6801_v8  ;;  %v1906_v0 = vpop.f32.mrf.mxu2  ;;  %vm1982_vm4 = vweird.f32 %v6801_v8  ;;  %2321 = vmatpush.bf16.msrb.mxu3 %v4139_v47 }
 0x3a9   :  { %4968 = vpow2.f32 %v4027_v17  ;;  %v1930_v63 = vadd.f32 %v3891_v5, %v1920_v24  ;;  %vm6871_vm1 = vcmp.eq.f32.partialorder %v1948_v10, 8.507059e+37  ;;  %v6875_v22 = vor.u32 1.1754944e-38, %v1950_v56  ;;  %v4094_v5 = vld [vmem:[%s7932_s1 + $0x60] sm:$0xf]  ;;  %v4657_v10 = vld [vmem:[%s7932_s1 + $0x74] sm:$0xf0] }
 0x3aa   :  { %v1929_v25 = vadd.f32 %v3890_v61, %v1906_v0  ;;  %v1989_v17 = vor.u32 1.1754944e-38, %v1988_v60  ;;  %vm6921_vm6 = vcmp.eq.f32.partialorder %v1986_v54, 8.507059e+37  ;;  %v4115_v37 = vor.u32 %v4658_v15, %v4112_v55  ;;  %v4655_v56 = vld [vmem:[%s7932_s1 + $0x6c] sm:$0xf]  ;;  %v4653_v15 = vld [vmem:[%s7932_s1 + $0x54] sm:$0xf0] }
 0x3ab   :  { %v4961_v21 = vpop.eup %4960  ;;  %v4029_v1 = vmul.f32 -1.442695, %v1930_v63  ;;  %v4099_v0 = vor.u32 %v4654_v42, %v4096_v44  ;;  %v4651_v55 = vld [vmem:[%s7932_s1 + $0x4c] sm:$0xf] }
 0x3ac   :  { %v4963_v20 = vpop.eup %4962  ;;  %v6844_v45 = vadd.f32 1.0, %v4961_v21  ;;  %v4656_v21 = vld [vmem:[%s7932_s1 + $0x6c] sm:$0xf0]  ;;  %2294 = vmatpush.bf16.msrb.mxu1 %v4115_v37 }
 0x3ad   :  { %v6846_v40 = vpop.eup %4964  ;;  %v6850_v49 = vadd.f32 1.0, %v4963_v20  ;;  %v4102_v20 = vld [vmem:[%s7932_s1 + $0x68] sm:$0xf]  ;;  %v4095_v61 = vor.u32 %v4656_v21, %v4094_v5  ;;  %v4649_v5 = vld [vmem:[%s7932_s1 + $0x34] sm:$0xf0] }
 0x3ae   :  { %v6852_v52 = vpop.eup %4966  ;;  %v1940_v31 = vmul.f32 %v6846_v40, %v6796_v16  ;;  %4970 = vrcp.f32 %v6844_v45  ;;  %vm1945_vm2 = vweird.f32 %v6846_v40  ;;  %v4120_v16 = vld [vmem:[%s7932_s1 + $0x98] sm:$0xf0]  ;;  %v4647_v21 = vld [vmem:[%s7932_s1 + $0x2c] sm:$0xf] }
 0x3af   :  { %v4969_v34 = vpop.eup %4968  ;;  %v1978_v38 = vmul.f32 %v6852_v52, %v6801_v8  ;;  %4972 = vrcp.f32 %v6850_v49  ;;  %vm1983_vm3 = vweird.f32 %v6852_v52  ;;  %v1963_v13 = vand.u32 2147483647, %v6850_v49  ;;  %vm6916_vm5 = vmor %vm1944_vm0, %vm1945_vm2  ;;  %v4659_v8 = vld [vmem:[%s7932_s1 + $0x8c] sm:$0xf]  ;;  %2281 = vmatpush.bf16.msrb.mxu0 %v4095_v61 }
 0x3b0   :  { %v1941_v57 = vsub.f32 1.0, %v1940_v31  ;;  %v6865_v51 = vadd.f32 1.0, %v4969_v34  ;;  %v1965_v29 = vand.u32 2147483648, %v6850_v49  ;;  %vm6939_vm7 = vmor %vm1982_vm4, %vm1983_vm3  ;;  %vm1959_vm9 = vweird.f32 %v6850_v49  ;;  %v4078_v34 = vld [vmem:[%s7932_s1 + $0x40] sm:$0xf]  ;;  %2295 = vmatpush.bf16.msrb.mxu1 %v4099_v0 }
 0x3b1   :  { %v1979_v2 = vsub.f32 1.0, %v1978_v38  ;;  %vm6958_vm8 = vcmp.eq.f32.partialorder %v1963_v13, 8.507059e+37  ;;  %v4652_v38 = vld [vmem:[%s7932_s1 + $0x4c] sm:$0xf0] }
 0x3b2   :  { %v1942_v6 = vmul.f32 %v6846_v40, %v1941_v57  ;;  %4974 = vrcp.f32 %v6865_v51  ;;  %v2003_v50 = vand.u32 2147483648, %v6865_v51  ;;  %v2001_v33 = vand.u32 2147483647, %v6865_v51 }
 0x3b3   :  { %v1980_v11 = vmul.f32 %v6852_v52, %v1979_v2  ;;  %4976 = vpow2.f32 %v4029_v1  ;;  %v1966_v53 = vor.u32 1.1754944e-38, %v1965_v29  ;;  %v4123_v57 = vor.u32 %v4659_v8, %v4120_v16  ;;  %v4064_v8 = vld [vmem:[%s7932_s1 + $0x30] sm:$0xf0]  ;;  %v4070_v16 = vld [vmem:[%s7932_s1 + $0x28] sm:$0xf] }
 0x3b4   :  { %v6902_v58 = vpop.eup %4970  ;;  %v1943_v7 = vadd.f32 %v6846_v40, %v1942_v6  ;;  %v6943_v62 = vor.u32 1.1754944e-38, %v2003_v50  ;;  %4978 = vtanh.f32 %v1925_v43  ;;  %v4103_v6 = vor.u32 %v4657_v10, %v4102_v20 }
 0x3b5   :  { %v1981_v27 = vadd.f32 %v6852_v52, %v1980_v11  ;;  %v6935_v24 = vpop.eup %4972  ;;  %v6954_v12 = vmul.f32 %v6902_v58, %v6844_v45  ;;  %4980 = vtanh.f32 %v1929_v25  ;;  %2322 = vmatpush.bf16.msrb.mxu3 %v4123_v57  ;;  %v4107_v50 = vor.u32 %v4655_v56, %v4104_v36  ;;  %v4086_v11 = vld [vmem:[%s7932_s1 + $0x48] sm:$0xf] }
 0x3b6   :  { %v1947_v39 = vsel %vm6916_vm5, %v6846_v40, %v1943_v7  ;;  %v1955_v9 = vmul.f32 %v6935_v24, %v6850_v49  ;;  %v4119_v40 = vor.u32 %v4661_v23, %v4118_v19  ;;  %vm1960_vm10 = vweird.f32 %v6935_v24  ;;  %v4062_v23 = vld [vmem:[%s7932_s1 + $0x20] sm:$0xf]  ;;  %v4054_v36 = vld [vmem:[%s7932_s1 + $0x8] sm:$0xf] }
 0x3b7   :  { %v1985_v48 = vsel %vm6939_vm7, %v6852_v52, %v1981_v27  ;;  %v1952_v54 = vsel %vm6871_vm1, %v6875_v22, %v1947_v39  ;;  %v2019_v2 = vsub.f32 1.0, %v6954_v12  ;;  %vm7009_vm11 = vmor %vm1959_vm9, %vm1960_vm10  ;;  %v4079_v46 = vor.u32 %v4652_v38, %v4078_v34  ;;  %v4646_v27 = vld [vmem:[%s7932_s1 + $0x24] sm:$0xf] }
 0x3b8   :  { %v6971_v63 = vpop.eup %4974  ;;  %v1956_v31 = vsub.f32 1.0, %v1955_v9  ;;  %2308 = vmatpush.bf16.msrb.mxu2 %v4119_v40  ;;  %v1990_v1 = vsel %vm6921_vm6, %v1989_v17, %v1985_v48  ;;  %v4088_v17 = vld [vmem:[%s7932_s1 + $0x58] sm:$0xf0]  ;;  %vm1997_vm13 = vweird.f32 %v6865_v51  ;;  %v4083_v29 = vor.u32 %v4650_v3, %v4080_v14  ;;  %v4642_v48 = vld [vmem:[%s7932_s1 + $0x4] sm:$0xf] }
 0x3b9   :  { %v1993_v52 = vmul.f32 %v6971_v63, %v6865_v51  ;;  %v4977_v60 = vpop.eup %4976  ;;  %vm1998_vm12 = vweird.f32 %v6971_v63  ;;  %v2049_v47 = vmul.f32 %v1990_v1, %v6714_v4  ;;  %vm2002_vm15 = vcmp.eq.f32.partialorder %v2001_v33, 8.507059e+37  ;;  %2323 = vmatpush.bf16.msrb.mxu3 %v4107_v50  ;;  %2282 = vmatpush.bf16.msrb.mxu0 %v4079_v46  ;;  %v4072_v51 = vld [vmem:[%s7932_s1 + $0x38] sm:$0xf0]  ;;  %v4046_v33 = vld [vmem:[%s7932_s1] sm:$0xf] }
 0x3ba   :  { %v1957_v59 = vmul.f32 %v6935_v24, %v1956_v31  ;;  %v7013_v22 = vadd.f32 1.0, %v4977_v60  ;;  %v4979_v49 = vpop.eup %4978  ;;  %vm7060_vm14 = vmor %vm1997_vm13, %vm1998_vm12  ;;  %v4087_v35 = vor.u32 %v4653_v15, %v4086_v11  ;;  %v4091_v37 = vor.u32 %v4651_v55, %v4088_v17  ;;  %2296 = vmatpush.bf16.msrb.mxu1 %v4083_v29  ;;  %v4048_v40 = vld [vmem:[%s7932_s1 + $0x10] sm:$0xf0]  ;;  %v4036_v29 = vld [vmem:[%s7933_s0 + $0x160] sm:$0xff] }
 0x3bb   :  { %v1994_v43 = vsub.f32 1.0, %v1993_v52  ;;  %v4981_v7 = vpop.eup %4980  ;;  %v2051_v19 = vmul.f32 %v4979_v49, %v1952_v54  ;;  %v4063_v9 = vor.u32 %v4648_v26, %v4062_v23  ;;  %v4067_v20 = vor.u32 %v4646_v27, %v4064_v8  ;;  %v4056_v54 = vld [vmem:[%s7932_s1 + $0x18] sm:$0xf0]  ;;  %v4037_v8 = vld [vmem:[%s7933_s0 + $0x168] sm:$0xff] }
 0x3bc   :  { %v1958_v13 = vadd.f32 %v6935_v24, %v1957_v59  ;;  %4982 = vrcp.f32 %v7013_v22  ;;  %2309 = vmatpush.bf16.msrb.mxu2 %v4103_v6  ;;  %v2020_v10 = vmul.f32 %v6902_v58, %v2019_v2  ;;  %v4075_v52 = vor.u32 %v4647_v21, %v4072_v51  ;;  %v4706_v51 = vld [vmem:[%s7932_s1 + $0xf4] sm:$0xf0] }
 0x3bd   :  { %v1995_v25 = vmul.f32 %v6971_v63, %v1994_v43  ;;  %v7083_v42 = vadd.f32 %v2051_v19, %v2049_v47  ;;  %2324 = vmatpush.bf16.msrb.mxu3 %v4091_v37  ;;  %2283 = vmatpush.bf16.msrb.mxu0 %v4063_v9  ;;  %v4051_v60 = vor.u32 %v4642_v48, %v4048_v40  ;;  %vm2023_vm0 = vweird.f32 %v6902_v58  ;;  %v4314_v9 = vld [vmem:[%s7932_s1 + $0xe8] sm:$0xf]  ;;  %v4316_v48 = vld [vmem:[%s7932_s1 + $0xf8] sm:$0xf0] }
 0x3be   :  { %v1962_v4 = vsel %vm7009_vm11, %v6935_v24, %v1958_v13  ;;  %2297 = vmatpush.bf16.msrb.mxu1 %v4067_v20  ;;  %v2021_v61 = vadd.f32 %v6902_v58, %v2020_v10  ;;  %vm2022_vm1 = vweird.f32 %v6844_v45  ;;  %v2028_v1 = vand.u32 2147483648, %v6844_v45 }
 0x3bf   :  { %v1996_v28 = vadd.f32 %v6971_v63, %v1995_v25  ;;  %v1967_v24 = vsel %vm6958_vm8, %v1966_v53, %v1962_v4  ;;  %v4047_v53 = vor.u32 %v4644_v41, %v4046_v33  ;;  %4984 = vtanh.f32 %v7083_v42  ;;  %vm2024_vm3 = vmor %vm2022_vm1, %vm2023_vm0 }
 0x3c0   :  { %v2052_v12 = vmul.f32 %v4981_v7, %v1967_v24  ;;  %2310 = vmatpush.bf16.msrb.mxu2 %v4087_v35  ;;  %v2043_v2 = vand.u32 2147483648, %v7013_v22  ;;  %v2026_v59 = vand.u32 2147483647, %v6844_v45  ;;  %v2041_v32 = vand.u32 2147483647, %v7013_v22  ;;  %v4033_v7 = vld [vmem:[%s7933_s0 + $0x148] sm:$0xff] }
 0x3c1   :  { %v2000_v39 = vsel %vm7060_vm14, %v6971_v63, %v1996_v28  ;;  %v4071_v63 = vor.u32 %v4649_v5, %v4070_v16  ;;  %2325 = vmatpush.bf16.msrb.mxu3 %v4075_v52  ;;  %2284 = vmatpush.bf16.msrb.mxu0 %v4047_v53  ;;  %v2025_v6 = vsel %vm2024_vm3, %v6902_v58, %v2021_v61  ;;  %vm2037_vm4 = vweird.f32 %v7013_v22  ;;  %v4035_v28 = vld [vmem:[%s7933_s0 + $0x158] sm:$0xff]  ;;  %v4306_v5 = vld [vmem:[%s7932_s1 + $0xe0] sm:$0xf]  ;;  %v4703_v24 = vld [vmem:[%s7932_s1 + $0xe4] sm:$0xf] }
 0x3c2   :  { %v2005_v44 = vsel %vm2002_vm15, %v6943_v62, %v2000_v39  ;;  %v4645_v62 = vld [vmem:[%s7932_s1 + $0x14] sm:$0xf0]  ;;  %v4983_v31 = vpop.eup %4982  ;;  %2298 = vmatpush.bf16.msrb.mxu1 %v4051_v60  ;;  %v2029_v14 = vor.u32 1.1754944e-38, %v2028_v1  ;;  %v2044_v11 = vor.u32 1.1754944e-38, %v2043_v2  ;;  %vm2027_vm6 = vcmp.eq.f32.partialorder %v2026_v59, 8.507059e+37 }
 0x3c3   :  { %v2050_v56 = vmul.f32 %v2005_v44, %v6731_v18  ;;  %v2033_v38 = vmul.f32 %v4983_v31, %v7013_v22  ;;  %v4643_v18 = vld [vmem:[%s7932_s1 + $0xc] sm:$0xf]  ;;  %v4055_v57 = vor.u32 %v4645_v62, %v4054_v36  ;;  %vm2038_vm2 = vweird.f32 %v4983_v31  ;;  %v4032_v22 = vld [vmem:[%s7933_s0 + $0x140] sm:$0xff]  ;;  %v4292_v61 = vld [vmem:[%s7932_s1 + $0xd0] sm:$0xf0] }
 0x3c4   :  { %2311 = vmatpush.bf16.msrb.mxu2 %v4071_v63  ;;  %v4059_v43 = vor.u32 %v4643_v18, %v4056_v54  ;;  %vm2039_vm5 = vmor %vm2037_vm4, %vm2038_vm2  ;;  %vm2042_vm7 = vcmp.eq.f32.partialorder %v2041_v32, 8.507059e+37  ;;  %v2030_v25 = vsel %vm2027_vm6, %v2029_v14, %v2025_v6  ;;  %v4307_v39 = vor.u32 %v4705_v30, %v4306_v5  ;;  %v4704_v63 = vld [vmem:[%s7932_s1 + $0xec] sm:$0xf]  ;;  %v4290_v62 = vld [vmem:[%s7932_s1 + $0xc0] sm:$0xf] }
 0x3c5   :  { %v7100_v34 = vadd.f32 %v2052_v12, %v2050_v56  ;;  %v2034_v0 = vsub.f32 1.0, %v2033_v38  ;;  %v4985_v46 = vpop.eup %4984  ;;  %v4308_v12 = vld [vmem:[%s7932_s1 + $0xf0] sm:$0xf0]  ;;  %v4315_v20 = vor.u32 %v4706_v51, %v4314_v9  ;;  %v4319_v10 = vor.u32 %v4704_v63, %v4316_v48  ;;  %v4701_v38 = vld [vmem:[%s7932_s1 + $0xcc] sm:$0xf0] }
 0x3c6   :  { %2326 = vmatpush.bf16.msrb.mxu3 %v4059_v43  ;;  %v2057_v15 = vmul.f32 %v4985_v46, %v2030_v25  ;;  %v4311_v44 = vor.u32 %v4703_v24, %v4308_v12  ;;  %2687 = vmatpush.bf16.msra.mxu0 %v4307_v39  ;;  %v4291_v54 = vor.u32 %v4701_v38, %v4290_v62  ;;  %v4702_v1 = vld [vmem:[%s7932_s1 + $0xd4] sm:$0xf0]  ;;  %v4700_v2 = vld [vmem:[%s7932_s1 + $0xcc] sm:$0xf]  ;;  %v4274_v32 = vld [vmem:[%s7932_s1 + $0xa0] sm:$0xf] }
 0x3c7   :  { %4986 = vtanh.f32 %v7100_v34  ;;  %v2035_v3 = vmul.f32 %v4983_v31, %v2034_v0  ;;  %v4298_v0 = vld [vmem:[%s7932_s1 + $0xc8] sm:$0xf]  ;;  %v4039_v43 = vld [vmem:[%s7933_s0 + $0x178] sm:$0xff]  ;;  %v4695_v46 = vld [vmem:[%s7932_s1 + $0xa4] sm:$0xf] }
 0x3c8   :  { %2312 = vmatpush.bf16.msrb.mxu2 %v4055_v57  ;;  %2701 = vmatpush.bf16.msra.mxu1 %v4311_v44  ;;  %v4699_v57 = vld [vmem:[%s7932_s1 + $0xc4] sm:$0xf]  ;;  %v4276_v25 = vld [vmem:[%s7932_s1 + $0xb0] sm:$0xf0]  ;;  %v4258_v63 = vld [vmem:[%s7932_s1 + $0x80] sm:$0xf] }
 0x3c9   :  { %v2036_v50 = vadd.f32 %v4983_v31, %v2035_v3  ;;  %v4300_v3 = vld [vmem:[%s7932_s1 + $0xd8] sm:$0xf0]  ;;  %v4295_v6 = vor.u32 %v4699_v57, %v4292_v61  ;;  %v4693_v48 = vld [vmem:[%s7932_s1 + $0x8c] sm:$0xf0]  ;;  %v4260_v62 = vld [vmem:[%s7932_s1 + $0x90] sm:$0xf0] }
 0x3ca   :  { %2729 = vmatpush.bf16.msra.mxu3 %v4319_v10  ;;  %2688 = vmatpush.bf16.msra.mxu0 %v4291_v54  ;;  %v4266_v54 = vld [vmem:[%s7932_s1 + $0x88] sm:$0xf]  ;;  %v4694_v57 = vld [vmem:[%s7932_s1 + $0x94] sm:$0xf0]  ;;  %v4681_v61 = vld [vmem:[%s7932_s1 + $0x2c] sm:$0xf0] }
 0x3cb   :  { %v2040_v45 = vsel %vm2039_vm5, %v4983_v31, %v2036_v50  ;;  %v4697_v50 = vld [vmem:[%s7932_s1 + $0xac] sm:$0xf0] }
 0x3cc   :  { %v2045_v13 = vsel %vm2042_vm7, %v2044_v11, %v2040_v45  ;;  %2715 = vmatpush.bf16.msra.mxu2 %v4315_v20  ;;  %v4299_v11 = vor.u32 %v4702_v1, %v4298_v0  ;;  %v4275_v45 = vor.u32 %v4697_v50, %v4274_v32  ;;  %2702 = vmatpush.bf16.msra.mxu1 %v4295_v6 }
 0x3cd   :  { %v4987_v49 = vpop.eup %4986  ;;  %v4259_v50 = vor.u32 %v4693_v48, %v4258_v63  ;;  %v4228_v48 = vld [vmem:[%s7932_s1 + $0x50] sm:$0xf0] }
 0x3ce   :  { %v2058_v55 = vmul.f32 %v4987_v49, %v2045_v13  ;;  %v4303_v49 = vor.u32 %v4700_v2, %v4300_v3  ;;  %v4282_v13 = vld [vmem:[%s7932_s1 + $0xa8] sm:$0xf]  ;;  %2689 = vmatpush.bf16.msra.mxu0 %v4275_v45  ;;  %v4738_v3 = vld [vmem:[%s7932_s1 + $0xec] sm:$0xf0] }
 0x3d0   :  { %v4783_v17 = vpack.c.bf16 %v2058_v55, %v2057_v15  ;;  %v4698_v15 = vld [vmem:[%s7932_s1 + $0xb4] sm:$0xf0]  ;;  %2716 = vmatpush.bf16.msra.mxu2 %v4299_v11  ;;  %2730 = vmatpush.bf16.msra.mxu3 %v4303_v49 }
 0x3d2   :  { %4823 = vst [vmem:[%s7934_s2 + $0x20] sm:$0xff] %v4783_v17   ;;  %2690 = vmatpush.bf16.msra.mxu0 %v4259_v50 }
 0x3d3   :  { %4784 = vst [vmem:[#allocation2] sm:$0xff] %v4783_v17  }
 0x3da   :  { %v4641_v58 = vld [vmem:[#allocation2] sm:$0xff] }
 0x3db   :  { %2285 = vmatmul.bf16.vlgmr.msrb.gmra.mxu0 %v4641_v58  ;;  %2299 = vmatmul.bf16.vlgmr.msrb.gmra.mxu1 %v4641_v58 }
 0x3dc   :  { %2313 = vmatmul.bf16.vlgmr.msrb.gmra.mxu2 %v4641_v58  ;;  %2327 = vmatmul.bf16.vlgmr.msrb.gmra.mxu3 %v4641_v58 }
 0x458   :  { %v2286_v47 = vpop.f32.mrf.mxu0  ;;  %v2300_v19 = vpop.f32.mrf.mxu1 }
 0x459   :  { %v2333_v23 = vadd.f32 %v4032_v22, %v2286_v47  ;;  %v2334_v26 = vadd.f32 %v4033_v7, %v2300_v19  ;;  %v4279_v22 = vor.u32 %v4695_v46, %v4276_v25  ;;  %v4677_v25 = vld [vmem:[%s7932_s1 + $0xc] sm:$0xf0] }
 0x45b   :  { %v4172_v27 = vmul.f32 -1.442695, %v2333_v23  ;;  %v4174_v4 = vmul.f32 -1.442695, %v2334_v26  ;;  %v4283_v26 = vor.u32 %v4698_v15, %v4282_v13  ;;  %2703 = vmatpush.bf16.msra.mxu1 %v4279_v22  ;;  %v4687_v13 = vld [vmem:[%s7932_s1 + $0x64] sm:$0xf] }
 0x45c   :  { %v4244_v15 = vld [vmem:[%s7932_s1 + $0x70] sm:$0xf0] }
 0x45d   :  { %4988 = vpow2.f32 %v4172_v27  ;;  %2717 = vmatpush.bf16.msra.mxu2 %v4283_v26  ;;  %v4252_v26 = vld [vmem:[%s7932_s1 + $0x78] sm:$0xf0] }
 0x45e   :  { %4990 = vpow2.f32 %v4174_v4 }
 0x45f   :  { %v2328_v16 = vpop.f32.mrf.mxu3  ;;  %v2314_v18 = vpop.f32.mrf.mxu2 }
 0x460   :  { %v2336_v35 = vadd.f32 %v4035_v28, %v2328_v16  ;;  %v2288_v37 = vpop.f32.mrf.mxu0  ;;  %v2302_v21 = vpop.f32.mrf.mxu1  ;;  %v4034_v28 = vld [vmem:[%s7933_s0 + $0x150] sm:$0xff] }
 0x461   :  { %v2337_v33 = vadd.f32 %v4036_v29, %v2288_v37  ;;  %v2338_v41 = vadd.f32 %v4037_v8, %v2302_v21  ;;  %v2335_v12 = vadd.f32 %v4034_v28, %v2314_v18 }
 0x462   :  { %v4176_v40 = vmul.f32 -1.442695, %v2336_v35  ;;  %v4038_v35 = vld [vmem:[%s7933_s0 + $0x170] sm:$0xff] }
 0x463   :  { %v4989_v56 = vpop.eup %4988  ;;  %v4173_v36 = vmul.f32 -1.442695, %v2337_v33  ;;  %v4175_v53 = vmul.f32 -1.442695, %v2338_v41  ;;  %v4696_v33 = vld [vmem:[%s7932_s1 + $0xac] sm:$0xf] }
 0x464   :  { %v4991_v31 = vpop.eup %4990  ;;  %v7165_v52 = vadd.f32 1.0, %v4989_v56  ;;  %4992 = vpow2.f32 %v4176_v40  ;;  %v4284_v41 = vld [vmem:[%s7932_s1 + $0xb8] sm:$0xf0] }
 0x465   :  { %v7170_v60 = vadd.f32 1.0, %v4991_v31  ;;  %4994 = vpow2.f32 %v4173_v36  ;;  %v4691_v36 = vld [vmem:[%s7932_s1 + $0x84] sm:$0xf]  ;;  %v4287_v18 = vor.u32 %v4696_v33, %v4284_v41 }
 0x466   :  { %4996 = vrcp.f32 %v7165_v52  ;;  %v2358_v47 = vand.u32 2147483647, %v7165_v52  ;;  %v2360_v19 = vand.u32 2147483648, %v7165_v52  ;;  %vm2354_vm8 = vweird.f32 %v7165_v52  ;;  %v4683_v41 = vld [vmem:[%s7932_s1 + $0x44] sm:$0xf] }
 0x467   :  { %4998 = vrcp.f32 %v7170_v60  ;;  %v2330_v59 = vpop.f32.mrf.mxu3  ;;  %v2398_v16 = vand.u32 2147483648, %v7170_v60  ;;  %v2396_v5 = vand.u32 2147483647, %v7170_v60  ;;  %v2316_v37 = vpop.f32.mrf.mxu2  ;;  %vm2392_vm12 = vweird.f32 %v7170_v60  ;;  %2731 = vmatpush.bf16.msra.mxu3 %v4287_v18 }
 0x468   :  { %5000 = vpow2.f32 %v4175_v53  ;;  %v2340_v58 = vadd.f32 %v4039_v43, %v2330_v59  ;;  %vm7240_vm9 = vcmp.eq.f32.partialorder %v2358_v47, 8.507059e+37  ;;  %v7244_v51 = vor.u32 1.1754944e-38, %v2360_v19  ;;  %v4242_v43 = vld [vmem:[%s7932_s1 + $0x60] sm:$0xf]  ;;  %v4690_v47 = vld [vmem:[%s7932_s1 + $0x74] sm:$0xf0] }
 0x469   :  { %v2339_v10 = vadd.f32 %v4038_v35, %v2316_v37  ;;  %v2399_v53 = vor.u32 1.1754944e-38, %v2398_v16  ;;  %vm7290_vm14 = vcmp.eq.f32.partialorder %v2396_v5, 8.507059e+37  ;;  %v4263_v46 = vor.u32 %v4691_v36, %v4260_v62  ;;  %v4688_v19 = vld [vmem:[%s7932_s1 + $0x6c] sm:$0xf]  ;;  %v4686_v36 = vld [vmem:[%s7932_s1 + $0x54] sm:$0xf0] }
 0x46a   :  { %v4993_v14 = vpop.eup %4992  ;;  %v4177_v21 = vmul.f32 -1.442695, %v2340_v58  ;;  %v4247_v37 = vor.u32 %v4687_v13, %v4244_v15  ;;  %v4684_v62 = vld [vmem:[%s7932_s1 + $0x4c] sm:$0xf] }
 0x46b   :  { %v4995_v55 = vpop.eup %4994  ;;  %v7213_v17 = vadd.f32 1.0, %v4993_v14  ;;  %v4689_v14 = vld [vmem:[%s7932_s1 + $0x6c] sm:$0xf0]  ;;  %2704 = vmatpush.bf16.msra.mxu1 %v4263_v46 }
 0x46c   :  { %v7215_v7 = vpop.eup %4996  ;;  %v7219_v23 = vadd.f32 1.0, %v4995_v55  ;;  %v4250_v55 = vld [vmem:[%s7932_s1 + $0x68] sm:$0xf]  ;;  %v4243_v35 = vor.u32 %v4689_v14, %v4242_v43  ;;  %v4682_v43 = vld [vmem:[%s7932_s1 + $0x34] sm:$0xf0] }
 0x46d   :  { %v7221_v27 = vpop.eup %4998  ;;  %v2350_v4 = vmul.f32 %v7215_v7, %v7165_v52  ;;  %5002 = vrcp.f32 %v7213_v17  ;;  %vm2355_vm10 = vweird.f32 %v7215_v7  ;;  %v4268_v52 = vld [vmem:[%s7932_s1 + $0x98] sm:$0xf0]  ;;  %v4680_v14 = vld [vmem:[%s7932_s1 + $0x2c] sm:$0xf] }
 0x46e   :  { %v5001_v29 = vpop.eup %5000  ;;  %v2388_v8 = vmul.f32 %v7221_v27, %v7170_v60  ;;  %5004 = vrcp.f32 %v7219_v23  ;;  %vm2393_vm11 = vweird.f32 %v7221_v27  ;;  %v2373_v56 = vand.u32 2147483647, %v7219_v23  ;;  %vm7285_vm13 = vmor %vm2354_vm8, %vm2355_vm10  ;;  %v4692_v60 = vld [vmem:[%s7932_s1 + $0x8c] sm:$0xf]  ;;  %2691 = vmatpush.bf16.msra.mxu0 %v4243_v35 }
 0x46f   :  { %v2351_v30 = vsub.f32 1.0, %v2350_v4  ;;  %v7234_v24 = vadd.f32 1.0, %v5001_v29  ;;  %v2375_v2 = vand.u32 2147483648, %v7219_v23  ;;  %vm7308_vm15 = vmor %vm2392_vm12, %vm2393_vm11  ;;  %vm2369_vm1 = vweird.f32 %v7219_v23  ;;  %v4226_v29 = vld [vmem:[%s7932_s1 + $0x40] sm:$0xf]  ;;  %2705 = vmatpush.bf16.msra.mxu1 %v4247_v37 }
 0x470   :  { %v2389_v39 = vsub.f32 1.0, %v2388_v8  ;;  %vm7327_vm0 = vcmp.eq.f32.partialorder %v2373_v56, 8.507059e+37  ;;  %v4685_v8 = vld [vmem:[%s7932_s1 + $0x4c] sm:$0xf0] }
 0x471   :  { %v2352_v44 = vmul.f32 %v7215_v7, %v2351_v30  ;;  %5006 = vrcp.f32 %v7234_v24  ;;  %v2413_v20 = vand.u32 2147483648, %v7234_v24  ;;  %v2411_v6 = vand.u32 2147483647, %v7234_v24 }
 0x472   :  { %v2390_v40 = vmul.f32 %v7221_v27, %v2389_v39  ;;  %5008 = vpow2.f32 %v4177_v21  ;;  %v2376_v28 = vor.u32 1.1754944e-38, %v2375_v2  ;;  %v4271_v30 = vor.u32 %v4692_v60, %v4268_v52  ;;  %v4212_v60 = vld [vmem:[%s7932_s1 + $0x30] sm:$0xf0]  ;;  %v4218_v52 = vld [vmem:[%s7932_s1 + $0x28] sm:$0xf] }
 0x473   :  { %v7271_v31 = vpop.eup %5002  ;;  %v2353_v38 = vadd.f32 %v7215_v7, %v2352_v44  ;;  %v7312_v32 = vor.u32 1.1754944e-38, %v2413_v20  ;;  %5010 = vtanh.f32 %v2335_v12  ;;  %v4251_v44 = vor.u32 %v4690_v47, %v4250_v55 }
 0x474   :  { %v2391_v0 = vadd.f32 %v7221_v27, %v2390_v40  ;;  %v7304_v59 = vpop.eup %5004  ;;  %v7323_v49 = vmul.f32 %v7271_v31, %v7213_v17  ;;  %5012 = vtanh.f32 %v2339_v10  ;;  %2732 = vmatpush.bf16.msra.mxu3 %v4271_v30  ;;  %v4255_v20 = vor.u32 %v4688_v19, %v4252_v26  ;;  %v4234_v40 = vld [vmem:[%s7932_s1 + $0x48] sm:$0xf] }
 0x475   :  { %v2357_v11 = vsel %vm7285_vm13, %v7215_v7, %v2353_v38  ;;  %v2365_v45 = vmul.f32 %v7304_v59, %v7219_v23  ;;  %v4267_v7 = vor.u32 %v4694_v57, %v4266_v54  ;;  %vm2370_vm2 = vweird.f32 %v7304_v59  ;;  %v4210_v57 = vld [vmem:[%s7932_s1 + $0x20] sm:$0xf]  ;;  %v4202_v26 = vld [vmem:[%s7932_s1 + $0x8] sm:$0xf] }
 0x476   :  { %v2395_v22 = vsel %vm7308_vm15, %v7221_v27, %v2391_v0  ;;  %v2362_v5 = vsel %vm7240_vm9, %v7244_v51, %v2357_v11  ;;  %v2429_v39 = vsub.f32 1.0, %v7323_v49  ;;  %vm7378_vm3 = vmor %vm2369_vm1, %vm2370_vm2  ;;  %v4227_v63 = vor.u32 %v4685_v8, %v4226_v29  ;;  %v4679_v0 = vld [vmem:[%s7932_s1 + $0x24] sm:$0xf] }
 0x477   :  { %v7340_v58 = vpop.eup %5006  ;;  %v2366_v4 = vsub.f32 1.0, %v2365_v45  ;;  %2718 = vmatpush.bf16.msra.mxu2 %v4267_v7  ;;  %v2400_v21 = vsel %vm7290_vm14, %v2399_v53, %v2395_v22  ;;  %v4236_v53 = vld [vmem:[%s7932_s1 + $0x58] sm:$0xf0]  ;;  %vm2407_vm5 = vweird.f32 %v7234_v24  ;;  %v4231_v2 = vor.u32 %v4683_v41, %v4228_v48  ;;  %v4675_v22 = vld [vmem:[%s7932_s1 + $0x4] sm:$0xf] }
 0x478   :  { %v2403_v27 = vmul.f32 %v7340_v58, %v7234_v24  ;;  %v5009_v16 = vpop.eup %5008  ;;  %vm2408_vm4 = vweird.f32 %v7340_v58  ;;  %v2459_v18 = vmul.f32 %v2400_v21, %v7083_v42  ;;  %vm2412_vm7 = vcmp.eq.f32.partialorder %v2411_v6, 8.507059e+37  ;;  %2733 = vmatpush.bf16.msra.mxu3 %v4255_v20  ;;  %2692 = vmatpush.bf16.msra.mxu0 %v4227_v63  ;;  %v4220_v24 = vld [vmem:[%s7932_s1 + $0x38] sm:$0xf0]  ;;  %v4194_v6 = vld [vmem:[%s7932_s1] sm:$0xf] }
 0x479   :  { %v2367_v33 = vmul.f32 %v7304_v59, %v2366_v4  ;;  %v7382_v51 = vadd.f32 1.0, %v5009_v16  ;;  %v5011_v23 = vpop.eup %5010  ;;  %vm7429_vm6 = vmor %vm2407_vm5, %vm2408_vm4  ;;  %v4235_v50 = vor.u32 %v4686_v36, %v4234_v40  ;;  %v4239_v46 = vor.u32 %v4684_v62, %v4236_v53  ;;  %2706 = vmatpush.bf16.msra.mxu1 %v4231_v2  ;;  %v4196_v7 = vld [vmem:[%s7932_s1 + $0x10] sm:$0xf0]  ;;  %v4184_v2 = vld [vmem:[%s7933_s0 + $0x1a0] sm:$0xff] }
 0x47a   :  { %v2404_v12 = vsub.f32 1.0, %v2403_v27  ;;  %v5013_v38 = vpop.eup %5012  ;;  %v2461_v54 = vmul.f32 %v5011_v23, %v2362_v5  ;;  %v4211_v45 = vor.u32 %v4681_v61, %v4210_v57  ;;  %v4215_v55 = vor.u32 %v4679_v0, %v4212_v60  ;;  %v4204_v5 = vld [vmem:[%s7932_s1 + $0x18] sm:$0xf0]  ;;  %v4185_v60 = vld [vmem:[%s7933_s0 + $0x1a8] sm:$0xff] }
 0x47b   :  { %v2368_v56 = vadd.f32 %v7304_v59, %v2367_v33  ;;  %5014 = vrcp.f32 %v7382_v51  ;;  %2719 = vmatpush.bf16.msra.mxu2 %v4251_v44  ;;  %v2430_v47 = vmul.f32 %v7271_v31, %v2429_v39  ;;  %v4223_v27 = vor.u32 %v4680_v14, %v4220_v24  ;;  %v4739_v24 = vld [vmem:[%s7932_s1 + $0xf4] sm:$0xf0] }
 0x47c   :  { %v2405_v10 = vmul.f32 %v7340_v58, %v2404_v12  ;;  %v7452_v13 = vadd.f32 %v2461_v54, %v2459_v18  ;;  %2734 = vmatpush.bf16.msra.mxu3 %v4239_v46  ;;  %2693 = vmatpush.bf16.msra.mxu0 %v4211_v45  ;;  %v4199_v16 = vor.u32 %v4675_v22, %v4196_v7  ;;  %vm2433_vm8 = vweird.f32 %v7271_v31  ;;  %v4462_v45 = vld [vmem:[%s7932_s1 + $0xe8] sm:$0xf]  ;;  %v4464_v22 = vld [vmem:[%s7932_s1 + $0xf8] sm:$0xf0] }
 0x47d   :  { %v2372_v42 = vsel %vm7378_vm3, %v7304_v59, %v2368_v56  ;;  %2707 = vmatpush.bf16.msra.mxu1 %v4215_v55  ;;  %v2431_v35 = vadd.f32 %v7271_v31, %v2430_v47  ;;  %vm2432_vm9 = vweird.f32 %v7213_v17  ;;  %v2438_v21 = vand.u32 2147483648, %v7213_v17 }
 0x47e   :  { %v2406_v1 = vadd.f32 %v7340_v58, %v2405_v10  ;;  %v2377_v59 = vsel %vm7327_vm0, %v2376_v28, %v2372_v42  ;;  %v4195_v28 = vor.u32 %v4677_v25, %v4194_v6  ;;  %5016 = vtanh.f32 %v7452_v13  ;;  %vm2434_vm11 = vmor %vm2432_vm9, %vm2433_vm8 }
 0x47f   :  { %v2462_v49 = vmul.f32 %v5013_v38, %v2377_v59  ;;  %2720 = vmatpush.bf16.msra.mxu2 %v4235_v50  ;;  %v2453_v39 = vand.u32 2147483648, %v7382_v51  ;;  %v2436_v33 = vand.u32 2147483647, %v7213_v17  ;;  %v2451_v9 = vand.u32 2147483647, %v7382_v51  ;;  %v4181_v38 = vld [vmem:[%s7933_s0 + $0x188] sm:$0xff] }
 0x480   :  { %v2410_v11 = vsel %vm7429_vm6, %v7340_v58, %v2406_v1  ;;  %v4219_v58 = vor.u32 %v4682_v43, %v4218_v52  ;;  %2735 = vmatpush.bf16.msra.mxu3 %v4223_v27  ;;  %2694 = vmatpush.bf16.msra.mxu0 %v4195_v28  ;;  %v2435_v44 = vsel %vm2434_vm11, %v7271_v31, %v2431_v35  ;;  %vm2447_vm12 = vweird.f32 %v7382_v51  ;;  %v4183_v1 = vld [vmem:[%s7933_s0 + $0x198] sm:$0xff]  ;;  %v4454_v43 = vld [vmem:[%s7932_s1 + $0xe0] sm:$0xf]  ;;  %v4736_v59 = vld [vmem:[%s7932_s1 + $0xe4] sm:$0xf] }
 0x481   :  { %v2415_v15 = vsel %vm2412_vm7, %v7312_v32, %v2410_v11  ;;  %v4678_v32 = vld [vmem:[%s7932_s1 + $0x14] sm:$0xf0]  ;;  %v5015_v4 = vpop.eup %5014  ;;  %2708 = vmatpush.bf16.msra.mxu1 %v4199_v16  ;;  %v2439_v48 = vor.u32 1.1754944e-38, %v2438_v21  ;;  %v2454_v40 = vor.u32 1.1754944e-38, %v2453_v39  ;;  %vm2437_vm14 = vcmp.eq.f32.partialorder %v2436_v33, 8.507059e+37 }
 0x482   :  { %v2460_v19 = vmul.f32 %v2415_v15, %v7100_v34  ;;  %v2443_v8 = vmul.f32 %v5015_v4, %v7382_v51  ;;  %v4676_v34 = vld [vmem:[%s7932_s1 + $0xc] sm:$0xf]  ;;  %v4203_v30 = vor.u32 %v4678_v32, %v4202_v26  ;;  %vm2448_vm10 = vweird.f32 %v5015_v4  ;;  %v4180_v51 = vld [vmem:[%s7933_s0 + $0x180] sm:$0xff]  ;;  %v4440_v35 = vld [vmem:[%s7932_s1 + $0xd0] sm:$0xf0] }
 0x483   :  { %2721 = vmatpush.bf16.msra.mxu2 %v4219_v58  ;;  %v4207_v12 = vor.u32 %v4676_v34, %v4204_v5  ;;  %vm2449_vm13 = vmor %vm2447_vm12, %vm2448_vm10  ;;  %vm2452_vm15 = vcmp.eq.f32.partialorder %v2451_v9, 8.507059e+37  ;;  %v2440_v10 = vsel %vm2437_vm14, %v2439_v48, %v2435_v44  ;;  %v4455_v11 = vor.u32 %v4738_v3, %v4454_v43  ;;  %v4737_v58 = vld [vmem:[%s7932_s1 + $0xec] sm:$0xf]  ;;  %v4438_v32 = vld [vmem:[%s7932_s1 + $0xc0] sm:$0xf] }
 0x484   :  { %v7469_v29 = vadd.f32 %v2462_v49, %v2460_v19  ;;  %v2444_v37 = vsub.f32 1.0, %v2443_v8  ;;  %v5017_v63 = vpop.eup %5016  ;;  %v4456_v49 = vld [vmem:[%s7932_s1 + $0xf0] sm:$0xf0]  ;;  %v4463_v55 = vor.u32 %v4739_v24, %v4462_v45  ;;  %v4467_v47 = vor.u32 %v4737_v58, %v4464_v22  ;;  %v4734_v8 = vld [vmem:[%s7932_s1 + $0xcc] sm:$0xf0] }
 0x485   :  { %2736 = vmatpush.bf16.msra.mxu3 %v4207_v12  ;;  %v2467_v36 = vmul.f32 %v5017_v63, %v2440_v10  ;;  %v4459_v15 = vor.u32 %v4736_v59, %v4456_v49  ;;  %3097 = vmatpush.bf16.msrb.mxu0 %v4455_v11  ;;  %v4439_v5 = vor.u32 %v4734_v8, %v4438_v32  ;;  %v4735_v21 = vld [vmem:[%s7932_s1 + $0xd4] sm:$0xf0]  ;;  %v4733_v39 = vld [vmem:[%s7932_s1 + $0xcc] sm:$0xf]  ;;  %v4422_v9 = vld [vmem:[%s7932_s1 + $0xa0] sm:$0xf] }
 0x486   :  { %5018 = vtanh.f32 %v7469_v29  ;;  %v2445_v41 = vmul.f32 %v5015_v4, %v2444_v37  ;;  %v4446_v37 = vld [vmem:[%s7932_s1 + $0xc8] sm:$0xf]  ;;  %v4187_v12 = vld [vmem:[%s7933_s0 + $0x1b8] sm:$0xff]  ;;  %v4728_v63 = vld [vmem:[%s7932_s1 + $0xa4] sm:$0xf] }
 0x487   :  { %2722 = vmatpush.bf16.msra.mxu2 %v4203_v30  ;;  %3111 = vmatpush.bf16.msrb.mxu1 %v4459_v15  ;;  %v4732_v30 = vld [vmem:[%s7932_s1 + $0xc4] sm:$0xf]  ;;  %v4424_v10 = vld [vmem:[%s7932_s1 + $0xb0] sm:$0xf0]  ;;  %v4406_v58 = vld [vmem:[%s7932_s1 + $0x80] sm:$0xf] }
 0x488   :  { %v2446_v20 = vadd.f32 %v5015_v4, %v2445_v41  ;;  %v4448_v41 = vld [vmem:[%s7932_s1 + $0xd8] sm:$0xf0]  ;;  %v4443_v44 = vor.u32 %v4732_v30, %v4440_v35  ;;  %v4726_v22 = vld [vmem:[%s7932_s1 + $0x8c] sm:$0xf0]  ;;  %v4408_v32 = vld [vmem:[%s7932_s1 + $0x90] sm:$0xf0] }
 0x489   :  { %3139 = vmatpush.bf16.msrb.mxu3 %v4467_v47  ;;  %3098 = vmatpush.bf16.msrb.mxu0 %v4439_v5  ;;  %v4414_v5 = vld [vmem:[%s7932_s1 + $0x88] sm:$0xf]  ;;  %v4727_v30 = vld [vmem:[%s7932_s1 + $0x94] sm:$0xf0]  ;;  %v4714_v35 = vld [vmem:[%s7932_s1 + $0x2c] sm:$0xf0] }
 0x48a   :  { %v2450_v17 = vsel %vm2449_vm13, %v5015_v4, %v2446_v20  ;;  %v4730_v20 = vld [vmem:[%s7932_s1 + $0xac] sm:$0xf0] }
 0x48b   :  { %v2455_v56 = vsel %vm2452_vm15, %v2454_v40, %v2450_v17  ;;  %3125 = vmatpush.bf16.msrb.mxu2 %v4463_v55  ;;  %v4447_v40 = vor.u32 %v4735_v21, %v4446_v37  ;;  %v4423_v17 = vor.u32 %v4730_v20, %v4422_v9  ;;  %3112 = vmatpush.bf16.msrb.mxu1 %v4443_v44 }
 0x48c   :  { %v5019_v23 = vpop.eup %5018  ;;  %v4407_v20 = vor.u32 %v4726_v22, %v4406_v58  ;;  %v4376_v22 = vld [vmem:[%s7932_s1 + $0x50] sm:$0xf0] }
 0x48d   :  { %v2468_v62 = vmul.f32 %v5019_v23, %v2455_v56  ;;  %v4451_v23 = vor.u32 %v4733_v39, %v4448_v41  ;;  %v4430_v56 = vld [vmem:[%s7932_s1 + $0xa8] sm:$0xf]  ;;  %3099 = vmatpush.bf16.msrb.mxu0 %v4423_v17 }
 0x48f   :  { %v4793_v53 = vpack.c.bf16 %v2468_v62, %v2467_v36  ;;  %v4731_v36 = vld [vmem:[%s7932_s1 + $0xb4] sm:$0xf0]  ;;  %3126 = vmatpush.bf16.msrb.mxu2 %v4447_v40  ;;  %3140 = vmatpush.bf16.msrb.mxu3 %v4451_v23 }
 0x491   :  { %4824 = vst [vmem:[%s7934_s2 + $0x28] sm:$0xff] %v4793_v53   ;;  %3100 = vmatpush.bf16.msrb.mxu0 %v4407_v20 }
 0x492   :  { %4794 = vst [vmem:[#allocation2] sm:$0xff] %v4793_v53  }
 0x499   :  { %v4674_v31 = vld [vmem:[#allocation2] sm:$0xff] }
 0x49a   :  { %2695 = vmatmul.bf16.vlgmr.msra.gmra.mxu0 %v4674_v31  ;;  %2709 = vmatmul.bf16.vlgmr.msra.gmra.mxu1 %v4674_v31 }
 0x49b   :  { %2723 = vmatmul.bf16.vlgmr.msra.gmra.mxu2 %v4674_v31  ;;  %2737 = vmatmul.bf16.vlgmr.msra.gmra.mxu3 %v4674_v31 }
 0x517   :  { %v2696_v18 = vpop.f32.mrf.mxu0  ;;  %v2710_v54 = vpop.f32.mrf.mxu1 }
 0x518   :  { %v2743_v57 = vadd.f32 %v4180_v51, %v2696_v18  ;;  %v2744_v61 = vadd.f32 %v4181_v38, %v2710_v54  ;;  %v4427_v51 = vor.u32 %v4728_v63, %v4424_v10  ;;  %v4710_v10 = vld [vmem:[%s7932_s1 + $0xc] sm:$0xf0] }
 0x51a   :  { %v4320_v0 = vmul.f32 -1.442695, %v2743_v57  ;;  %v4322_v42 = vmul.f32 -1.442695, %v2744_v61  ;;  %v4431_v61 = vor.u32 %v4731_v36, %v4430_v56  ;;  %3113 = vmatpush.bf16.msrb.mxu1 %v4427_v51  ;;  %v4720_v56 = vld [vmem:[%s7932_s1 + $0x64] sm:$0xf] }
 0x51b   :  { %v4392_v36 = vld [vmem:[%s7932_s1 + $0x70] sm:$0xf0] }
 0x51c   :  { %5020 = vpow2.f32 %v4320_v0  ;;  %3127 = vmatpush.bf16.msrb.mxu2 %v4431_v61  ;;  %v4400_v61 = vld [vmem:[%s7932_s1 + $0x78] sm:$0xf0] }
 0x51d   :  { %5022 = vpow2.f32 %v4322_v42 }
 0x51e   :  { %v2738_v52 = vpop.f32.mrf.mxu3  ;;  %v2724_v34 = vpop.f32.mrf.mxu2 }
 0x51f   :  { %v2746_v50 = vadd.f32 %v4183_v1, %v2738_v52  ;;  %v2698_v46 = vpop.f32.mrf.mxu0  ;;  %v2712_v14 = vpop.f32.mrf.mxu1  ;;  %v4182_v1 = vld [vmem:[%s7933_s0 + $0x190] sm:$0xff] }
 0x520   :  { %v2747_v6 = vadd.f32 %v4184_v2, %v2698_v46  ;;  %v2748_v25 = vadd.f32 %v4185_v60, %v2712_v14  ;;  %v2745_v49 = vadd.f32 %v4182_v1, %v2724_v34 }
 0x521   :  { %v4324_v7 = vmul.f32 -1.442695, %v2746_v50  ;;  %v4186_v50 = vld [vmem:[%s7933_s0 + $0x1b0] sm:$0xff] }
 0x522   :  { %v5021_v19 = vpop.eup %5020  ;;  %v4321_v26 = vmul.f32 -1.442695, %v2747_v6  ;;  %v4323_v28 = vmul.f32 -1.442695, %v2748_v25  ;;  %v4729_v6 = vld [vmem:[%s7932_s1 + $0xac] sm:$0xf] }
 0x523   :  { %v5023_v4 = vpop.eup %5022  ;;  %v7534_v27 = vadd.f32 1.0, %v5021_v19  ;;  %5024 = vpow2.f32 %v4324_v7  ;;  %v4432_v25 = vld [vmem:[%s7932_s1 + $0xb8] sm:$0xf0] }
 0x524   :  { %v7539_v16 = vadd.f32 1.0, %v5023_v4  ;;  %5026 = vpow2.f32 %v4321_v26  ;;  %v4724_v26 = vld [vmem:[%s7932_s1 + $0x84] sm:$0xf]  ;;  %v4435_v34 = vor.u32 %v4729_v6, %v4432_v25 }
 0x525   :  { %5028 = vrcp.f32 %v7534_v27  ;;  %v2768_v18 = vand.u32 2147483647, %v7534_v27  ;;  %v2770_v54 = vand.u32 2147483648, %v7534_v27  ;;  %vm2764_vm0 = vweird.f32 %v7534_v27  ;;  %v4716_v25 = vld [vmem:[%s7932_s1 + $0x44] sm:$0xf] }
 0x526   :  { %5030 = vrcp.f32 %v7539_v16  ;;  %v2740_v33 = vpop.f32.mrf.mxu3  ;;  %v2808_v52 = vand.u32 2147483648, %v7539_v16  ;;  %v2806_v43 = vand.u32 2147483647, %v7539_v16  ;;  %v2726_v46 = vpop.f32.mrf.mxu2  ;;  %vm2802_vm4 = vweird.f32 %v7539_v16  ;;  %3141 = vmatpush.bf16.msrb.mxu3 %v4435_v34 }
 0x527   :  { %5032 = vpow2.f32 %v4323_v28  ;;  %v2750_v31 = vadd.f32 %v4187_v12, %v2740_v33  ;;  %vm7609_vm1 = vcmp.eq.f32.partialorder %v2768_v18, 8.507059e+37  ;;  %v7613_v24 = vor.u32 1.1754944e-38, %v2770_v54  ;;  %v4390_v12 = vld [vmem:[%s7932_s1 + $0x60] sm:$0xf]  ;;  %v4723_v18 = vld [vmem:[%s7932_s1 + $0x74] sm:$0xf0] }
 0x528   :  { %v2749_v47 = vadd.f32 %v4186_v50, %v2726_v46  ;;  %v2809_v28 = vor.u32 1.1754944e-38, %v2808_v52  ;;  %vm7659_vm6 = vcmp.eq.f32.partialorder %v2806_v43, 8.507059e+37  ;;  %v4411_v63 = vor.u32 %v4724_v26, %v4408_v32  ;;  %v4721_v54 = vld [vmem:[%s7932_s1 + $0x6c] sm:$0xf]  ;;  %v4719_v26 = vld [vmem:[%s7932_s1 + $0x54] sm:$0xf0] }
 0x529   :  { %v5025_v48 = vpop.eup %5024  ;;  %v4325_v14 = vmul.f32 -1.442695, %v2750_v31  ;;  %v4395_v46 = vor.u32 %v4720_v56, %v4392_v36  ;;  %v4717_v32 = vld [vmem:[%s7932_s1 + $0x4c] sm:$0xf] }
 0x52a   :  { %v5027_v62 = vpop.eup %5026  ;;  %v7582_v53 = vadd.f32 1.0, %v5025_v48  ;;  %v4722_v48 = vld [vmem:[%s7932_s1 + $0x6c] sm:$0xf0]  ;;  %3114 = vmatpush.bf16.msrb.mxu1 %v4411_v63 }
 0x52b   :  { %v7584_v38 = vpop.eup %5028  ;;  %v7588_v57 = vadd.f32 1.0, %v5027_v62  ;;  %v4398_v62 = vld [vmem:[%s7932_s1 + $0x68] sm:$0xf]  ;;  %v4391_v50 = vor.u32 %v4722_v48, %v4390_v12  ;;  %v4715_v12 = vld [vmem:[%s7932_s1 + $0x34] sm:$0xf0] }
 0x52c   :  { %v7590_v0 = vpop.eup %5030  ;;  %v2760_v42 = vmul.f32 %v7584_v38, %v7534_v27  ;;  %5034 = vrcp.f32 %v7582_v53  ;;  %vm2765_vm2 = vweird.f32 %v7584_v38  ;;  %v4416_v27 = vld [vmem:[%s7932_s1 + $0x98] sm:$0xf0]  ;;  %v4713_v48 = vld [vmem:[%s7932_s1 + $0x2c] sm:$0xf] }
 0x52d   :  { %v5033_v2 = vpop.eup %5032  ;;  %v2798_v60 = vmul.f32 %v7590_v0, %v7539_v16  ;;  %5036 = vrcp.f32 %v7588_v57  ;;  %vm2803_vm3 = vweird.f32 %v7590_v0  ;;  %v2783_v19 = vand.u32 2147483647, %v7588_v57  ;;  %vm7654_vm5 = vmor %vm2764_vm0, %vm2765_vm2  ;;  %v4725_v16 = vld [vmem:[%s7932_s1 + $0x8c] sm:$0xf]  ;;  %3101 = vmatpush.bf16.msrb.mxu0 %v4391_v50 }
 0x52e   :  { %v2761_v3 = vsub.f32 1.0, %v2760_v42  ;;  %v7603_v59 = vadd.f32 1.0, %v5033_v2  ;;  %v2785_v39 = vand.u32 2147483648, %v7588_v57  ;;  %vm7677_vm7 = vmor %vm2802_vm4, %vm2803_vm3  ;;  %vm2779_vm9 = vweird.f32 %v7588_v57  ;;  %v4374_v2 = vld [vmem:[%s7932_s1 + $0x40] sm:$0xf]  ;;  %3115 = vmatpush.bf16.msrb.mxu1 %v4395_v46 }
 0x52f   :  { %v2799_v11 = vsub.f32 1.0, %v2798_v60  ;;  %vm7696_vm8 = vcmp.eq.f32.partialorder %v2783_v19, 8.507059e+37  ;;  %v4718_v60 = vld [vmem:[%s7932_s1 + $0x4c] sm:$0xf0] }
 0x530   :  { %v2762_v15 = vmul.f32 %v7584_v38, %v2761_v3  ;;  %5038 = vrcp.f32 %v7603_v59  ;;  %v2823_v55 = vand.u32 2147483648, %v7603_v59  ;;  %v2821_v44 = vand.u32 2147483647, %v7603_v59 }
 0x531   :  { %v2800_v7 = vmul.f32 %v7590_v0, %v2799_v11  ;;  %5040 = vpow2.f32 %v4325_v14  ;;  %v2786_v1 = vor.u32 1.1754944e-38, %v2785_v39  ;;  %v4419_v3 = vor.u32 %v4725_v16, %v4416_v27  ;;  %v4360_v16 = vld [vmem:[%s7932_s1 + $0x30] sm:$0xf0]  ;;  %v4366_v27 = vld [vmem:[%s7932_s1 + $0x28] sm:$0xf] }
 0x532   :  { %v7640_v4 = vpop.eup %5034  ;;  %v2763_v8 = vadd.f32 %v7584_v38, %v2762_v15  ;;  %v7681_v9 = vor.u32 1.1754944e-38, %v2823_v55  ;;  %5042 = vtanh.f32 %v2745_v49  ;;  %v4399_v15 = vor.u32 %v4723_v18, %v4398_v62 }
 0x533   :  { %v2801_v37 = vadd.f32 %v7590_v0, %v2800_v7  ;;  %v7673_v33 = vpop.eup %5036  ;;  %v7692_v23 = vmul.f32 %v7640_v4, %v7582_v53  ;;  %5044 = vtanh.f32 %v2749_v47  ;;  %3142 = vmatpush.bf16.msrb.mxu3 %v4419_v3  ;;  %v4403_v55 = vor.u32 %v4721_v54, %v4400_v61  ;;  %v4382_v7 = vld [vmem:[%s7932_s1 + $0x48] sm:$0xf] }
 0x534   :  { %v2767_v40 = vsel %vm7654_vm5, %v7584_v38, %v2763_v8  ;;  %v2775_v17 = vmul.f32 %v7673_v33, %v7588_v57  ;;  %v4415_v38 = vor.u32 %v4727_v30, %v4414_v5  ;;  %vm2780_vm10 = vweird.f32 %v7673_v33  ;;  %v4358_v30 = vld [vmem:[%s7932_s1 + $0x20] sm:$0xf]  ;;  %v4350_v61 = vld [vmem:[%s7932_s1 + $0x8] sm:$0xf] }
 0x535   :  { %v2805_v51 = vsel %vm7677_vm7, %v7590_v0, %v2801_v37  ;;  %v2772_v43 = vsel %vm7609_vm1, %v7613_v24, %v2767_v40  ;;  %v2839_v11 = vsub.f32 1.0, %v7692_v23  ;;  %vm7747_vm11 = vmor %vm2779_vm9, %vm2780_vm10  ;;  %v4375_v58 = vor.u32 %v4718_v60, %v4374_v2  ;;  %v4712_v37 = vld [vmem:[%s7932_s1 + $0x24] sm:$0xf] }
 0x536   :  { %v7709_v31 = vpop.eup %5038  ;;  %v2776_v42 = vsub.f32 1.0, %v2775_v17  ;;  %3128 = vmatpush.bf16.msrb.mxu2 %v4415_v38  ;;  %v2810_v14 = vsel %vm7659_vm6, %v2809_v28, %v2805_v51  ;;  %v4384_v28 = vld [vmem:[%s7932_s1 + $0x58] sm:$0xf0]  ;;  %vm2817_vm13 = vweird.f32 %v7603_v59  ;;  %v4379_v39 = vor.u32 %v4716_v25, %v4376_v22  ;;  %v4708_v51 = vld [vmem:[%s7932_s1 + $0x4] sm:$0xf] }
 0x537   :  { %v2813_v0 = vmul.f32 %v7709_v31, %v7603_v59  ;;  %v5041_v52 = vpop.eup %5040  ;;  %vm2818_vm12 = vweird.f32 %v7709_v31  ;;  %v2869_v34 = vmul.f32 %v2810_v14, %v7452_v13  ;;  %vm2822_vm15 = vcmp.eq.f32.partialorder %v2821_v44, 8.507059e+37  ;;  %3143 = vmatpush.bf16.msrb.mxu3 %v4403_v55  ;;  %3102 = vmatpush.bf16.msrb.mxu0 %v4375_v58  ;;  %v4368_v59 = vld [vmem:[%s7932_s1 + $0x38] sm:$0xf0]  ;;  %v4342_v44 = vld [vmem:[%s7932_s1] sm:$0xf] }
 0x538   :  { %v2777_v6 = vmul.f32 %v7673_v33, %v2776_v42  ;;  %v7751_v24 = vadd.f32 1.0, %v5041_v52  ;;  %v5043_v57 = vpop.eup %5042  ;;  %vm7798_vm14 = vmor %vm2817_vm13, %vm2818_vm12  ;;  %v4383_v20 = vor.u32 %v4719_v26, %v4382_v7  ;;  %v4387_v63 = vor.u32 %v4717_v32, %v4384_v28  ;;  %3116 = vmatpush.bf16.msrb.mxu1 %v4379_v39  ;;  %v4344_v38 = vld [vmem:[%s7932_s1 + $0x10] sm:$0xf0]  ;;  %v4332_v39 = vld [vmem:[%s7933_s0 + $0x1e0] sm:$0xff] }
 0x539   :  { %v2814_v49 = vsub.f32 1.0, %v2813_v0  ;;  %v5045_v8 = vpop.eup %5044  ;;  %v2871_v5 = vmul.f32 %v5043_v57, %v2772_v43  ;;  %v4359_v17 = vor.u32 %v4714_v35, %v4358_v30  ;;  %v4363_v62 = vor.u32 %v4712_v37, %v4360_v16  ;;  %v4352_v43 = vld [vmem:[%s7932_s1 + $0x18] sm:$0xf0]  ;;  %v4333_v16 = vld [vmem:[%s7933_s0 + $0x1e8] sm:$0xff] }
 0x53a   :  { %v2778_v19 = vadd.f32 %v7673_v33, %v2777_v6  ;;  %5046 = vrcp.f32 %v7751_v24  ;;  %3129 = vmatpush.bf16.msrb.mxu2 %v4399_v15  ;;  %v2840_v18 = vmul.f32 %v7640_v4, %v2839_v11  ;;  %v4371_v0 = vor.u32 %v4713_v48, %v4368_v59 }
 0x53b   :  { %v2815_v47 = vmul.f32 %v7709_v31, %v2814_v49  ;;  %v7821_v56 = vadd.f32 %v2871_v5, %v2869_v34  ;;  %3144 = vmatpush.bf16.msrb.mxu3 %v4387_v63  ;;  %3103 = vmatpush.bf16.msrb.mxu0 %v4359_v17  ;;  %v4347_v52 = vor.u32 %v4708_v51, %v4344_v38  ;;  %vm2843_vm0 = vweird.f32 %v7640_v4 }
 0x53c   :  { %v2782_v13 = vsel %vm7747_vm11, %v7673_v33, %v2778_v19  ;;  %3117 = vmatpush.bf16.msrb.mxu1 %v4363_v62  ;;  %v2841_v50 = vadd.f32 %v7640_v4, %v2840_v18  ;;  %vm2842_vm1 = vweird.f32 %v7582_v53  ;;  %v2848_v14 = vand.u32 2147483648, %v7582_v53  ;;  %v4335_v62 = vld [vmem:[%s7933_s0 + $0x1f8] sm:$0xff] }
 0x53d   :  { %v2816_v21 = vadd.f32 %v7709_v31, %v2815_v47  ;;  %v2787_v33 = vsel %vm7696_vm8, %v2786_v1, %v2782_v13  ;;  %v4343_v1 = vor.u32 %v4710_v10, %v4342_v44  ;;  %5048 = vtanh.f32 %v7821_v56  ;;  %vm2844_vm3 = vmor %vm2842_vm1, %vm2843_vm0 }
 0x53e   :  { %v2872_v23 = vmul.f32 %v5045_v8, %v2787_v33  ;;  %3130 = vmatpush.bf16.msrb.mxu2 %v4383_v20  ;;  %v2863_v11 = vand.u32 2147483648, %v7751_v24  ;;  %v2846_v6 = vand.u32 2147483647, %v7582_v53  ;;  %v2861_v45 = vand.u32 2147483647, %v7751_v24  ;;  %v4329_v8 = vld [vmem:[%s7933_s0 + $0x1c8] sm:$0xff] }
 0x53f   :  { %v2820_v40 = vsel %vm7798_vm14, %v7709_v31, %v2816_v21  ;;  %v4367_v31 = vor.u32 %v4715_v12, %v4366_v27  ;;  %3145 = vmatpush.bf16.msrb.mxu3 %v4371_v0  ;;  %3104 = vmatpush.bf16.msrb.mxu0 %v4343_v1  ;;  %v2845_v15 = vsel %vm2844_vm3, %v7640_v4, %v2841_v50  ;;  %vm2857_vm4 = vweird.f32 %v7751_v24  ;;  %v4331_v21 = vld [vmem:[%s7933_s0 + $0x1d8] sm:$0xff] }
 0x540   :  { %v2825_v36 = vsel %vm2822_vm15, %v7681_v9, %v2820_v40  ;;  %v4711_v9 = vld [vmem:[%s7932_s1 + $0x14] sm:$0xf0]  ;;  %v5047_v42 = vpop.eup %5046  ;;  %3118 = vmatpush.bf16.msrb.mxu1 %v4347_v52  ;;  %v2849_v22 = vor.u32 1.1754944e-38, %v2848_v14  ;;  %v2864_v7 = vor.u32 1.1754944e-38, %v2863_v11  ;;  %vm2847_vm6 = vcmp.eq.f32.partialorder %v2846_v6, 8.507059e+37  ;;  %v4330_v52 = vld [vmem:[%s7933_s0 + $0x1d0] sm:$0xff] }
 0x541   :  { %v2870_v54 = vmul.f32 %v2825_v36, %v7469_v29  ;;  %v2853_v60 = vmul.f32 %v5047_v42, %v7751_v24  ;;  %v4709_v29 = vld [vmem:[%s7932_s1 + $0xc] sm:$0xf]  ;;  %v4351_v3 = vor.u32 %v4711_v9, %v4350_v61  ;;  %vm2858_vm2 = vweird.f32 %v5047_v42  ;;  %v4328_v24 = vld [vmem:[%s7933_s0 + $0x1c0] sm:$0xff]  ;;  %v4334_v11 = vld [vmem:[%s7933_s0 + $0x1f0] sm:$0xff] }
 0x542   :  { %3131 = vmatpush.bf16.msrb.mxu2 %v4367_v31  ;;  %v4355_v49 = vor.u32 %v4709_v29, %v4352_v43  ;;  %vm2859_vm5 = vmor %vm2857_vm4, %vm2858_vm2  ;;  %vm2862_vm7 = vcmp.eq.f32.partialorder %v2861_v45, 8.507059e+37  ;;  %v2850_v47 = vsel %vm2847_vm6, %v2849_v22, %v2845_v15 }
 0x543   :  { %v7838_v2 = vadd.f32 %v2872_v23, %v2870_v54  ;;  %v2854_v46 = vsub.f32 1.0, %v2853_v60  ;;  %v5049_v58 = vpop.eup %5048 }
 0x544   :  { %3146 = vmatpush.bf16.msrb.mxu3 %v4355_v49  ;;  %v2877_v26 = vmul.f32 %v5049_v58, %v2850_v47 }
 0x545   :  { %5050 = vtanh.f32 %v7838_v2  ;;  %v2855_v25 = vmul.f32 %v5047_v42, %v2854_v46 }
 0x546   :  { %3132 = vmatpush.bf16.msrb.mxu2 %v4351_v3 }
 0x547   :  { %v2856_v55 = vadd.f32 %v5047_v42, %v2855_v25 }
 0x549   :  { %v2860_v53 = vsel %vm2859_vm5, %v5047_v42, %v2856_v55 }
 0x54a   :  { %v2865_v19 = vsel %vm2862_vm7, %v2864_v7, %v2860_v53 }
 0x54b   :  { %v5051_v57 = vpop.eup %5050 }
 0x54c   :  { %v2878_v32 = vmul.f32 %v5051_v57, %v2865_v19 }
 0x54e   :  { %v4803_v28 = vpack.c.bf16 %v2878_v32, %v2877_v26 }
 0x550   :  { %4825 = vst [vmem:[%s7934_s2 + $0x30] sm:$0xff] %v4803_v28  }
 0x551   :  { %4804 = vst [vmem:[#allocation2] sm:$0xff] %v4803_v28  }
 0x558   :  { %v4707_v4 = vld [vmem:[#allocation2] sm:$0xff] }
 0x559   :  { %3105 = vmatmul.bf16.vlgmr.msrb.gmra.mxu0 %v4707_v4  ;;  %3119 = vmatmul.bf16.vlgmr.msrb.gmra.mxu1 %v4707_v4 }
 0x55a   :  { %3133 = vmatmul.bf16.vlgmr.msrb.gmra.mxu2 %v4707_v4  ;;  %3147 = vmatmul.bf16.vlgmr.msrb.gmra.mxu3 %v4707_v4 }
 0x5d6   :  { %v3106_v34 = vpop.f32.mrf.mxu0  ;;  %v3120_v5 = vpop.f32.mrf.mxu1 }
 0x5d7   :  { %v3153_v30 = vadd.f32 %v4328_v24, %v3106_v34  ;;  %v3154_v35 = vadd.f32 %v4329_v8, %v3120_v5 }
 0x5d9   :  { %v4468_v37 = vmul.f32 -1.442695, %v3153_v30  ;;  %v4470_v13 = vmul.f32 -1.442695, %v3154_v35 }
 0x5db   :  { %5052 = vpow2.f32 %v4468_v37 }
 0x5dc   :  { %5054 = vpow2.f32 %v4470_v13 }
 0x5dd   :  { %v3148_v27 = vpop.f32.mrf.mxu3  ;;  %v3134_v36 = vpop.f32.mrf.mxu2 }
 0x5de   :  { %v3156_v12 = vadd.f32 %v4331_v21, %v3148_v27  ;;  %v3108_v41 = vpop.f32.mrf.mxu0  ;;  %v3122_v33 = vpop.f32.mrf.mxu1  ;;  %v3155_v46 = vadd.f32 %v4330_v52, %v3134_v36 }
 0x5df   :  { %v3157_v20 = vadd.f32 %v4332_v39, %v3108_v41  ;;  %v3158_v63 = vadd.f32 %v4333_v16, %v3122_v33 }
 0x5e0   :  { %v4472_v48 = vmul.f32 -1.442695, %v3156_v12 }
 0x5e1   :  { %v5053_v40 = vpop.eup %5052  ;;  %v4469_v23 = vmul.f32 -1.442695, %v3157_v20  ;;  %v4471_v44 = vmul.f32 -1.442695, %v3158_v63 }
 0x5e2   :  { %v5055_v17 = vpop.eup %5054  ;;  %v3167_v59 = vadd.f32 1.0, %v5053_v40  ;;  %5056 = vpow2.f32 %v4472_v48 }
 0x5e3   :  { %v3205_v10 = vadd.f32 1.0, %v5055_v17  ;;  %5058 = vpow2.f32 %v4469_v23 }
 0x5e4   :  { %5060 = vrcp.f32 %v3167_v59  ;;  %v3178_v25 = vand.u32 2147483647, %v3167_v59  ;;  %v3180_v45 = vand.u32 2147483648, %v3167_v59  ;;  %vm3174_vm10 = vweird.f32 %v3167_v59 }
 0x5e5   :  { %5062 = vrcp.f32 %v3205_v10  ;;  %v3150_v31 = vpop.f32.mrf.mxu3  ;;  %v3136_v49 = vpop.f32.mrf.mxu2  ;;  %v3218_v15 = vand.u32 2147483648, %v3205_v10  ;;  %v3216_v22 = vand.u32 2147483647, %v3205_v10  ;;  %vm3212_vm11 = vweird.f32 %v3205_v10 }
 0x5e6   :  { %5064 = vpow2.f32 %v4471_v44  ;;  %v3160_v18 = vadd.f32 %v4335_v62, %v3150_v31  ;;  %v3159_v7 = vadd.f32 %v4334_v11, %v3136_v49  ;;  %vm3179_vm14 = vcmp.eq.f32.partialorder %v3178_v25, 8.507059e+37 }
 0x5e7   :  { %v3219_v4 = vor.u32 1.1754944e-38, %v3218_v15  ;;  %v3181_v24 = vor.u32 1.1754944e-38, %v3180_v45  ;;  %vm3217_vm15 = vcmp.eq.f32.partialorder %v3216_v22, 8.507059e+37 }
 0x5e8   :  { %v5057_v51 = vpop.eup %5056  ;;  %v4473_v3 = vmul.f32 -1.442695, %v3160_v18 }
 0x5e9   :  { %v5059_v38 = vpop.eup %5058  ;;  %v7879_v61 = vadd.f32 1.0, %v5057_v51 }
 0x5ea   :  { %v5061_v54 = vpop.eup %5060  ;;  %v7881_v9 = vadd.f32 1.0, %v5059_v38 }
 0x5eb   :  { %v5063_v42 = vpop.eup %5062  ;;  %v3170_v0 = vmul.f32 %v5061_v54, %v3167_v59  ;;  %vm3175_vm8 = vweird.f32 %v5061_v54 }
 0x5ec   :  { %v5065_v1 = vpop.eup %5064  ;;  %v3208_v60 = vmul.f32 %v5063_v42, %v3205_v10  ;;  %5066 = vrcp.f32 %v7881_v9  ;;  %vm3213_vm9 = vweird.f32 %v5063_v42  ;;  %vm7894_vm12 = vmor %vm3174_vm10, %vm3175_vm8  ;;  %v3193_v13 = vand.u32 2147483647, %v7881_v9 }
 0x5ed   :  { %v3171_v29 = vsub.f32 1.0, %v3170_v0  ;;  %v7887_v43 = vadd.f32 1.0, %v5065_v1  ;;  %5068 = vrcp.f32 %v7879_v61  ;;  %vm7900_vm13 = vmor %vm3212_vm11, %vm3213_vm9  ;;  %v3195_v21 = vand.u32 2147483648, %v7881_v9 }
 0x5ee   :  { %v3209_v50 = vsub.f32 1.0, %v3208_v60  ;;  %vm3189_vm2 = vweird.f32 %v7881_v9  ;;  %vm3194_vm5 = vcmp.eq.f32.partialorder %v3193_v13, 8.507059e+37  ;;  %vm3252_vm9 = vweird.f32 %v7879_v61 }
 0x5ef   :  { %v3172_v14 = vmul.f32 %v5061_v54, %v3171_v29  ;;  %5070 = vrcp.f32 %v7887_v43  ;;  %vm3227_vm1 = vweird.f32 %v7887_v43  ;;  %v3233_v12 = vand.u32 2147483648, %v7887_v43 }
 0x5f0   :  { %v3210_v6 = vmul.f32 %v5063_v42, %v3209_v50  ;;  %5072 = vpow2.f32 %v4473_v3  ;;  %v3231_v48 = vand.u32 2147483647, %v7887_v43  ;;  %v3196_v17 = vor.u32 1.1754944e-38, %v3195_v21 }
 0x5f1   :  { %v3173_v55 = vadd.f32 %v5061_v54, %v3172_v14  ;;  %5074 = vtanh.f32 %v3155_v46  ;;  %v3234_v62 = vor.u32 1.1754944e-38, %v3233_v12  ;;  %v3258_v29 = vand.u32 2147483648, %v7879_v61 }
 0x5f2   :  { %v3211_v58 = vadd.f32 %v5063_v42, %v3210_v6  ;;  %v5067_v57 = vpop.eup %5066  ;;  %5076 = vtanh.f32 %v3159_v7  ;;  %vm3232_vm7 = vcmp.eq.f32.partialorder %v3231_v48, 8.507059e+37  ;;  %v3256_v3 = vand.u32 2147483647, %v7879_v61 }
 0x5f3   :  { %v7898_v47 = vpop.eup %5068  ;;  %v3177_v26 = vsel %vm7894_vm12, %v5061_v54, %v3173_v55  ;;  %v3185_v32 = vmul.f32 %v5067_v57, %v7881_v9  ;;  %vm3190_vm0 = vweird.f32 %v5067_v57  ;;  %v3259_v49 = vor.u32 1.1754944e-38, %v3258_v29 }
 0x5f4   :  { %v3215_v8 = vsel %vm7900_vm13, %v5063_v42, %v3211_v58  ;;  %v3182_v35 = vsel %vm3179_vm14, %v3181_v24, %v3177_v26  ;;  %v3248_v37 = vmul.f32 %v7898_v47, %v7879_v61  ;;  %vm3191_vm4 = vmor %vm3189_vm2, %vm3190_vm0  ;;  %vm3253_vm8 = vweird.f32 %v7898_v47 }
 0x5f5   :  { %v5071_v28 = vpop.eup %5070  ;;  %v3186_v34 = vsub.f32 1.0, %v3185_v32  ;;  %v3220_v39 = vsel %vm3217_vm15, %v3219_v4, %v3215_v8  ;;  %vm3254_vm11 = vmor %vm3252_vm9, %vm3253_vm8  ;;  %vm3257_vm14 = vcmp.eq.f32.partialorder %v3256_v3, 8.507059e+37 }
 0x5f6   :  { %v3223_v5 = vmul.f32 %v5071_v28, %v7887_v43  ;;  %v5073_v30 = vpop.eup %5072  ;;  %vm3228_vm3 = vweird.f32 %v5071_v28  ;;  %v3279_v40 = vmul.f32 %v3220_v39, %v7821_v56  ;;  %v3249_v44 = vsub.f32 1.0, %v3248_v37 }
 0x5f7   :  { %v3187_v27 = vmul.f32 %v5067_v57, %v3186_v34  ;;  %v3246_v41 = vadd.f32 1.0, %v5073_v30  ;;  %v5075_v33 = vpop.eup %5074  ;;  %vm3229_vm6 = vmor %vm3227_vm1, %vm3228_vm3 }
 0x5f8   :  { %v3224_v16 = vsub.f32 1.0, %v3223_v5  ;;  %v3281_v23 = vmul.f32 %v5075_v33, %v3182_v35  ;;  %v5077_v59 = vpop.eup %5076  ;;  %v3250_v56 = vmul.f32 %v7898_v47, %v3249_v44 }
 0x5f9   :  { %v3188_v63 = vadd.f32 %v5067_v57, %v3187_v27  ;;  %5078 = vrcp.f32 %v3246_v41  ;;  %v3273_v43 = vand.u32 2147483648, %v3246_v41  ;;  %vm3267_vm12 = vweird.f32 %v3246_v41 }
 0x5fa   :  { %v3225_v20 = vmul.f32 %v5071_v28, %v3224_v16  ;;  %v3283_v18 = vadd.f32 %v3281_v23, %v3279_v40  ;;  %v3251_v60 = vadd.f32 %v7898_v47, %v3250_v56 }
 0x5fb   :  { %v3192_v10 = vsel %vm3191_vm4, %v5067_v57, %v3188_v63  ;;  %v3274_v6 = vor.u32 1.1754944e-38, %v3273_v43 }
 0x5fc   :  { %v3226_v36 = vadd.f32 %v5071_v28, %v3225_v20  ;;  %v3197_v31 = vsel %vm3194_vm5, %v3196_v17, %v3192_v10  ;;  %5080 = vtanh.f32 %v3283_v18  ;;  %v3255_v46 = vsel %vm3254_vm11, %v7898_v47, %v3251_v60 }
 0x5fd   :  { %v3282_v38 = vmul.f32 %v5077_v59, %v3197_v31  ;;  %v3260_v15 = vsel %vm3257_vm14, %v3259_v49, %v3255_v46 }
 0x5fe   :  { %v3230_v51 = vsel %vm3229_vm6, %v5071_v28, %v3226_v36 }
 0x5ff   :  { %v3235_v54 = vsel %vm3232_vm7, %v3234_v62, %v3230_v51  ;;  %v5079_v42 = vpop.eup %5078 }
 0x600   :  { %v3280_v9 = vmul.f32 %v3235_v54, %v7838_v2  ;;  %v3263_v1 = vmul.f32 %v5079_v42, %v3246_v41  ;;  %vm3268_vm10 = vweird.f32 %v5079_v42  ;;  %v3271_v2 = vand.u32 2147483647, %v3246_v41 }
 0x601   :  { %vm3269_vm13 = vmor %vm3267_vm12, %vm3268_vm10 }
 0x602   :  { %v3284_v0 = vadd.f32 %v3282_v38, %v3280_v9  ;;  %v3264_v52 = vsub.f32 1.0, %v3263_v1  ;;  %v5081_v11 = vpop.eup %5080  ;;  %vm3272_vm15 = vcmp.eq.f32.partialorder %v3271_v2, 8.507059e+37 }
 0x603   :  { %v3287_v58 = vmul.f32 %v5081_v11, %v3260_v15 }
 0x604   :  { %5082 = vtanh.f32 %v3284_v0  ;;  %v3265_v50 = vmul.f32 %v5079_v42, %v3264_v52 }
 0x606   :  { %v3266_v14 = vadd.f32 %v5079_v42, %v3265_v50 }
 0x608   :  { %v3270_v45 = vsel %vm3269_vm13, %v5079_v42, %v3266_v14 }
 0x609   :  { %v3275_v55 = vsel %vm3272_vm15, %v3274_v6, %v3270_v45 }
 0x60a   :  { %v5083_v25 = vpop.eup %5082 }
 0x60b   :  { %v3288_v61 = vmul.f32 %v5083_v25, %v3275_v55 }
 0x60d   :  { %v4813_v22 = vpack.c.bf16 %v3288_v61, %v3287_v58 }
 0x60f   :  { %4814 = vst [vmem:[#allocation2] sm:$0xff] %v4813_v22  }
 0x610   :  { %4826 = vst [vmem:[%s7934_s2 + $0x38] sm:$0xff] %v4813_v22  }

</bundles_post_ra>
